<compile_context>
chip_gen: v5e
topology: v5e:2x2
jax: 0.10.0
libtpu: 0.0.40
codegen_flags: <defaults>
</compile_context>

<pallas_src>
import numpy as np
import jax
import jax.numpy as jnp
from jax import lax
from jax.experimental import pallas as pl
from jax.experimental.pallas import tpu as pltpu

KSIZE = 5          # hetconv kernel size
PAD = 2            # padding (same-length conv)
NEG_SLOPE = 0.01   # LeakyReLU slope
BN_EPS = 1e-5

OUT_FULL = 221
OUT_FOCUS1 = 145
OUT_FOCUS2 = 51

NUM_CONV = 6
# Layers 2..6 run inside the kernel.  Output halos per layer decrease by 4
# rows/side so every activation row count stays a multiple of 8.
KERNEL_HALOS = (16, 12, 8, 4, 0)
HALO_IN = KERNEL_HALOS[0] + 2 * PAD      # 20: halo of the layer-1 activation tiles
DEFAULT_TILE_L = 2048                    # compute-bound kernel -> big tiles

LAYER_CFGS = [  # (cin, cout, groups) — matches HetCNN_1d_Forward.__init__
    (1, 16, 1), (16, 16, 4), (16, 64, 4), (64, 64, 4), (64, 256, 4), (256, 256, 4),
]


# ---------------------------------------------------------------------------
# Fused Pallas kernel: hetconv2..6 + BN(shift) + LeakyReLU + global avg pool
# ---------------------------------------------------------------------------
def _make_kernel(seq_len, tile_l, nt_per_split):
    halos = KERNEL_HALOS
    t_sizes = tuple(tile_l + 2 * h for h in halos)     # 8-aligned row counts

    def kernel(x_ref, w2, s2, w3, s3, w4, s4, w5, s5, w6, s6,
               out_ref, a2, a3, a4, a5):
        c = pl.program_id(1)
        j = pl.program_id(2)
        t0 = (c * nt_per_split + j) * tile_l           # global start row of tile

        def conv5(win, w_ref, t_out):
            # k=5 "same" conv as 5 shifted MXU matmuls; win(k) -> (t_out, Cin)
            acc = jnp.dot(win(0), w_ref[0], preferred_element_type=jnp.float32)
            for k in range(1, KSIZE):
                acc = acc + jnp.dot(win(k), w_ref[k],
                                    preferred_element_type=jnp.float32)
            return acc

        def shift_lrelu(acc, s_ref):
            # BN scale already folded into the conv weights; only "+ shift".
            y = acc + s_ref[0]
            return jnp.maximum(y, NEG_SLOPE * y)       # LeakyReLU (mul + max)

        def mask_edges(dst_ref, halo, t_out):
            # Reproduce per-layer zero padding: zero rows whose global position
            # is outside [0, seq_len).  Interior tiles provably need no mask,
            # so the whole body is skipped.
            @pl.when((t0 < halo) | (t0 + tile_l + halo > seq_len))
            def _():
                g = lax.broadcasted_iota(jnp.int32, (t_out, 1), 0) + (t0 - halo)
                valid = ((g >= 0) & (g < seq_len)).astype(dst_ref.dtype)
                dst_ref[...] = dst_ref[...] * valid

        # ---- layers 2..5: conv -> shift -> LeakyReLU -> VMEM scratch (+mask)
        layer_io = (
            (lambda k, t: x_ref[0, 0, 2 + k:2 + k + t, :], w2, s2, a2),
            (lambda k, t: a2[2 + k:2 + k + t, :], w3, s3, a3),
            (lambda k, t: a3[2 + k:2 + k + t, :], w4, s4, a4),
            (lambda k, t: a4[2 + k:2 + k + t, :], w5, s5, a5),
        )
        for li, (src, w_ref, s_ref, dst_ref) in enumerate(layer_io):
            t_out = t_sizes[li]
            y = shift_lrelu(conv5(lambda k: src(k, t_out), w_ref, t_out), s_ref)
            dst_ref[...] = y.astype(dst_ref.dtype)
            mask_edges(dst_ref, halos[li], t_out)

        # ---- layer 6 (256 -> 256): halo 0, rows [t0, t0 + tile_l), f32
        y6 = shift_lrelu(conv5(lambda k: a5[2 + k:2 + k + tile_l, :], w6, tile_l),
                         s6)

        # ---- fused global-average-pool partial: masked-ones row x activation
        # on the MXU.  The ones row doubles as the "rows >= seq_len" mask.
        gcol = lax.broadcasted_iota(jnp.int32, (1, tile_l), 1) + t0
        ones = (gcol < seq_len).astype(jnp.float32)                  # (1, tile_l)
        part = jnp.dot(ones, y6, preferred_element_type=jnp.float32)  # (1, 256)

        @pl.when(j == 0)
        def _():
            out_ref[...] = jnp.zeros(out_ref.shape, jnp.float32)
        out_ref[0, 0] = out_ref[0, 0] + part

    return kernel


# ---------------------------------------------------------------------------
# Wrapper helpers
# ---------------------------------------------------------------------------
def _round_up(v, m):
    return ((v + m - 1) // m) * m


def _const_spec(arr):
    nd = arr.ndim
    return pl.BlockSpec(arr.shape, lambda n, c, j, _nd=nd: (0,) * _nd)


def _vmem_limit_bytes(tile_l):
    """Right-sized scoped-VMEM budget: double-buffered input tiles + layer
    scratches + weights, with a 2x margin for compiler temporaries / spills."""
    lane = 128
    t_in = tile_l + 2 * HALO_IN
    inp = 2 * t_in * lane * 2                                        # bf16 tiles
    scratch = ((tile_l + 32) * lane + (tile_l + 24) * lane
               + (tile_l + 16) * lane + (tile_l + 8) * 256) * 2      # bf16
    weights = 2 * 2 * KSIZE * (16 * 16 + 16 * 64 + 64 * 64 + 64 * 256 + 256 * 256)
    acc = 2 * (tile_l + 8) * 256 * 4                                 # f32 temps
    est = inp + scratch + weights + acc
    return int(min(64 << 20, max(16 << 20, 2 * est + (4 << 20))))


def _layer1_xla(x_ncl, l1_params):
    """Layer 1 (HetConv1d 1->16 + BN + LeakyReLU) in XLA (f32)."""
    w1, shift1 = l1_params                       # (16, 1, 5) scale-folded, (16,)
    y = lax.conv_general_dilated(
        x_ncl.astype(jnp.float32), w1, (1,), [(PAD, PAD)],
        dimension_numbers=("NCH", "OIH", "NCH"),
        precision=lax.Precision.HIGHEST)
    y = y + shift1[None, :, None]
    y = jnp.maximum(y, NEG_SLOPE * y)
    return jnp.transpose(y, (0, 2, 1))           # (N, L, 16) f32


def _build_tiles(a1_nlc, tile_l, nt_pad, dtype):
    """(N, L, 16) -> (N, nt_pad, tile_l + 2*HALO_IN, 16) haloed tiles.
    Zero-fill outside [0, L) supplies the layer-2 boundary padding."""
    N, L, C = a1_nlc.shape
    t_in = tile_l + 2 * HALO_IN
    pad_r = nt_pad * tile_l - L + HALO_IN
    a1p = jnp.pad(a1_nlc, ((0, 0), (HALO_IN, pad_r), (0, 0)))
    idx = jnp.arange(nt_pad)[:, None] * tile_l + jnp.arange(t_in)[None, :]
    return a1p[:, idx, :].astype(dtype)          # (N, nt_pad, t_in, 16)


def hetcnn_forward(x_ncl, prepared, tile_l=DEFAULT_TILE_L, core_split=1):
    """Forward pass.  core_split > 1 shards the L axis across TensorCores
    (v7x small-batch case); per-split pool partials are combined here."""
    l1_params, conv_folded, fc_params = prepared
    N, C, L = x_ncl.shape
    assert C == 1, "HetCNN_1d_Forward expects a single input channel"
    compute_dtype = conv_folded[0][0].dtype

    tile_l = max(8, _round_up(min(tile_l, _round_up(L, 8)), 8))
    nt = pl.cdiv(L, tile_l)
    nt_per_split = pl.cdiv(nt, core_split)
    nt_pad = core_split * nt_per_split
    t_in = tile_l + 2 * HALO_IN

    a1 = _layer1_xla(x_ncl, l1_params)
    x_tiles = _build_tiles(a1, tile_l, nt_pad, compute_dtype)

    inputs = [x_tiles]
    in_specs = [pl.BlockSpec(
        (1, 1, t_in, 16),
        lambda n, c, j, _nps=nt_per_split: (n, c * _nps + j, 0, 0))]
    for w, s in conv_folded:                     # VMEM-resident folded weights
        inputs += [w, s]
        in_specs += [_const_spec(w), _const_spec(s)]

    scratch_shapes = [
        pltpu.VMEM((tile_l + 2 * h, ch), compute_dtype)
        for h, ch in zip(KERNEL_HALOS[:4], (16, 64, 64, 256))
    ]

    pooled_parts = pl.pallas_call(
        _make_kernel(L, tile_l, nt_per_split),
        out_shape=jax.ShapeDtypeStruct((N, core_split, 1, 256), jnp.float32),
        grid=(N, core_split, nt_per_split),
        in_specs=in_specs,
        out_specs=pl.BlockSpec((1, 1, 1, 256), lambda n, c, j: (n, c, 0, 0)),
        scratch_shapes=scratch_shapes,
        compiler_params=pltpu.CompilerParams(
            # batch and L-split axes are megacore-parallel; the L-tile axis
            # carries the fused pool accumulator so it stays "arbitrary".
            dimension_semantics=("parallel", "parallel", "arbitrary"),
            vmem_limit_bytes=_vmem_limit_bytes(tile_l)),
    )(*inputs)

    pooled = jnp.sum(pooled_parts[:, :, 0, :], axis=1) * (1.0 / L)   # (N, 256)

    # fc + three heads batched over N in XLA (f32).
    # TODO(synk): Dropout1d(0.5) is identity in eval mode; training-mode
    # channel masking is not implemented.
    (wfc, bfc), (wfull, bfull), (wf1, bf1), (wf2, bf2) = fc_params
    hp = lax.Precision.HIGHEST
    h = jnp.dot(pooled, wfc.T, precision=hp) + bfc
    return (jnp.dot(h, wfull.T, precision=hp) + bfull,
            jnp.dot(h, wf1.T, precision=hp) + bf1,
            jnp.dot(h, wf2.T, precision=hp) + bf2)


# ---------------------------------------------------------------------------
# Parameter construction (deterministic, synthetic) and one-time folding
# ---------------------------------------------------------------------------
def init_params(key):
    keys = list(jax.random.split(key, 8 * len(LAYER_CFGS) + 8))
    ki = iter(keys)
    conv_layers = []
    for (cin, cout, g) in LAYER_CFGS:
        conv_layers.append(dict(
            cin=cin, cout=cout, groups=g,
            w_gwc=0.1 * jax.random.normal(next(ki), (cout, cin // g, KSIZE), jnp.float32),
            w_pwc=0.1 * jax.random.normal(next(ki), (cout, cin, 1), jnp.float32),
            gamma=1.0 + 0.1 * jax.random.normal(next(ki), (cout,), jnp.float32),
            beta=0.1 * jax.random.normal(next(ki), (cout,), jnp.float32),
            rmean=0.1 * jax.random.normal(next(ki), (cout,), jnp.float32),
            rvar=jnp.abs(jax.random.normal(next(ki), (cout,), jnp.float32)) + 0.5,
        ))

    def linear(k, din, dout):
        kw, kb = jax.random.split(k)
        return (0.05 * jax.random.normal(kw, (dout, din), jnp.float32),
                0.05 * jax.random.normal(kb, (dout,), jnp.float32))

    fc_params = (linear(next(ki), 256, 512),
                 linear(next(ki), 512, OUT_FULL),
                 linear(next(ki), 512, OUT_FOCUS1),
                 linear(next(ki), 512, OUT_FOCUS2))
    return conv_layers, fc_params


def _expand_grouped(w_gwc, cin, cout, groups):
    """Grouped conv weight (cout, cin//g, K) -> block-diagonal dense (cout, cin, K)."""
    cin_g, cout_g = cin // groups, cout // groups
    dense = jnp.zeros((cout, cin, KSIZE), jnp.float32)
    for g in range(groups):
        dense = dense.at[g * cout_g:(g + 1) * cout_g,
                         g * cin_g:(g + 1) * cin_g, :].set(
            w_gwc[g * cout_g:(g + 1) * cout_g])
    return dense


def prepare_params(conv_layers, fc_params, dtype=jnp.bfloat16):
    """One-time folding (in f32, cast last): grouped->dense, pwc->centre tap,
    BN scale folded into the conv weights (shift kept separate)."""
    l1 = None
    folded = []
    for i, lp in enumerate(conv_layers):
        dense = _expand_grouped(lp["w_gwc"], lp["cin"], lp["cout"], lp["groups"])
        comb = dense.at[:, :, PAD].add(lp["w_pwc"][:, :, 0])     # pwc == centre tap
        scale = lp["gamma"] / jnp.sqrt(lp["rvar"] + BN_EPS)
        shift = lp["beta"] - lp["rmean"] * scale
        comb = comb * scale[:, None, None]                       # fold BN scale (f32)
        if i == 0:
            l1 = (comb, shift)                                   # wrapper-side, f32
        else:
            w = jnp.transpose(comb, (2, 1, 0)).astype(dtype)     # (K, Cin, Cout)
            folded.append((w, shift.reshape(1, -1).astype(jnp.float32)))
    return l1, tuple(folded), fc_params


# ---------------------------------------------------------------------------
# Pure-JAX f32 reference (module semantics)
# ---------------------------------------------------------------------------
def ref_forward(x_ncl, conv_layers, fc_params):
    hp = lax.Precision.HIGHEST
    y = x_ncl
    for lp in conv_layers:
        gwc = lax.conv_general_dilated(
            y, lp["w_gwc"], (1,), [(PAD, PAD)],
            dimension_numbers=("NCH", "OIH", "NCH"),
            feature_group_count=lp["groups"], precision=hp)
        pwc = lax.conv_general_dilated(
            y, lp["w_pwc"], (1,), [(0, 0)],
            dimension_numbers=("NCH", "OIH", "NCH"), precision=hp)
        z = gwc + pwc
        scale = lp["gamma"] / jnp.sqrt(lp["rvar"] + BN_EPS)
        shift = lp["beta"] - lp["rmean"] * scale
        z = z * scale[None, :, None] + shift[None, :, None]
        y = jnp.where(z > 0, z, NEG_SLOPE * z)
    pooled = y.mean(axis=-1)
    (wfc, bfc), (wfull, bfull), (wf1, bf1), (wf2, bf2) = fc_params
    h = jnp.dot(pooled, wfc.T, precision=hp) + bfc
    return (jnp.dot(h, wfull.T, precision=hp) + bfull,
            jnp.dot(h, wf1.T, precision=hp) + bf1,
            jnp.dot(h, wf2.T, precision=hp) + bf2)


if __name__ == "__main__":
    key = jax.random.PRNGKey(0)
    k_param, k_x1, k_x2, k_x3 = jax.random.split(key, 4)

    conv_layers, fc_params = init_params(k_param)
    prepared = prepare_params(conv_layers, fc_params)   # folded once, bf16 MXU weights

    fwd = jax.jit(hetcnn_forward, static_argnames=("tile_l", "core_split"))
    # bf16 MXU path vs f32 reference -> loosened tolerances.
    RTOL, ATOL = 3e-2, 3e-2

    def check(x, **kw):
        outs = jax.block_until_ready(fwd(x, prepared, **kw))
        refs = jax.block_until_ready(ref_forward(x, conv_layers, fc_params))
        for o, r, d in zip(outs, refs, (OUT_FULL, OUT_FOCUS1, OUT_FOCUS2)):
            assert o.shape == (x.shape[0], d)
            np.testing.assert_allclose(np.asarray(o), np.asarray(r),
                                       rtol=RTOL, atol=ATOL)

    # Case 1: single L-tile, halo larger than the tile (batch=2, L=16).
    check(jax.random.normal(k_x1, (2, 1, 16), jnp.float32))

    # Case 2: multiple L-tiles (L=40, tile_l=16 -> 3 tiles): halos, boundary
    # masking and the cross-tile fused pool accumulator.
    x2 = jax.random.normal(k_x2, (2, 1, 40), jnp.float32)
    check(x2, tile_l=16)

    # Case 3: same input with the L axis split across two cores (core_split=2),
    # including one fully out-of-range padding tile and partial-pool combine.
    check(x2, tile_l=16, core_split=2)

    # Case 4: the default large tile (tile_l=2048) with a ragged last tile.
    check(jax.random.normal(k_x3, (1, 1, 2560), jnp.float32))

    print("KERNEL_OK")
</pallas_src>

<mosaic_0001>
module attributes {stable_mosaic.version = 11 : i64} {
  func.func @kernel(%arg0: i32, %arg1: i32, %arg2: i32, %arg3: memref<1x1x56x16xbf16, #tpu.memory_space<vmem>>, %arg4: memref<5x16x16xbf16, #tpu.memory_space<vmem>>, %arg5: memref<1x16xf32, #tpu.memory_space<vmem>>, %arg6: memref<5x16x64xbf16, #tpu.memory_space<vmem>>, %arg7: memref<1x64xf32, #tpu.memory_space<vmem>>, %arg8: memref<5x64x64xbf16, #tpu.memory_space<vmem>>, %arg9: memref<1x64xf32, #tpu.memory_space<vmem>>, %arg10: memref<5x64x256xbf16, #tpu.memory_space<vmem>>, %arg11: memref<1x256xf32, #tpu.memory_space<vmem>>, %arg12: memref<5x256x256xbf16, #tpu.memory_space<vmem>>, %arg13: memref<1x256xf32, #tpu.memory_space<vmem>>, %arg14: memref<1x1x1x256xf32, #tpu.memory_space<vmem>>, %arg15: memref<48x16xbf16, #tpu.memory_space<vmem>>, %arg16: memref<40x64xbf16, #tpu.memory_space<vmem>>, %arg17: memref<32x64xbf16, #tpu.memory_space<vmem>>, %arg18: memref<24x256xbf16, #tpu.memory_space<vmem>>) attributes {dimension_semantics = [#tpu.dimension_semantics<parallel>, #tpu.dimension_semantics<parallel>, #tpu.dimension_semantics<arbitrary>], iteration_bounds = array<i64: 2, 1, 1>, scalar_prefetch = 0 : i64, scratch_operands = 4 : i64, tpu.core_type = #tpu.core_type<tc>, window_params = [{transform_indices = @transform_0, window_bounds = array<i64: 1, 1, 56, 16>}, {pipeline_mode = #tpu.pipeline_mode<synchronous>, transform_indices = @transform_1, window_bounds = array<i64: 5, 16, 16>}, {pipeline_mode = #tpu.pipeline_mode<synchronous>, transform_indices = @transform_2, window_bounds = array<i64: 1, 16>}, {pipeline_mode = #tpu.pipeline_mode<synchronous>, transform_indices = @transform_3, window_bounds = array<i64: 5, 16, 64>}, {pipeline_mode = #tpu.pipeline_mode<synchronous>, transform_indices = @transform_4, window_bounds = array<i64: 1, 64>}, {pipeline_mode = #tpu.pipeline_mode<synchronous>, transform_indices = @transform_5, window_bounds = array<i64: 5, 64, 64>}, {pipeline_mode = #tpu.pipeline_mode<synchronous>, transform_indices = @transform_6, window_bounds = array<i64: 1, 64>}, {pipeline_mode = #tpu.pipeline_mode<synchronous>, transform_indices = @transform_7, window_bounds = array<i64: 5, 64, 256>}, {pipeline_mode = #tpu.pipeline_mode<synchronous>, transform_indices = @transform_8, window_bounds = array<i64: 1, 256>}, {pipeline_mode = #tpu.pipeline_mode<synchronous>, transform_indices = @transform_9, window_bounds = array<i64: 5, 256, 256>}, {pipeline_mode = #tpu.pipeline_mode<synchronous>, transform_indices = @transform_10, window_bounds = array<i64: 1, 256>}, {transform_indices = @transform_11, window_bounds = array<i64: 1, 1, 1, 256>}]} {
    %c1_i32 = arith.constant 1 : i32
    %0 = arith.muli %arg1, %c1_i32 : i32
    %1 = arith.addi %0, %arg2 : i32
    %c16_i32 = arith.constant 16 : i32
    %2 = arith.muli %1, %c16_i32 : i32
    %c0 = arith.constant 0 : index
    %c0_0 = arith.constant 0 : index
    %c2 = arith.constant 2 : index
    %c0_1 = arith.constant 0 : index
    %3 = vector.load %arg3[%c0, %c0_0, %c2, %c0_1] : memref<1x1x56x16xbf16, #tpu.memory_space<vmem>>, vector<1x1x48x16xbf16>
    %4 = vector.shape_cast %3 : vector<1x1x48x16xbf16> to vector<48x16xbf16>
    %c0_2 = arith.constant 0 : index
    %c0_3 = arith.constant 0 : index
    %c0_4 = arith.constant 0 : index
    %5 = vector.load %arg4[%c0_2, %c0_3, %c0_4] : memref<5x16x16xbf16, #tpu.memory_space<vmem>>, vector<1x16x16xbf16>
    %6 = vector.shape_cast %5 : vector<1x16x16xbf16> to vector<16x16xbf16>
    %cst = arith.constant dense<0.000000e+00> : vector<48x16xf32>
    %7 = tpu.matmul %4, %6, %cst {dimension_numbers = #tpu.dot_dimension_numbers<[1], [0], [0], [1], [0, 0, 1, 1], [], []>} : vector<48x16xbf16>, vector<16x16xbf16>, vector<48x16xf32> -> vector<48x16xf32>
    %c0_5 = arith.constant 0 : index
    %c0_6 = arith.constant 0 : index
    %c3 = arith.constant 3 : index
    %c0_7 = arith.constant 0 : index
    %8 = vector.load %arg3[%c0_5, %c0_6, %c3, %c0_7] : memref<1x1x56x16xbf16, #tpu.memory_space<vmem>>, vector<1x1x48x16xbf16>
    %9 = vector.shape_cast %8 : vector<1x1x48x16xbf16> to vector<48x16xbf16>
    %c1 = arith.constant 1 : index
    %c0_8 = arith.constant 0 : index
    %c0_9 = arith.constant 0 : index
    %10 = vector.load %arg4[%c1, %c0_8, %c0_9] : memref<5x16x16xbf16, #tpu.memory_space<vmem>>, vector<1x16x16xbf16>
    %11 = vector.shape_cast %10 : vector<1x16x16xbf16> to vector<16x16xbf16>
    %cst_10 = arith.constant dense<0.000000e+00> : vector<48x16xf32>
    %12 = tpu.matmul %9, %11, %cst_10 {dimension_numbers = #tpu.dot_dimension_numbers<[1], [0], [0], [1], [0, 0, 1, 1], [], []>} : vector<48x16xbf16>, vector<16x16xbf16>, vector<48x16xf32> -> vector<48x16xf32>
    %13 = arith.addf %7, %12 : vector<48x16xf32>
    %c0_11 = arith.constant 0 : index
    %c0_12 = arith.constant 0 : index
    %c4 = arith.constant 4 : index
    %c0_13 = arith.constant 0 : index
    %14 = vector.load %arg3[%c0_11, %c0_12, %c4, %c0_13] : memref<1x1x56x16xbf16, #tpu.memory_space<vmem>>, vector<1x1x48x16xbf16>
    %15 = vector.shape_cast %14 : vector<1x1x48x16xbf16> to vector<48x16xbf16>
    %c2_14 = arith.constant 2 : index
    %c0_15 = arith.constant 0 : index
    %c0_16 = arith.constant 0 : index
    %16 = vector.load %arg4[%c2_14, %c0_15, %c0_16] : memref<5x16x16xbf16, #tpu.memory_space<vmem>>, vector<1x16x16xbf16>
    %17 = vector.shape_cast %16 : vector<1x16x16xbf16> to vector<16x16xbf16>
    %cst_17 = arith.constant dense<0.000000e+00> : vector<48x16xf32>
    %18 = tpu.matmul %15, %17, %cst_17 {dimension_numbers = #tpu.dot_dimension_numbers<[1], [0], [0], [1], [0, 0, 1, 1], [], []>} : vector<48x16xbf16>, vector<16x16xbf16>, vector<48x16xf32> -> vector<48x16xf32>
    %19 = arith.addf %13, %18 : vector<48x16xf32>
    %c0_18 = arith.constant 0 : index
    %c0_19 = arith.constant 0 : index
    %c5 = arith.constant 5 : index
    %c0_20 = arith.constant 0 : index
    %20 = vector.load %arg3[%c0_18, %c0_19, %c5, %c0_20] : memref<1x1x56x16xbf16, #tpu.memory_space<vmem>>, vector<1x1x48x16xbf16>
    %21 = vector.shape_cast %20 : vector<1x1x48x16xbf16> to vector<48x16xbf16>
    %c3_21 = arith.constant 3 : index
    %c0_22 = arith.constant 0 : index
    %c0_23 = arith.constant 0 : index
    %22 = vector.load %arg4[%c3_21, %c0_22, %c0_23] : memref<5x16x16xbf16, #tpu.memory_space<vmem>>, vector<1x16x16xbf16>
    %23 = vector.shape_cast %22 : vector<1x16x16xbf16> to vector<16x16xbf16>
    %cst_24 = arith.constant dense<0.000000e+00> : vector<48x16xf32>
    %24 = tpu.matmul %21, %23, %cst_24 {dimension_numbers = #tpu.dot_dimension_numbers<[1], [0], [0], [1], [0, 0, 1, 1], [], []>} : vector<48x16xbf16>, vector<16x16xbf16>, vector<48x16xf32> -> vector<48x16xf32>
    %25 = arith.addf %19, %24 : vector<48x16xf32>
    %c0_25 = arith.constant 0 : index
    %c0_26 = arith.constant 0 : index
    %c6 = arith.constant 6 : index
    %c0_27 = arith.constant 0 : index
    %26 = vector.load %arg3[%c0_25, %c0_26, %c6, %c0_27] : memref<1x1x56x16xbf16, #tpu.memory_space<vmem>>, vector<1x1x48x16xbf16>
    %27 = vector.shape_cast %26 : vector<1x1x48x16xbf16> to vector<48x16xbf16>
    %c4_28 = arith.constant 4 : index
    %c0_29 = arith.constant 0 : index
    %c0_30 = arith.constant 0 : index
    %28 = vector.load %arg4[%c4_28, %c0_29, %c0_30] : memref<5x16x16xbf16, #tpu.memory_space<vmem>>, vector<1x16x16xbf16>
    %29 = vector.shape_cast %28 : vector<1x16x16xbf16> to vector<16x16xbf16>
    %cst_31 = arith.constant dense<0.000000e+00> : vector<48x16xf32>
    %30 = tpu.matmul %27, %29, %cst_31 {dimension_numbers = #tpu.dot_dimension_numbers<[1], [0], [0], [1], [0, 0, 1, 1], [], []>} : vector<48x16xbf16>, vector<16x16xbf16>, vector<48x16xf32> -> vector<48x16xf32>
    %31 = arith.addf %25, %30 : vector<48x16xf32>
    %c0_32 = arith.constant 0 : index
    %c0_33 = arith.constant 0 : index
    %32 = vector.load %arg5[%c0_32, %c0_33] : memref<1x16xf32, #tpu.memory_space<vmem>>, vector<1x16xf32>
    %33 = vector.shape_cast %32 : vector<1x16xf32> to vector<16xf32>
    %34 = vector.shape_cast %33 : vector<16xf32> to vector<1x16xf32>
    %35 = vector.broadcast %34 : vector<1x16xf32> to vector<48x16xf32>
    %36 = arith.addf %31, %35 : vector<48x16xf32>
    %cst_34 = arith.constant 0.00999999977 : f32
    %37 = vector.broadcast %cst_34 : f32 to vector<48x16xf32>
    %38 = arith.mulf %37, %36 : vector<48x16xf32>
    %39 = arith.maximumf %36, %38 : vector<48x16xf32>
    %40 = arith.truncf %39 : vector<48x16xf32> to vector<48x16xbf16>
    %c0_35 = arith.constant 0 : index
    %c0_36 = arith.constant 0 : index
    %41 = vector.load %arg15[%c0_35, %c0_36] : memref<48x16xbf16, #tpu.memory_space<vmem>>, vector<48x16xbf16>
    tpu.vector_store %arg15[%c0_35, %c0_36], %40 {strides = array<i32>} : memref<48x16xbf16, #tpu.memory_space<vmem>>, vector<48x16xbf16>,
    %c16_i32_37 = arith.constant 16 : i32
    %42 = arith.cmpi slt, %2, %c16_i32_37 : i32
    %c16_i32_38 = arith.constant 16 : i32
    %43 = arith.addi %2, %c16_i32_38 : i32
    %c16_i32_39 = arith.constant 16 : i32
    %44 = arith.addi %43, %c16_i32_39 : i32
    %c16_i32_40 = arith.constant 16 : i32
    %45 = arith.cmpi sgt, %44, %c16_i32_40 : i32
    %46 = arith.ori %42, %45 : i1
    %47 = arith.extui %46 : i1 to i32
    %c0_i32 = arith.constant 0 : i32
    %48 = arith.cmpi ne, %47, %c0_i32 : i32
    scf.if %48 {
      %221 = tpu.iota {dimensions = array<i32: 0>} : vector<48x1xi32>
      %c16_i32_203 = arith.constant 16 : i32
      %222 = arith.subi %2, %c16_i32_203 : i32
      %223 = vector.broadcast %222 : i32 to vector<48x1xi32>
      %224 = arith.addi %221, %223 : vector<48x1xi32>
      %c0_i32_204 = arith.constant 0 : i32
      %225 = vector.broadcast %c0_i32_204 : i32 to vector<48x1xi32>
      %226 = arith.cmpi sge, %224, %225 : vector<48x1xi32>
      %c16_i32_205 = arith.constant 16 : i32
      %227 = vector.broadcast %c16_i32_205 : i32 to vector<48x1xi32>
      %228 = arith.cmpi slt, %224, %227 : vector<48x1xi32>
      %229 = arith.andi %226, %228 : vector<48x1xi1>
      %230 = arith.extui %229 : vector<48x1xi1> to vector<48x1xi32>
      %231 = arith.sitofp %230 : vector<48x1xi32> to vector<48x1xf32>
      %232 = arith.truncf %231 : vector<48x1xf32> to vector<48x1xbf16>
      %c0_206 = arith.constant 0 : index
      %c0_207 = arith.constant 0 : index
      %233 = vector.load %arg15[%c0_206, %c0_207] : memref<48x16xbf16, #tpu.memory_space<vmem>>, vector<48x16xbf16>
      %234 = vector.broadcast %232 : vector<48x1xbf16> to vector<48x16xbf16>
      %235 = arith.mulf %233, %234 : vector<48x16xbf16>
      %c0_208 = arith.constant 0 : index
      %c0_209 = arith.constant 0 : index
      %236 = vector.load %arg15[%c0_208, %c0_209] : memref<48x16xbf16, #tpu.memory_space<vmem>>, vector<48x16xbf16>
      tpu.vector_store %arg15[%c0_208, %c0_209], %235 {strides = array<i32>} : memref<48x16xbf16, #tpu.memory_space<vmem>>, vector<48x16xbf16>,
    } else {
    }
    %c2_41 = arith.constant 2 : index
    %c0_42 = arith.constant 0 : index
    %49 = vector.load %arg15[%c2_41, %c0_42] : memref<48x16xbf16, #tpu.memory_space<vmem>>, vector<40x16xbf16>
    %c0_43 = arith.constant 0 : index
    %c0_44 = arith.constant 0 : index
    %c0_45 = arith.constant 0 : index
    %50 = vector.load %arg6[%c0_43, %c0_44, %c0_45] : memref<5x16x64xbf16, #tpu.memory_space<vmem>>, vector<1x16x64xbf16>
    %51 = vector.shape_cast %50 : vector<1x16x64xbf16> to vector<16x64xbf16>
    %cst_46 = arith.constant dense<0.000000e+00> : vector<40x64xf32>
    %52 = tpu.matmul %49, %51, %cst_46 {dimension_numbers = #tpu.dot_dimension_numbers<[1], [0], [0], [1], [0, 0, 1, 1], [], []>} : vector<40x16xbf16>, vector<16x64xbf16>, vector<40x64xf32> -> vector<40x64xf32>
    %c3_47 = arith.constant 3 : index
    %c0_48 = arith.constant 0 : index
    %53 = vector.load %arg15[%c3_47, %c0_48] : memref<48x16xbf16, #tpu.memory_space<vmem>>, vector<40x16xbf16>
    %c1_49 = arith.constant 1 : index
    %c0_50 = arith.constant 0 : index
    %c0_51 = arith.constant 0 : index
    %54 = vector.load %arg6[%c1_49, %c0_50, %c0_51] : memref<5x16x64xbf16, #tpu.memory_space<vmem>>, vector<1x16x64xbf16>
    %55 = vector.shape_cast %54 : vector<1x16x64xbf16> to vector<16x64xbf16>
    %cst_52 = arith.constant dense<0.000000e+00> : vector<40x64xf32>
    %56 = tpu.matmul %53, %55, %cst_52 {dimension_numbers = #tpu.dot_dimension_numbers<[1], [0], [0], [1], [0, 0, 1, 1], [], []>} : vector<40x16xbf16>, vector<16x64xbf16>, vector<40x64xf32> -> vector<40x64xf32>
    %57 = arith.addf %52, %56 : vector<40x64xf32>
    %c4_53 = arith.constant 4 : index
    %c0_54 = arith.constant 0 : index
    %58 = vector.load %arg15[%c4_53, %c0_54] : memref<48x16xbf16, #tpu.memory_space<vmem>>, vector<40x16xbf16>
    %c2_55 = arith.constant 2 : index
    %c0_56 = arith.constant 0 : index
    %c0_57 = arith.constant 0 : index
    %59 = vector.load %arg6[%c2_55, %c0_56, %c0_57] : memref<5x16x64xbf16, #tpu.memory_space<vmem>>, vector<1x16x64xbf16>
    %60 = vector.shape_cast %59 : vector<1x16x64xbf16> to vector<16x64xbf16>
    %cst_58 = arith.constant dense<0.000000e+00> : vector<40x64xf32>
    %61 = tpu.matmul %58, %60, %cst_58 {dimension_numbers = #tpu.dot_dimension_numbers<[1], [0], [0], [1], [0, 0, 1, 1], [], []>} : vector<40x16xbf16>, vector<16x64xbf16>, vector<40x64xf32> -> vector<40x64xf32>
    %62 = arith.addf %57, %61 : vector<40x64xf32>
    %c5_59 = arith.constant 5 : index
    %c0_60 = arith.constant 0 : index
    %63 = vector.load %arg15[%c5_59, %c0_60] : memref<48x16xbf16, #tpu.memory_space<vmem>>, vector<40x16xbf16>
    %c3_61 = arith.constant 3 : index
    %c0_62 = arith.constant 0 : index
    %c0_63 = arith.constant 0 : index
    %64 = vector.load %arg6[%c3_61, %c0_62, %c0_63] : memref<5x16x64xbf16, #tpu.memory_space<vmem>>, vector<1x16x64xbf16>
    %65 = vector.shape_cast %64 : vector<1x16x64xbf16> to vector<16x64xbf16>
    %cst_64 = arith.constant dense<0.000000e+00> : vector<40x64xf32>
    %66 = tpu.matmul %63, %65, %cst_64 {dimension_numbers = #tpu.dot_dimension_numbers<[1], [0], [0], [1], [0, 0, 1, 1], [], []>} : vector<40x16xbf16>, vector<16x64xbf16>, vector<40x64xf32> -> vector<40x64xf32>
    %67 = arith.addf %62, %66 : vector<40x64xf32>
    %c6_65 = arith.constant 6 : index
    %c0_66 = arith.constant 0 : index
    %68 = vector.load %arg15[%c6_65, %c0_66] : memref<48x16xbf16, #tpu.memory_space<vmem>>, vector<40x16xbf16>
    %c4_67 = arith.constant 4 : index
    %c0_68 = arith.constant 0 : index
    %c0_69 = arith.constant 0 : index
    %69 = vector.load %arg6[%c4_67, %c0_68, %c0_69] : memref<5x16x64xbf16, #tpu.memory_space<vmem>>, vector<1x16x64xbf16>
    %70 = vector.shape_cast %69 : vector<1x16x64xbf16> to vector<16x64xbf16>
    %cst_70 = arith.constant dense<0.000000e+00> : vector<40x64xf32>
    %71 = tpu.matmul %68, %70, %cst_70 {dimension_numbers = #tpu.dot_dimension_numbers<[1], [0], [0], [1], [0, 0, 1, 1], [], []>} : vector<40x16xbf16>, vector<16x64xbf16>, vector<40x64xf32> -> vector<40x64xf32>
    %72 = arith.addf %67, %71 : vector<40x64xf32>
    %c0_71 = arith.constant 0 : index
    %c0_72 = arith.constant 0 : index
    %73 = vector.load %arg7[%c0_71, %c0_72] : memref<1x64xf32, #tpu.memory_space<vmem>>, vector<1x64xf32>
    %74 = vector.shape_cast %73 : vector<1x64xf32> to vector<64xf32>
    %75 = vector.shape_cast %74 : vector<64xf32> to vector<1x64xf32>
    %76 = vector.broadcast %75 : vector<1x64xf32> to vector<40x64xf32>
    %77 = arith.addf %72, %76 : vector<40x64xf32>
    %cst_73 = arith.constant 0.00999999977 : f32
    %78 = vector.broadcast %cst_73 : f32 to vector<40x64xf32>
    %79 = arith.mulf %78, %77 : vector<40x64xf32>
    %80 = arith.maximumf %77, %79 : vector<40x64xf32>
    %81 = arith.truncf %80 : vector<40x64xf32> to vector<40x64xbf16>
    %c0_74 = arith.constant 0 : index
    %c0_75 = arith.constant 0 : index
    %82 = vector.load %arg16[%c0_74, %c0_75] : memref<40x64xbf16, #tpu.memory_space<vmem>>, vector<40x64xbf16>
    tpu.vector_store %arg16[%c0_74, %c0_75], %81 {strides = array<i32>} : memref<40x64xbf16, #tpu.memory_space<vmem>>, vector<40x64xbf16>,
    %c12_i32 = arith.constant 12 : i32
    %83 = arith.cmpi slt, %2, %c12_i32 : i32
    %c16_i32_76 = arith.constant 16 : i32
    %84 = arith.addi %2, %c16_i32_76 : i32
    %c12_i32_77 = arith.constant 12 : i32
    %85 = arith.addi %84, %c12_i32_77 : i32
    %c16_i32_78 = arith.constant 16 : i32
    %86 = arith.cmpi sgt, %85, %c16_i32_78 : i32
    %87 = arith.ori %83, %86 : i1
    %88 = arith.extui %87 : i1 to i32
    %c0_i32_79 = arith.constant 0 : i32
    %89 = arith.cmpi ne, %88, %c0_i32_79 : i32
    scf.if %89 {
      %221 = tpu.iota {dimensions = array<i32: 0>} : vector<40x1xi32>
      %c12_i32_203 = arith.constant 12 : i32
      %222 = arith.subi %2, %c12_i32_203 : i32
      %223 = vector.broadcast %222 : i32 to vector<40x1xi32>
      %224 = arith.addi %221, %223 : vector<40x1xi32>
      %c0_i32_204 = arith.constant 0 : i32
      %225 = vector.broadcast %c0_i32_204 : i32 to vector<40x1xi32>
      %226 = arith.cmpi sge, %224, %225 : vector<40x1xi32>
      %c16_i32_205 = arith.constant 16 : i32
      %227 = vector.broadcast %c16_i32_205 : i32 to vector<40x1xi32>
      %228 = arith.cmpi slt, %224, %227 : vector<40x1xi32>
      %229 = arith.andi %226, %228 : vector<40x1xi1>
      %230 = arith.extui %229 : vector<40x1xi1> to vector<40x1xi32>
      %231 = arith.sitofp %230 : vector<40x1xi32> to vector<40x1xf32>
      %232 = arith.truncf %231 : vector<40x1xf32> to vector<40x1xbf16>
      %c0_206 = arith.constant 0 : index
      %c0_207 = arith.constant 0 : index
      %233 = vector.load %arg16[%c0_206, %c0_207] : memref<40x64xbf16, #tpu.memory_space<vmem>>, vector<40x64xbf16>
      %234 = vector.broadcast %232 : vector<40x1xbf16> to vector<40x64xbf16>
      %235 = arith.mulf %233, %234 : vector<40x64xbf16>
      %c0_208 = arith.constant 0 : index
      %c0_209 = arith.constant 0 : index
      %236 = vector.load %arg16[%c0_208, %c0_209] : memref<40x64xbf16, #tpu.memory_space<vmem>>, vector<40x64xbf16>
      tpu.vector_store %arg16[%c0_208, %c0_209], %235 {strides = array<i32>} : memref<40x64xbf16, #tpu.memory_space<vmem>>, vector<40x64xbf16>,
    } else {
    }
    %c2_80 = arith.constant 2 : index
    %c0_81 = arith.constant 0 : index
    %90 = vector.load %arg16[%c2_80, %c0_81] : memref<40x64xbf16, #tpu.memory_space<vmem>>, vector<32x64xbf16>
    %c0_82 = arith.constant 0 : index
    %c0_83 = arith.constant 0 : index
    %c0_84 = arith.constant 0 : index
    %91 = vector.load %arg8[%c0_82, %c0_83, %c0_84] : memref<5x64x64xbf16, #tpu.memory_space<vmem>>, vector<1x64x64xbf16>
    %92 = vector.shape_cast %91 : vector<1x64x64xbf16> to vector<64x64xbf16>
    %cst_85 = arith.constant dense<0.000000e+00> : vector<32x64xf32>
    %93 = tpu.matmul %90, %92, %cst_85 {dimension_numbers = #tpu.dot_dimension_numbers<[1], [0], [0], [1], [0, 0, 1, 1], [], []>} : vector<32x64xbf16>, vector<64x64xbf16>, vector<32x64xf32> -> vector<32x64xf32>
    %c3_86 = arith.constant 3 : index
    %c0_87 = arith.constant 0 : index
    %94 = vector.load %arg16[%c3_86, %c0_87] : memref<40x64xbf16, #tpu.memory_space<vmem>>, vector<32x64xbf16>
    %c1_88 = arith.constant 1 : index
    %c0_89 = arith.constant 0 : index
    %c0_90 = arith.constant 0 : index
    %95 = vector.load %arg8[%c1_88, %c0_89, %c0_90] : memref<5x64x64xbf16, #tpu.memory_space<vmem>>, vector<1x64x64xbf16>
    %96 = vector.shape_cast %95 : vector<1x64x64xbf16> to vector<64x64xbf16>
    %cst_91 = arith.constant dense<0.000000e+00> : vector<32x64xf32>
    %97 = tpu.matmul %94, %96, %cst_91 {dimension_numbers = #tpu.dot_dimension_numbers<[1], [0], [0], [1], [0, 0, 1, 1], [], []>} : vector<32x64xbf16>, vector<64x64xbf16>, vector<32x64xf32> -> vector<32x64xf32>
    %98 = arith.addf %93, %97 : vector<32x64xf32>
    %c4_92 = arith.constant 4 : index
    %c0_93 = arith.constant 0 : index
    %99 = vector.load %arg16[%c4_92, %c0_93] : memref<40x64xbf16, #tpu.memory_space<vmem>>, vector<32x64xbf16>
    %c2_94 = arith.constant 2 : index
    %c0_95 = arith.constant 0 : index
    %c0_96 = arith.constant 0 : index
    %100 = vector.load %arg8[%c2_94, %c0_95, %c0_96] : memref<5x64x64xbf16, #tpu.memory_space<vmem>>, vector<1x64x64xbf16>
    %101 = vector.shape_cast %100 : vector<1x64x64xbf16> to vector<64x64xbf16>
    %cst_97 = arith.constant dense<0.000000e+00> : vector<32x64xf32>
    %102 = tpu.matmul %99, %101, %cst_97 {dimension_numbers = #tpu.dot_dimension_numbers<[1], [0], [0], [1], [0, 0, 1, 1], [], []>} : vector<32x64xbf16>, vector<64x64xbf16>, vector<32x64xf32> -> vector<32x64xf32>
    %103 = arith.addf %98, %102 : vector<32x64xf32>
    %c5_98 = arith.constant 5 : index
    %c0_99 = arith.constant 0 : index
    %104 = vector.load %arg16[%c5_98, %c0_99] : memref<40x64xbf16, #tpu.memory_space<vmem>>, vector<32x64xbf16>
    %c3_100 = arith.constant 3 : index
    %c0_101 = arith.constant 0 : index
    %c0_102 = arith.constant 0 : index
    %105 = vector.load %arg8[%c3_100, %c0_101, %c0_102] : memref<5x64x64xbf16, #tpu.memory_space<vmem>>, vector<1x64x64xbf16>
    %106 = vector.shape_cast %105 : vector<1x64x64xbf16> to vector<64x64xbf16>
    %cst_103 = arith.constant dense<0.000000e+00> : vector<32x64xf32>
    %107 = tpu.matmul %104, %106, %cst_103 {dimension_numbers = #tpu.dot_dimension_numbers<[1], [0], [0], [1], [0, 0, 1, 1], [], []>} : vector<32x64xbf16>, vector<64x64xbf16>, vector<32x64xf32> -> vector<32x64xf32>
    %108 = arith.addf %103, %107 : vector<32x64xf32>
    %c6_104 = arith.constant 6 : index
    %c0_105 = arith.constant 0 : index
    %109 = vector.load %arg16[%c6_104, %c0_105] : memref<40x64xbf16, #tpu.memory_space<vmem>>, vector<32x64xbf16>
    %c4_106 = arith.constant 4 : index
    %c0_107 = arith.constant 0 : index
    %c0_108 = arith.constant 0 : index
    %110 = vector.load %arg8[%c4_106, %c0_107, %c0_108] : memref<5x64x64xbf16, #tpu.memory_space<vmem>>, vector<1x64x64xbf16>
    %111 = vector.shape_cast %110 : vector<1x64x64xbf16> to vector<64x64xbf16>
    %cst_109 = arith.constant dense<0.000000e+00> : vector<32x64xf32>
    %112 = tpu.matmul %109, %111, %cst_109 {dimension_numbers = #tpu.dot_dimension_numbers<[1], [0], [0], [1], [0, 0, 1, 1], [], []>} : vector<32x64xbf16>, vector<64x64xbf16>, vector<32x64xf32> -> vector<32x64xf32>
    %113 = arith.addf %108, %112 : vector<32x64xf32>
    %c0_110 = arith.constant 0 : index
    %c0_111 = arith.constant 0 : index
    %114 = vector.load %arg9[%c0_110, %c0_111] : memref<1x64xf32, #tpu.memory_space<vmem>>, vector<1x64xf32>
    %115 = vector.shape_cast %114 : vector<1x64xf32> to vector<64xf32>
    %116 = vector.shape_cast %115 : vector<64xf32> to vector<1x64xf32>
    %117 = vector.broadcast %116 : vector<1x64xf32> to vector<32x64xf32>
    %118 = arith.addf %113, %117 : vector<32x64xf32>
    %cst_112 = arith.constant 0.00999999977 : f32
    %119 = vector.broadcast %cst_112 : f32 to vector<32x64xf32>
    %120 = arith.mulf %119, %118 : vector<32x64xf32>
    %121 = arith.maximumf %118, %120 : vector<32x64xf32>
    %122 = arith.truncf %121 : vector<32x64xf32> to vector<32x64xbf16>
    %c0_113 = arith.constant 0 : index
    %c0_114 = arith.constant 0 : index
    %123 = vector.load %arg17[%c0_113, %c0_114] : memref<32x64xbf16, #tpu.memory_space<vmem>>, vector<32x64xbf16>
    tpu.vector_store %arg17[%c0_113, %c0_114], %122 {strides = array<i32>} : memref<32x64xbf16, #tpu.memory_space<vmem>>, vector<32x64xbf16>,
    %c8_i32 = arith.constant 8 : i32
    %124 = arith.cmpi slt, %2, %c8_i32 : i32
    %c16_i32_115 = arith.constant 16 : i32
    %125 = arith.addi %2, %c16_i32_115 : i32
    %c8_i32_116 = arith.constant 8 : i32
    %126 = arith.addi %125, %c8_i32_116 : i32
    %c16_i32_117 = arith.constant 16 : i32
    %127 = arith.cmpi sgt, %126, %c16_i32_117 : i32
    %128 = arith.ori %124, %127 : i1
    %129 = arith.extui %128 : i1 to i32
    %c0_i32_118 = arith.constant 0 : i32
    %130 = arith.cmpi ne, %129, %c0_i32_118 : i32
    scf.if %130 {
      %221 = tpu.iota {dimensions = array<i32: 0>} : vector<32x1xi32>
      %c8_i32_203 = arith.constant 8 : i32
      %222 = arith.subi %2, %c8_i32_203 : i32
      %223 = vector.broadcast %222 : i32 to vector<32x1xi32>
      %224 = arith.addi %221, %223 : vector<32x1xi32>
      %c0_i32_204 = arith.constant 0 : i32
      %225 = vector.broadcast %c0_i32_204 : i32 to vector<32x1xi32>
      %226 = arith.cmpi sge, %224, %225 : vector<32x1xi32>
      %c16_i32_205 = arith.constant 16 : i32
      %227 = vector.broadcast %c16_i32_205 : i32 to vector<32x1xi32>
      %228 = arith.cmpi slt, %224, %227 : vector<32x1xi32>
      %229 = arith.andi %226, %228 : vector<32x1xi1>
      %230 = arith.extui %229 : vector<32x1xi1> to vector<32x1xi32>
      %231 = arith.sitofp %230 : vector<32x1xi32> to vector<32x1xf32>
      %232 = arith.truncf %231 : vector<32x1xf32> to vector<32x1xbf16>
      %c0_206 = arith.constant 0 : index
      %c0_207 = arith.constant 0 : index
      %233 = vector.load %arg17[%c0_206, %c0_207] : memref<32x64xbf16, #tpu.memory_space<vmem>>, vector<32x64xbf16>
      %234 = vector.broadcast %232 : vector<32x1xbf16> to vector<32x64xbf16>
      %235 = arith.mulf %233, %234 : vector<32x64xbf16>
      %c0_208 = arith.constant 0 : index
      %c0_209 = arith.constant 0 : index
      %236 = vector.load %arg17[%c0_208, %c0_209] : memref<32x64xbf16, #tpu.memory_space<vmem>>, vector<32x64xbf16>
      tpu.vector_store %arg17[%c0_208, %c0_209], %235 {strides = array<i32>} : memref<32x64xbf16, #tpu.memory_space<vmem>>, vector<32x64xbf16>,
    } else {
    }
    %c2_119 = arith.constant 2 : index
    %c0_120 = arith.constant 0 : index
    %131 = vector.load %arg17[%c2_119, %c0_120] : memref<32x64xbf16, #tpu.memory_space<vmem>>, vector<24x64xbf16>
    %c0_121 = arith.constant 0 : index
    %c0_122 = arith.constant 0 : index
    %c0_123 = arith.constant 0 : index
    %132 = vector.load %arg10[%c0_121, %c0_122, %c0_123] : memref<5x64x256xbf16, #tpu.memory_space<vmem>>, vector<1x64x256xbf16>
    %133 = vector.shape_cast %132 : vector<1x64x256xbf16> to vector<64x256xbf16>
    %cst_124 = arith.constant dense<0.000000e+00> : vector<24x256xf32>
    %134 = tpu.matmul %131, %133, %cst_124 {dimension_numbers = #tpu.dot_dimension_numbers<[1], [0], [0], [1], [0, 0, 1, 1], [], []>} : vector<24x64xbf16>, vector<64x256xbf16>, vector<24x256xf32> -> vector<24x256xf32>
    %c3_125 = arith.constant 3 : index
    %c0_126 = arith.constant 0 : index
    %135 = vector.load %arg17[%c3_125, %c0_126] : memref<32x64xbf16, #tpu.memory_space<vmem>>, vector<24x64xbf16>
    %c1_127 = arith.constant 1 : index
    %c0_128 = arith.constant 0 : index
    %c0_129 = arith.constant 0 : index
    %136 = vector.load %arg10[%c1_127, %c0_128, %c0_129] : memref<5x64x256xbf16, #tpu.memory_space<vmem>>, vector<1x64x256xbf16>
    %137 = vector.shape_cast %136 : vector<1x64x256xbf16> to vector<64x256xbf16>
    %cst_130 = arith.constant dense<0.000000e+00> : vector<24x256xf32>
    %138 = tpu.matmul %135, %137, %cst_130 {dimension_numbers = #tpu.dot_dimension_numbers<[1], [0], [0], [1], [0, 0, 1, 1], [], []>} : vector<24x64xbf16>, vector<64x256xbf16>, vector<24x256xf32> -> vector<24x256xf32>
    %139 = arith.addf %134, %138 : vector<24x256xf32>
    %c4_131 = arith.constant 4 : index
    %c0_132 = arith.constant 0 : index
    %140 = vector.load %arg17[%c4_131, %c0_132] : memref<32x64xbf16, #tpu.memory_space<vmem>>, vector<24x64xbf16>
    %c2_133 = arith.constant 2 : index
    %c0_134 = arith.constant 0 : index
    %c0_135 = arith.constant 0 : index
    %141 = vector.load %arg10[%c2_133, %c0_134, %c0_135] : memref<5x64x256xbf16, #tpu.memory_space<vmem>>, vector<1x64x256xbf16>
    %142 = vector.shape_cast %141 : vector<1x64x256xbf16> to vector<64x256xbf16>
    %cst_136 = arith.constant dense<0.000000e+00> : vector<24x256xf32>
    %143 = tpu.matmul %140, %142, %cst_136 {dimension_numbers = #tpu.dot_dimension_numbers<[1], [0], [0], [1], [0, 0, 1, 1], [], []>} : vector<24x64xbf16>, vector<64x256xbf16>, vector<24x256xf32> -> vector<24x256xf32>
    %144 = arith.addf %139, %143 : vector<24x256xf32>
    %c5_137 = arith.constant 5 : index
    %c0_138 = arith.constant 0 : index
    %145 = vector.load %arg17[%c5_137, %c0_138] : memref<32x64xbf16, #tpu.memory_space<vmem>>, vector<24x64xbf16>
    %c3_139 = arith.constant 3 : index
    %c0_140 = arith.constant 0 : index
    %c0_141 = arith.constant 0 : index
    %146 = vector.load %arg10[%c3_139, %c0_140, %c0_141] : memref<5x64x256xbf16, #tpu.memory_space<vmem>>, vector<1x64x256xbf16>
    %147 = vector.shape_cast %146 : vector<1x64x256xbf16> to vector<64x256xbf16>
    %cst_142 = arith.constant dense<0.000000e+00> : vector<24x256xf32>
    %148 = tpu.matmul %145, %147, %cst_142 {dimension_numbers = #tpu.dot_dimension_numbers<[1], [0], [0], [1], [0, 0, 1, 1], [], []>} : vector<24x64xbf16>, vector<64x256xbf16>, vector<24x256xf32> -> vector<24x256xf32>
    %149 = arith.addf %144, %148 : vector<24x256xf32>
    %c6_143 = arith.constant 6 : index
    %c0_144 = arith.constant 0 : index
    %150 = vector.load %arg17[%c6_143, %c0_144] : memref<32x64xbf16, #tpu.memory_space<vmem>>, vector<24x64xbf16>
    %c4_145 = arith.constant 4 : index
    %c0_146 = arith.constant 0 : index
    %c0_147 = arith.constant 0 : index
    %151 = vector.load %arg10[%c4_145, %c0_146, %c0_147] : memref<5x64x256xbf16, #tpu.memory_space<vmem>>, vector<1x64x256xbf16>
    %152 = vector.shape_cast %151 : vector<1x64x256xbf16> to vector<64x256xbf16>
    %cst_148 = arith.constant dense<0.000000e+00> : vector<24x256xf32>
    %153 = tpu.matmul %150, %152, %cst_148 {dimension_numbers = #tpu.dot_dimension_numbers<[1], [0], [0], [1], [0, 0, 1, 1], [], []>} : vector<24x64xbf16>, vector<64x256xbf16>, vector<24x256xf32> -> vector<24x256xf32>
    %154 = arith.addf %149, %153 : vector<24x256xf32>
    %c0_149 = arith.constant 0 : index
    %c0_150 = arith.constant 0 : index
    %155 = vector.load %arg11[%c0_149, %c0_150] : memref<1x256xf32, #tpu.memory_space<vmem>>, vector<1x256xf32>
    %156 = vector.shape_cast %155 : vector<1x256xf32> to vector<256xf32>
    %157 = vector.shape_cast %156 : vector<256xf32> to vector<1x256xf32>
    %158 = vector.broadcast %157 : vector<1x256xf32> to vector<24x256xf32>
    %159 = arith.addf %154, %158 : vector<24x256xf32>
    %cst_151 = arith.constant 0.00999999977 : f32
    %160 = vector.broadcast %cst_151 : f32 to vector<24x256xf32>
    %161 = arith.mulf %160, %159 : vector<24x256xf32>
    %162 = arith.maximumf %159, %161 : vector<24x256xf32>
    %163 = arith.truncf %162 : vector<24x256xf32> to vector<24x256xbf16>
    %c0_152 = arith.constant 0 : index
    %c0_153 = arith.constant 0 : index
    %164 = vector.load %arg18[%c0_152, %c0_153] : memref<24x256xbf16, #tpu.memory_space<vmem>>, vector<24x256xbf16>
    tpu.vector_store %arg18[%c0_152, %c0_153], %163 {strides = array<i32>} : memref<24x256xbf16, #tpu.memory_space<vmem>>, vector<24x256xbf16>,
    %c4_i32 = arith.constant 4 : i32
    %165 = arith.cmpi slt, %2, %c4_i32 : i32
    %c16_i32_154 = arith.constant 16 : i32
    %166 = arith.addi %2, %c16_i32_154 : i32
    %c4_i32_155 = arith.constant 4 : i32
    %167 = arith.addi %166, %c4_i32_155 : i32
    %c16_i32_156 = arith.constant 16 : i32
    %168 = arith.cmpi sgt, %167, %c16_i32_156 : i32
    %169 = arith.ori %165, %168 : i1
    %170 = arith.extui %169 : i1 to i32
    %c0_i32_157 = arith.constant 0 : i32
    %171 = arith.cmpi ne, %170, %c0_i32_157 : i32
    scf.if %171 {
      %221 = tpu.iota {dimensions = array<i32: 0>} : vector<24x1xi32>
      %c4_i32_203 = arith.constant 4 : i32
      %222 = arith.subi %2, %c4_i32_203 : i32
      %223 = vector.broadcast %222 : i32 to vector<24x1xi32>
      %224 = arith.addi %221, %223 : vector<24x1xi32>
      %c0_i32_204 = arith.constant 0 : i32
      %225 = vector.broadcast %c0_i32_204 : i32 to vector<24x1xi32>
      %226 = arith.cmpi sge, %224, %225 : vector<24x1xi32>
      %c16_i32_205 = arith.constant 16 : i32
      %227 = vector.broadcast %c16_i32_205 : i32 to vector<24x1xi32>
      %228 = arith.cmpi slt, %224, %227 : vector<24x1xi32>
      %229 = arith.andi %226, %228 : vector<24x1xi1>
      %230 = arith.extui %229 : vector<24x1xi1> to vector<24x1xi32>
      %231 = arith.sitofp %230 : vector<24x1xi32> to vector<24x1xf32>
      %232 = arith.truncf %231 : vector<24x1xf32> to vector<24x1xbf16>
      %c0_206 = arith.constant 0 : index
      %c0_207 = arith.constant 0 : index
      %233 = vector.load %arg18[%c0_206, %c0_207] : memref<24x256xbf16, #tpu.memory_space<vmem>>, vector<24x256xbf16>
      %234 = vector.broadcast %232 : vector<24x1xbf16> to vector<24x256xbf16>
      %235 = arith.mulf %233, %234 : vector<24x256xbf16>
      %c0_208 = arith.constant 0 : index
      %c0_209 = arith.constant 0 : index
      %236 = vector.load %arg18[%c0_208, %c0_209] : memref<24x256xbf16, #tpu.memory_space<vmem>>, vector<24x256xbf16>
      tpu.vector_store %arg18[%c0_208, %c0_209], %235 {strides = array<i32>} : memref<24x256xbf16, #tpu.memory_space<vmem>>, vector<24x256xbf16>,
    } else {
    }
    %c2_158 = arith.constant 2 : index
    %c0_159 = arith.constant 0 : index
    %172 = vector.load %arg18[%c2_158, %c0_159] : memref<24x256xbf16, #tpu.memory_space<vmem>>, vector<16x256xbf16>
    %c0_160 = arith.constant 0 : index
    %c0_161 = arith.constant 0 : index
    %c0_162 = arith.constant 0 : index
    %173 = vector.load %arg12[%c0_160, %c0_161, %c0_162] : memref<5x256x256xbf16, #tpu.memory_space<vmem>>, vector<1x256x256xbf16>
    %174 = vector.shape_cast %173 : vector<1x256x256xbf16> to vector<256x256xbf16>
    %cst_163 = arith.constant dense<0.000000e+00> : vector<16x256xf32>
    %175 = tpu.matmul %172, %174, %cst_163 {dimension_numbers = #tpu.dot_dimension_numbers<[1], [0], [0], [1], [0, 0, 1, 1], [], []>} : vector<16x256xbf16>, vector<256x256xbf16>, vector<16x256xf32> -> vector<16x256xf32>
    %c3_164 = arith.constant 3 : index
    %c0_165 = arith.constant 0 : index
    %176 = vector.load %arg18[%c3_164, %c0_165] : memref<24x256xbf16, #tpu.memory_space<vmem>>, vector<16x256xbf16>
    %c1_166 = arith.constant 1 : index
    %c0_167 = arith.constant 0 : index
    %c0_168 = arith.constant 0 : index
    %177 = vector.load %arg12[%c1_166, %c0_167, %c0_168] : memref<5x256x256xbf16, #tpu.memory_space<vmem>>, vector<1x256x256xbf16>
    %178 = vector.shape_cast %177 : vector<1x256x256xbf16> to vector<256x256xbf16>
    %cst_169 = arith.constant dense<0.000000e+00> : vector<16x256xf32>
    %179 = tpu.matmul %176, %178, %cst_169 {dimension_numbers = #tpu.dot_dimension_numbers<[1], [0], [0], [1], [0, 0, 1, 1], [], []>} : vector<16x256xbf16>, vector<256x256xbf16>, vector<16x256xf32> -> vector<16x256xf32>
    %180 = arith.addf %175, %179 : vector<16x256xf32>
    %c4_170 = arith.constant 4 : index
    %c0_171 = arith.constant 0 : index
    %181 = vector.load %arg18[%c4_170, %c0_171] : memref<24x256xbf16, #tpu.memory_space<vmem>>, vector<16x256xbf16>
    %c2_172 = arith.constant 2 : index
    %c0_173 = arith.constant 0 : index
    %c0_174 = arith.constant 0 : index
    %182 = vector.load %arg12[%c2_172, %c0_173, %c0_174] : memref<5x256x256xbf16, #tpu.memory_space<vmem>>, vector<1x256x256xbf16>
    %183 = vector.shape_cast %182 : vector<1x256x256xbf16> to vector<256x256xbf16>
    %cst_175 = arith.constant dense<0.000000e+00> : vector<16x256xf32>
    %184 = tpu.matmul %181, %183, %cst_175 {dimension_numbers = #tpu.dot_dimension_numbers<[1], [0], [0], [1], [0, 0, 1, 1], [], []>} : vector<16x256xbf16>, vector<256x256xbf16>, vector<16x256xf32> -> vector<16x256xf32>
    %185 = arith.addf %180, %184 : vector<16x256xf32>
    %c5_176 = arith.constant 5 : index
    %c0_177 = arith.constant 0 : index
    %186 = vector.load %arg18[%c5_176, %c0_177] : memref<24x256xbf16, #tpu.memory_space<vmem>>, vector<16x256xbf16>
    %c3_178 = arith.constant 3 : index
    %c0_179 = arith.constant 0 : index
    %c0_180 = arith.constant 0 : index
    %187 = vector.load %arg12[%c3_178, %c0_179, %c0_180] : memref<5x256x256xbf16, #tpu.memory_space<vmem>>, vector<1x256x256xbf16>
    %188 = vector.shape_cast %187 : vector<1x256x256xbf16> to vector<256x256xbf16>
    %cst_181 = arith.constant dense<0.000000e+00> : vector<16x256xf32>
    %189 = tpu.matmul %186, %188, %cst_181 {dimension_numbers = #tpu.dot_dimension_numbers<[1], [0], [0], [1], [0, 0, 1, 1], [], []>} : vector<16x256xbf16>, vector<256x256xbf16>, vector<16x256xf32> -> vector<16x256xf32>
    %190 = arith.addf %185, %189 : vector<16x256xf32>
    %c6_182 = arith.constant 6 : index
    %c0_183 = arith.constant 0 : index
    %191 = vector.load %arg18[%c6_182, %c0_183] : memref<24x256xbf16, #tpu.memory_space<vmem>>, vector<16x256xbf16>
    %c4_184 = arith.constant 4 : index
    %c0_185 = arith.constant 0 : index
    %c0_186 = arith.constant 0 : index
    %192 = vector.load %arg12[%c4_184, %c0_185, %c0_186] : memref<5x256x256xbf16, #tpu.memory_space<vmem>>, vector<1x256x256xbf16>
    %193 = vector.shape_cast %192 : vector<1x256x256xbf16> to vector<256x256xbf16>
    %cst_187 = arith.constant dense<0.000000e+00> : vector<16x256xf32>
    %194 = tpu.matmul %191, %193, %cst_187 {dimension_numbers = #tpu.dot_dimension_numbers<[1], [0], [0], [1], [0, 0, 1, 1], [], []>} : vector<16x256xbf16>, vector<256x256xbf16>, vector<16x256xf32> -> vector<16x256xf32>
    %195 = arith.addf %190, %194 : vector<16x256xf32>
    %c0_188 = arith.constant 0 : index
    %c0_189 = arith.constant 0 : index
    %196 = vector.load %arg13[%c0_188, %c0_189] : memref<1x256xf32, #tpu.memory_space<vmem>>, vector<1x256xf32>
    %197 = vector.shape_cast %196 : vector<1x256xf32> to vector<256xf32>
    %198 = vector.shape_cast %197 : vector<256xf32> to vector<1x256xf32>
    %199 = vector.broadcast %198 : vector<1x256xf32> to vector<16x256xf32>
    %200 = arith.addf %195, %199 : vector<16x256xf32>
    %cst_190 = arith.constant 0.00999999977 : f32
    %201 = vector.broadcast %cst_190 : f32 to vector<16x256xf32>
    %202 = arith.mulf %201, %200 : vector<16x256xf32>
    %203 = arith.maximumf %200, %202 : vector<16x256xf32>
    %204 = tpu.iota {dimensions = array<i32: 1>} : vector<1x16xi32>
    %205 = vector.broadcast %2 : i32 to vector<1x16xi32>
    %206 = arith.addi %204, %205 : vector<1x16xi32>
    %c16_i32_191 = arith.constant 16 : i32
    %207 = vector.broadcast %c16_i32_191 : i32 to vector<1x16xi32>
    %208 = arith.cmpi slt, %206, %207 : vector<1x16xi32>
    %209 = arith.extui %208 : vector<1x16xi1> to vector<1x16xi32>
    %210 = arith.sitofp %209 : vector<1x16xi32> to vector<1x16xf32>
    %cst_192 = arith.constant dense<0.000000e+00> : vector<1x256xf32>
    %211 = tpu.matmul %210, %203, %cst_192 {dimension_numbers = #tpu.dot_dimension_numbers<[1], [0], [0], [1], [0, 0, 1, 1], [], []>} : vector<1x16xf32>, vector<16x256xf32>, vector<1x256xf32> -> vector<1x256xf32>
    %c0_i32_193 = arith.constant 0 : i32
    %212 = arith.cmpi eq, %arg2, %c0_i32_193 : i32
    %213 = arith.extui %212 : i1 to i32
    %c0_i32_194 = arith.constant 0 : i32
    %214 = arith.cmpi ne, %213, %c0_i32_194 : i32
    scf.if %214 {
      %cst_203 = arith.constant 0.000000e+00 : f32
      %221 = vector.broadcast %cst_203 : f32 to vector<1x1x1x256xf32>
      %c0_204 = arith.constant 0 : index
      %c0_205 = arith.constant 0 : index
      %c0_206 = arith.constant 0 : index
      %c0_207 = arith.constant 0 : index
      %222 = vector.load %arg14[%c0_204, %c0_205, %c0_206, %c0_207] : memref<1x1x1x256xf32, #tpu.memory_space<vmem>>, vector<1x1x1x256xf32>
      tpu.vector_store %arg14[%c0_204, %c0_205, %c0_206, %c0_207], %221 {strides = array<i32>} : memref<1x1x1x256xf32, #tpu.memory_space<vmem>>, vector<1x1x1x256xf32>,
    } else {
    }
    %c0_195 = arith.constant 0 : index
    %c0_196 = arith.constant 0 : index
    %c0_197 = arith.constant 0 : index
    %c0_198 = arith.constant 0 : index
    %215 = vector.load %arg14[%c0_195, %c0_196, %c0_197, %c0_198] : memref<1x1x1x256xf32, #tpu.memory_space<vmem>>, vector<1x1x1x256xf32>
    %216 = vector.shape_cast %215 : vector<1x1x1x256xf32> to vector<1x256xf32>
    %217 = arith.addf %216, %211 : vector<1x256xf32>
    %c0_199 = arith.constant 0 : index
    %c0_200 = arith.constant 0 : index
    %c0_201 = arith.constant 0 : index
    %c0_202 = arith.constant 0 : index
    %218 = vector.load %arg14[%c0_199, %c0_200, %c0_201, %c0_202] : memref<1x1x1x256xf32, #tpu.memory_space<vmem>>, vector<1x1x1x256xf32>
    %219 = vector.shape_cast %218 : vector<1x1x1x256xf32> to vector<1x256xf32>
    %220 = vector.shape_cast %217 : vector<1x256xf32> to vector<1x1x1x256xf32>
    tpu.vector_store %arg14[%c0_199, %c0_200, %c0_201, %c0_202], %220 {strides = array<i32>} : memref<1x1x1x256xf32, #tpu.memory_space<vmem>>, vector<1x1x1x256xf32>,
    return
  }
  func.func @transform_0(%arg0: i32, %arg1: i32, %arg2: i32) -> (i32, i32, i32, i32) {
    %c1_i32 = arith.constant 1 : i32
    %0 = arith.muli %arg1, %c1_i32 : i32
    %1 = arith.addi %0, %arg2 : i32
    %c0_i32 = arith.constant 0 : i32
    %c0_i32_0 = arith.constant 0 : i32
    %c0_i32_1 = arith.constant 0 : i32
    return %arg0, %1, %c0_i32, %c0_i32_0 : i32, i32, i32, i32
  }
  func.func @transform_1(%arg0: i32, %arg1: i32, %arg2: i32) -> (i32, i32, i32) {
    %c0_i32 = arith.constant 0 : i32
    %c0_i32_0 = arith.constant 0 : i32
    %c0_i32_1 = arith.constant 0 : i32
    %c0_i32_2 = arith.constant 0 : i32
    return %c0_i32, %c0_i32_0, %c0_i32_1 : i32, i32, i32
  }
  func.func @transform_2(%arg0: i32, %arg1: i32, %arg2: i32) -> (i32, i32) {
    %c0_i32 = arith.constant 0 : i32
    %c0_i32_0 = arith.constant 0 : i32
    %c0_i32_1 = arith.constant 0 : i32
    return %c0_i32, %c0_i32_0 : i32, i32
  }
  func.func @transform_3(%arg0: i32, %arg1: i32, %arg2: i32) -> (i32, i32, i32) {
    %c0_i32 = arith.constant 0 : i32
    %c0_i32_0 = arith.constant 0 : i32
    %c0_i32_1 = arith.constant 0 : i32
    %c0_i32_2 = arith.constant 0 : i32
    return %c0_i32, %c0_i32_0, %c0_i32_1 : i32, i32, i32
  }
  func.func @transform_4(%arg0: i32, %arg1: i32, %arg2: i32) -> (i32, i32) {
    %c0_i32 = arith.constant 0 : i32
    %c0_i32_0 = arith.constant 0 : i32
    %c0_i32_1 = arith.constant 0 : i32
    return %c0_i32, %c0_i32_0 : i32, i32
  }
  func.func @transform_5(%arg0: i32, %arg1: i32, %arg2: i32) -> (i32, i32, i32) {
    %c0_i32 = arith.constant 0 : i32
    %c0_i32_0 = arith.constant 0 : i32
    %c0_i32_1 = arith.constant 0 : i32
    %c0_i32_2 = arith.constant 0 : i32
    return %c0_i32, %c0_i32_0, %c0_i32_1 : i32, i32, i32
  }
  func.func @transform_6(%arg0: i32, %arg1: i32, %arg2: i32) -> (i32, i32) {
    %c0_i32 = arith.constant 0 : i32
    %c0_i32_0 = arith.constant 0 : i32
    %c0_i32_1 = arith.constant 0 : i32
    return %c0_i32, %c0_i32_0 : i32, i32
  }
  func.func @transform_7(%arg0: i32, %arg1: i32, %arg2: i32) -> (i32, i32, i32) {
    %c0_i32 = arith.constant 0 : i32
    %c0_i32_0 = arith.constant 0 : i32
    %c0_i32_1 = arith.constant 0 : i32
    %c0_i32_2 = arith.constant 0 : i32
    return %c0_i32, %c0_i32_0, %c0_i32_1 : i32, i32, i32
  }
  func.func @transform_8(%arg0: i32, %arg1: i32, %arg2: i32) -> (i32, i32) {
    %c0_i32 = arith.constant 0 : i32
    %c0_i32_0 = arith.constant 0 : i32
    %c0_i32_1 = arith.constant 0 : i32
    return %c0_i32, %c0_i32_0 : i32, i32
  }
  func.func @transform_9(%arg0: i32, %arg1: i32, %arg2: i32) -> (i32, i32, i32) {
    %c0_i32 = arith.constant 0 : i32
    %c0_i32_0 = arith.constant 0 : i32
    %c0_i32_1 = arith.constant 0 : i32
    %c0_i32_2 = arith.constant 0 : i32
    return %c0_i32, %c0_i32_0, %c0_i32_1 : i32, i32, i32
  }
  func.func @transform_10(%arg0: i32, %arg1: i32, %arg2: i32) -> (i32, i32) {
    %c0_i32 = arith.constant 0 : i32
    %c0_i32_0 = arith.constant 0 : i32
    %c0_i32_1 = arith.constant 0 : i32
    return %c0_i32, %c0_i32_0 : i32, i32
  }
  func.func @transform_11(%arg0: i32, %arg1: i32, %arg2: i32) -> (i32, i32, i32, i32) {
    %c0_i32 = arith.constant 0 : i32
    %c0_i32_0 = arith.constant 0 : i32
    %c0_i32_1 = arith.constant 0 : i32
    return %arg0, %arg1, %c0_i32, %c0_i32_0 : i32, i32, i32, i32
  }
}

</mosaic_0001>

<bundles_post_ra>
// kernel: hetcnn_forward.1
= control target key start
LH: loop header
LB: loop body
LE: loop exit
PB: predicated region body
PF: predicated region fallthrough
CT: control target
= control target key end

     0   :  { %16 = vsyncpa [#allocation7], 0  ;;  %s6445_s0 = inlined_call_operand.vmem [shape: bf16[2,1,56,16], index: 0, kind: input, shape index: {}]   ;;  %s6446_s1 = inlined_call_operand.vmem [shape: bf16[5,16,16], index: 1, kind: input, shape index: {}]   ;;  %s6447_s2 = inlined_call_operand.vmem [shape: f32[1,16], index: 2, kind: input, shape index: {}]   ;;  %s6448_s3 = inlined_call_operand.vmem [shape: bf16[5,16,64], index: 3, kind: input, shape index: {}]   ;;  %s6449_s4 = inlined_call_operand.vmem [shape: f32[1,64], index: 4, kind: input, shape index: {}]   ;;  %s6450_s5 = inlined_call_operand.hbm [shape: bf16[5,64,64], index: 5, kind: input, shape index: {}]   ;;  %s6451_s6 = inlined_call_operand.vmem [shape: f32[1,64], index: 6, kind: input, shape index: {}]   ;;  %s6452_s7 = inlined_call_operand.vmem [shape: bf16[5,64,256], index: 7, kind: input, shape index: {}]   ;;  %s6453_s8 = inlined_call_operand.vmem [shape: f32[1,256], index: 8, kind: input, shape index: {}]   ;;  %s6454_s9 = inlined_call_operand.hbm [shape: bf16[5,256,256], index: 9, kind: input, shape index: {}]   ;;  %s6455_s10 = inlined_call_operand.vmem [shape: f32[1,256], index: 10, kind: input, shape index: {}]   ;;  %s6456_s11 = inlined_call_operand.vmem [shape: f32[2,1,1,256], index: 11, kind: output, shape index: {}]  }
   0x1   :  { %17 = vsyncpa [#allocation9], 0  ;;  %s5646_s17 = smov 0   ;;  %s5648_s18 = smov 0  }
   0x2   :  { %s5650_s19 = smov 0  }
   0x3 LB: > { %s4099_s20 = sadd.s32 4294967295, %s5575_s19   ;;  %s42_s21 = sadd.s32 1, %s5571_s18  ;;  %s5575_s19 = sphi %s5650_s19, %s23_s19   ;;  %s5571_s18 = sphi %s5648_s18, %s6460_s18   ;;  %s5567_s17 = sphi %s5646_s17, %s6459_s17  }
   0x4   : > { %p44_p0 = scmp.ge.s32.totalorder %s42_s21, 2  ;;  %p4101_p1 = scmp.ge.s32.totalorder %s5575_s19, 1 }
   0x5   : > { %p315_p2 = scmp.lt.s32.totalorder %s5575_s19, 3  ;;  %p5671_p4 = scmp.eq.s32.totalorder %s4099_s20, 0 }
   0x6   : > { %s6462_s21 = smov (%p44_p0, %s42_s21), 0  ;;  %s338_s26 = sshll.u32 %s6450_s5, 4  ;;  %s339_s26 = int_to_ptr.hbm [resolvable:$true] %s338_s26 }
   0x7   : > { %p5667_p3 = pnand %p4101_p1, %p315_p2  ;;  %s5577_s27 = smov [#allocation6]  }
   0x8   : > { %s340_s28 = sshll.u32 %s5577_s27, 4  ;;  %s361_s12 = sshll.u32 %s6454_s9, 4  ;;  %s341_s28 = int_to_ptr.vmem [resolvable:$true] %s340_s28  ;;  %s362_s12 = int_to_ptr.hbm [resolvable:$true] %s361_s12 }
   0x9   : > { %p5438_p5 = pneg %p5667_p3  ;;  %s5578_s13 = smov 64  }
   0xa   : > { %s5579_s14 = smov 4   ;;  %s5580_s15 = smov [#allocation8]  }
   0xb   : > { %p5439_p6 = pnand %p5671_p4, %p5438_p5  ;;  %s363_s16 = sshll.u32 %s5580_s15, 4  ;;  %s364_s16 = int_to_ptr.vmem [resolvable:$true] %s363_s16 }
   0xc   : > { %s5581_s20 = smov 128   ;;  %s5582_s24 = smov 8  }
   0xd   : > { %5441 = dma.hbm_to_vmem [thread:$0]  (!%p5439_p6), %s339_s26, 2560, %s341_s28, [#allocation7], %s5578_s13, %s5578_s13, %s5579_s14  }
   0xe   : > { %5444 = dma.hbm_to_vmem [thread:$0]  (!%p5439_p6), %s362_s12, 20480, %s364_s16, [#allocation9], %s5581_s20, %s5581_s20, %s5582_s24  }
   0xf   : > { %396 = sbr.rel (%p5667_p3) target bundleno = 1403 (0x57b), region = 64 }
  0x14   : > { %5558 = dma.done.wait (%p5671_p4), [#allocation7], 2560  }
  0x15   : > { %5560 = vsyncadd (%p5671_p4), [#allocation7], 4294964736 }
  0x16   : > { %5562 = dma.done.wait (%p5671_p4), [#allocation9], 20480  }
  0x17   : > { %5564 = vsyncadd (%p5671_p4), [#allocation9], 4294946816  ;;  %p451_p7 = scmp.lt.s32.totalorder %s5567_s17, 1  ;;  %v5167_v0 = vld [vmem:[%s6446_s1 + $0x10] sm:$0xff]  ;;  %v5166_v5 = vld [vmem:[%s6446_s1 + $0x8] sm:$0xff]  ;;  %vm545_vm0 = vcmask 130048  }
  0x18   : > { %v5165_v6 = vld [vmem:[%s6446_s1] sm:$0xff]  ;;  %666 = vmatpush.bf16.msra.mxu2 %v5167_v0  ;;  %v5168_v8 = vld [vmem:[%s6446_s1 + $0x18] sm:$0xff]  ;;  %vm636_vm1 = vcmask 1045504   ;;  %562 = vmatpush.bf16.msra.mxu0 %v5166_v5  ;;  %vm582_vm2 = vcmask 1046528   ;;  %vm696_vm3 = vsmask.f32 5376 }
  0x19   : > { %s6464_s17 = smov (!%p451_p7, %s5567_s17), 1  ;;  %612 = vmatpush.bf16.msra.mxu1 %v5165_v6  ;;  %744 = vmatpush.bf16.msra.mxu3 %v5168_v8  ;;  %vm503_vm4 = vsmask.f32 6400  ;;  %v5169_v42 = vld [vmem:[%s6446_s1 + $0x20] sm:$0xff]  ;;  %vm774_vm5 = vcmask 1044480   ;;  %vm855_vm6 = vcmask 125952  }
  0x1a   : > { %s5429_s22 = smul.u32 28, %s6464_s17  ;;  %vm1298_vm7 = vcmask 519168   ;;  %vm1470_vm10 = vcmask 523264   ;;  %s4109_s24 = sshll.u32 %s6464_s17, 1  ;;  %vm3978_vm15 = vcmask 1040384  }
  0x1b   : > { %s468_s26 = scalar_lea.vmem %s6456_s11, %s4109_s24 }
  0x1c   : > { %s5703_s27 = scalar_lea.vmem %s6445_s0, %s5429_s22  ;;  %804 = vmatpush.bf16.msrb.mxu0 %v5169_v42 }
  0x1d   : > { %v473_v1 = vld [vmem:[%s5703_s27 + $0x4] sm:$0xf]  ;;  %v5710_v2 = vld [vmem:[%s5703_s27 + $0x8] sm:$0xff]  ;;  %v629_v4 = vld [vmem:[%s5703_s27] sm:$0xc] }
  0x1e   : > { %v5712_v3 = vunpack.c.l.b16 %v473_v1  ;;  %v634_v7 = vunpack.c.l.b16 %v629_v4  ;;  %v472_v9 = vld [vmem:[%s5703_s27] sm:$0xe]  ;;  %v513_v10 = vshrl.u32 %v5710_v2, 16  ;;  %v516_v11 = vshll.u32 %v5710_v2, 16  ;;  %v5736_v36 = vld [vmem:[%s5703_s27 + $0x10] sm:$0xff] }
  0x1f   : > { %v492_v12 = vunpack.c.l.b16 %v472_v9  ;;  %v638_v14 = vrot.slane %v5710_v2, 2  ;;  %v584_v15 = vrot.slane %v5710_v2, 1  ;;  %v522_v40 = vshrl.u32 %v5736_v36, 16  ;;  %v689_v49 = vld [vmem:[%s5703_s27 + $0x18] sm:$0x7] }
  0x20   : > { %v635_v13 = vpack.c.b16 %v5712_v3, %v634_v7  ;;  %v705_v16 = vrot.slane %v513_v10, 2  ;;  %v515_v18 = vrot.slane %v513_v10, 1  ;;  %v518_v19 = vrot.slane %v516_v11, 2  ;;  %v481_v50 = vld [vmem:[%s5703_s27 + $0x18] sm:$0x3] }
  0x21   : > { %v499_v17 = vpack.c.b16 %v5712_v3, %v492_v12  ;;  %v706_v20 = vrot.slane %v516_v11, 3  ;;  %v525_v41 = vshll.u32 %v5736_v36, 16  ;;  %v640_v43 = vrot.slane %v5736_v36, 2  ;;  %v478_v57 = vld [vmem:[%s5703_s27 + $0x18] sm:$0x1] }
  0x22   : > { %v637_v21 = vrot.slane %v635_v13, 2  ;;  %v698_v22 = vshrl.u32 %v635_v13, 16  ;;  %v701_v23 = vshll.u32 %v635_v13, 16  ;;  %v519_v33 = vor.u32 %v518_v19, %v515_v18  ;;  %v767_v18 = vld [vmem:[%s5703_s27] sm:$0x8] }
  0x23   : > { %v505_v24 = vshrl.u32 %v499_v17, 16  ;;  %v508_v25 = vshll.u32 %v499_v17, 16  ;;  %v583_v26 = vrot.slane %v499_v17, 1  ;;  %v707_v30 = vor.u32 %v706_v20, %v705_v16 }
  0x24   : > { %v639_v27 = vsel %vm636_vm1, %v637_v21, %v638_v14  ;;  %v700_v28 = vrot.slane %v698_v22, 2  ;;  %v703_v29 = vrot.slane %v701_v23, 3  ;;  %v709_v44 = vrot.slane %v522_v40, 2 }
  0x25   : > { %4140 = vmatmul.msk.bf16.vlgmr.msra.gmra.mxu2 %vm545_vm0, %v639_v27  ;;  %v507_v31 = vrot.slane %v505_v24, 1  ;;  %v510_v32 = vrot.slane %v508_v25, 2  ;;  %v585_v34 = vsel %vm582_vm2, %v583_v26, %v584_v15  ;;  %v710_v45 = vrot.slane %v525_v41, 3 }
  0x26   : > { %4131 = vmatmul.msk.bf16.vlgmr.msra.gmra.mxu1 %vm545_vm0, %v585_v34  ;;  %v704_v35 = vor.u32 %v703_v29, %v700_v28  ;;  %v524_v46 = vrot.slane %v522_v40, 1  ;;  %v527_v47 = vrot.slane %v525_v41, 2  ;;  %v586_v48 = vrot.slane %v5736_v36, 1  ;;  %v5783_v41 = vld [vmem:[%s6447_s2] ss:$0 sm:$0xff] }
  0x27   : > { %v511_v37 = vor.u32 %v510_v32, %v507_v31  ;;  %v641_v51 = vsel %vm636_vm1, %v638_v14, %v640_v43  ;;  %v711_v52 = vor.u32 %v710_v45, %v709_v44  ;;  %v694_v53 = vunpack.c.l.b16 %v689_v49 }
  0x28   : > { %v708_v38 = vsel %vm696_vm3, %v704_v35, %v707_v30  ;;  %v528_v54 = vor.u32 %v527_v47, %v524_v46  ;;  %v587_v55 = vsel %vm582_vm2, %v584_v15, %v586_v48  ;;  %v498_v56 = vunpack.c.l.b16 %v481_v50 }
  0x29   : > { %v520_v39 = vsel %vm503_vm4, %v511_v37, %v519_v33  ;;  %4149 = vmatmul.msk.bf16.vlgmr.msra.gmra.mxu3 %vm545_vm0, %v708_v38  ;;  %v712_v58 = vsel %vm696_vm3, %v707_v30, %v711_v52  ;;  %v695_v59 = vpack.c.b16 %v694_v53, %v694_v53  ;;  %v580_v62 = vunpack.c.l.b16 %v478_v57 }
  0x2a   : > { %4124 = vmatmul.msk.bf16.vlgmr.msra.gmra.mxu0 %vm545_vm0, %v520_v39  ;;  %v529_v60 = vsel %vm503_vm4, %v519_v33, %v528_v54  ;;  %v502_v61 = vpack.c.b16 %v498_v56, %v498_v56  ;;  %v772_v19 = vunpack.c.l.b16 %v767_v18  ;;  %v776_v22 = vrot.slane %v5710_v2, 3 }
  0x2b   : > { %v714_v63 = vshrl.u32 %v695_v59, 16  ;;  %v717_v0 = vshll.u32 %v695_v59, 16  ;;  %v581_v5 = vpack.c.b16 %v580_v62, %v580_v62  ;;  %v778_v24 = vrot.slane %v5736_v36, 3 }
  0x2c   : > { %v531_v1 = vshrl.u32 %v502_v61, 16  ;;  %v534_v4 = vshll.u32 %v502_v61, 16  ;;  %v642_v6 = vrot.slane %v502_v61, 2  ;;  %v773_v20 = vpack.c.b16 %v5712_v3, %v772_v19 }
  0x2d   : > { %v716_v7 = vrot.slane %v714_v63, 2  ;;  %v719_v8 = vrot.slane %v717_v0, 3  ;;  %v588_v11 = vrot.slane %v581_v5, 1  ;;  %v779_v25 = vsel %vm774_vm5, %v776_v22, %v778_v24 }
  0x2e   : > { %v533_v9 = vrot.slane %v531_v1, 1  ;;  %v536_v10 = vrot.slane %v534_v4, 2  ;;  %v643_v12 = vsel %vm636_vm1, %v640_v43, %v642_v6  ;;  %v775_v21 = vrot.slane %v773_v20, 3  ;;  %v5171_v20 = vld [vmem:[%s6448_s3] sm:$0xff] }
  0x2f   : > { %v720_v13 = vor.u32 %v719_v8, %v716_v7  ;;  %v589_v15 = vsel %vm582_vm2, %v586_v48, %v588_v11  ;;  %v780_v26 = vrot.slane %v695_v59, 3  ;;  %1077 = vmatpush.bf16.msrb.mxu2 %v5171_v20 }
  0x30   : > { %v537_v14 = vor.u32 %v536_v10, %v533_v9  ;;  %v777_v23 = vsel %vm774_vm5, %v775_v21, %v776_v22  ;;  %v5173_v21 = vld [vmem:[%s6448_s3 + $0x10] sm:$0xff] }
  0x31   : > { %v721_v16 = vsel %vm696_vm3, %v711_v52, %v720_v13  ;;  %v781_v27 = vsel %vm774_vm5, %v778_v24, %v780_v26  ;;  %1127 = vmatpush.bf16.msrb.mxu3 %v5173_v21 }
  0x32   : > { %v538_v17 = vsel %vm503_vm4, %v528_v54, %v537_v14 }
  0x35   : > { %4141 = vmatmul.msk.bf16.gmra.mxu2 %vm545_vm0, %v641_v51 }
  0x36   : > { %4132 = vmatmul.msk.bf16.gmra.mxu1 %vm545_vm0, %v587_v55 }
  0x39   : > { %4150 = vmatmul.msk.bf16.gmra.mxu3 %vm545_vm0, %v712_v58 }
  0x3a   : > { %4125 = vmatmul.msk.bf16.gmra.mxu0 %vm545_vm0, %v529_v60 }
  0x45   : > { %4142 = vmatmul.msk.bf16.gmra.mxu2 %vm545_vm0, %v643_v12 }
  0x46   : > { %4133 = vmatmul.msk.bf16.gmra.mxu1 %vm545_vm0, %v589_v15 }
  0x49   : > { %4151 = vmatmul.msk.bf16.gmra.mxu3 %vm545_vm0, %v721_v16  ;;  %v5583_v16 = vmov 0.0|0.0  }
  0x4a   : > { %4126 = vmatmul.msk.bf16.gmra.mxu0 %vm545_vm0, %v538_v17  ;;  %v5790_v17 = vunpack.c.l.bf16 %v5583_v16 }
  0x5a   : > { %4158 = vmatmul.msk.bf16.vlgmr.msrb.gmra.mxu0 %vm545_vm0, %v777_v23 }
  0x6a   : > { %4159 = vmatmul.msk.bf16.gmra.mxu0 %vm545_vm0, %v779_v25 }
  0x7a   : > { %4160 = vmatmul.msk.bf16.gmra.mxu0 %vm545_vm0, %v781_v27 }
  0xa3   : > { %v614_v30 = vpop.f32.mrf.mxu1 }
  0xa7   : > { %v564_v3 = vpop.f32.mrf.mxu0 }
  0xa8   : > { %v668_v31 = vpop.f32.mrf.mxu2  ;;  %v615_v36 = vadd.f32 %v614_v30, %v564_v3  ;;  %v5174_v30 = vld [vmem:[%s6448_s3 + $0x18] sm:$0xff] }
  0xa9   : > { %1198 = vmatpush.bf16.msra.mxu0 %v5174_v30 }
  0xaa   : > { %v683_v39 = vadd.f32 %v668_v31, %v615_v36 }
  0xab   : > { %v616_v34 = vpop.f32.mrf.mxu1 }
  0xac   : > { %v746_v33 = vpop.f32.mrf.mxu3 }
  0xad   : > { %v761_v40 = vadd.f32 %v746_v33, %v683_v39 }
  0xaf   : > { %v566_v28 = vpop.f32.mrf.mxu0 }
  0xb0   : > { %v670_v37 = vpop.f32.mrf.mxu2  ;;  %v617_v44 = vadd.f32 %v616_v34, %v566_v28 }
  0xb2   : > { %v684_v48 = vadd.f32 %v670_v37, %v617_v44 }
  0xb3   : > { %v619_v42 = vpop.f32.mrf.mxu1 }
  0xb4   : > { %v748_v38 = vpop.f32.mrf.mxu3 }
  0xb5   : > { %v762_v51 = vadd.f32 %v748_v38, %v684_v48 }
  0xb7   : > { %v569_v29 = vpop.f32.mrf.mxu0 }
  0xb8   : > { %v673_v47 = vpop.f32.mrf.mxu2  ;;  %v620_v54 = vadd.f32 %v619_v42, %v569_v29 }
  0xba   : > { %v685_v59 = vadd.f32 %v673_v47, %v620_v54 }
  0xbb   : > { %v621_v57 = vpop.f32.mrf.mxu1 }
  0xbc   : > { %v751_v50 = vpop.f32.mrf.mxu3 }
  0xbd   : > { %v763_v62 = vadd.f32 %v751_v50, %v685_v59  ;;  %v5584_v50 = vmov 1.0|1.0  }
  0xbf   : > { %v571_v2 = vpop.f32.mrf.mxu0 }
  0xc0   : > { %v675_v61 = vpop.f32.mrf.mxu2  ;;  %v622_v4 = vadd.f32 %v621_v57, %v571_v2  ;;  %v5172_v2 = vld [vmem:[%s6448_s3 + $0x8] sm:$0xff] }
  0xc1   : > { %1031 = vmatpush.bf16.msrb.mxu1 %v5172_v2 }
  0xc2   : > { %v686_v9 = vadd.f32 %v675_v61, %v622_v4 }
  0xc3   : > { %v624_v8 = vpop.f32.mrf.mxu1 }
  0xc4   : > { %v753_v0 = vpop.f32.mrf.mxu3 }
  0xc5   : > { %v764_v11 = vadd.f32 %v753_v0, %v686_v9 }
  0xc7   : > { %v574_v32 = vpop.f32.mrf.mxu0 }
  0xc8   : > { %v625_v13 = vadd.f32 %v624_v8, %v574_v32  ;;  %v678_v14 = vpop.f32.mrf.mxu2 }
  0xca   : > { %v687_v27 = vadd.f32 %v678_v14, %v625_v13 }
  0xcb   : > { %v626_v32 = vpop.f32.mrf.mxu1 }
  0xcc   : > { %v756_v22 = vpop.f32.mrf.mxu3 }
  0xcd   : > { %v765_v31 = vadd.f32 %v756_v22, %v687_v27 }
  0xcf   : > { %v5778_v35 = vpop.f32.mrf.mxu0 }
  0xd0   : > { %v627_v38 = vadd.f32 %v626_v32, %v5778_v35  ;;  %v680_v42 = vpop.f32.mrf.mxu2 }
  0xd4   : > { %v758_v44 = vpop.f32.mrf.mxu3 }
  0xd7   : > { %v806_v43 = vpop.f32.mrf.mxu0 }
  0xd8   : > { %v821_v45 = vadd.f32 %v806_v43, %v761_v40 }
  0xda   : > { %v831_v46 = vadd.f32 %v5783_v41, %v821_v45  ;;  %v688_v45 = vadd.f32 %v680_v42, %v627_v38 }
  0xdc   : > { %v837_v49 = vmul.f32 0.01, %v831_v46  ;;  %v766_v47 = vadd.f32 %v758_v44, %v688_v45  ;;  %v5175_v44 = vld [vmem:[%s6448_s3 + $0x20] sm:$0xff] }
  0xdd   : > { %1253 = vmatpush.bf16.msra.mxu1 %v5175_v44 }
  0xde   : > { %v843_v52 = vmax.f32 %v831_v46, %v837_v49 }
  0xdf   : > { %v808_v53 = vpop.f32.mrf.mxu0 }
  0xe0   : > { %v849_v55 = vpack.c.bf16 %v843_v52, %v843_v52  ;;  %v822_v56 = vadd.f32 %v808_v53, %v762_v51  ;;  %v5813_v51 = vunpack.c.l.bf16 %v5584_v50 }
  0xe2   : > { %856 = vst.msk [vmem:[#allocation2] sm:$0xf] %vm855_vm6, %v849_v55  ;;  %v832_v58 = vadd.f32 %v5783_v41, %v822_v56 }
  0xe4   : > { %v838_v60 = vmul.f32 0.01, %v832_v58 }
  0xe6   : > { %v844_v63 = vmax.f32 %v832_v58, %v838_v60 }
  0xe7   : > { %v811_v1 = vpop.f32.mrf.mxu0 }
  0xe8   : > { %v850_v5 = vpack.c.bf16 %v844_v63, %v844_v63  ;;  %v823_v6 = vadd.f32 %v811_v1, %v763_v62 }
  0xea   : > { %857 = vst.msk [vmem:[#allocation2 + $0x4] sm:$0xf] %vm855_vm6, %v850_v5  ;;  %v833_v7 = vadd.f32 %v5783_v41, %v823_v6 }
  0xec   : > { %v839_v10 = vmul.f32 0.01, %v833_v7 }
  0xee   : > { %v845_v12 = vmax.f32 %v833_v7, %v839_v10 }
  0xef   : > { %v813_v15 = vpop.f32.mrf.mxu0 }
  0xf0   : > { %v851_v18 = vpack.c.bf16 %v845_v12, %v845_v12  ;;  %v824_v19 = vadd.f32 %v813_v15, %v764_v11 }
  0xf1   : > { %v5398_v23 = vld [vmem:[#allocation2] sm:$0xff]  }
  0xf2   : > { %v5399_v24 = vunpack.c.l.bf16 %v5398_v23  ;;  %v5400_v25 = vunpack.c.h.bf16 %v5398_v23  ;;  %858 = vst.msk [vmem:[#allocation2 + $0x8] sm:$0xf] %vm855_vm6, %v851_v18  ;;  %v834_v26 = vadd.f32 %v5783_v41, %v824_v19 }
  0xf4   : > { %v938_v3 = vmul.f32 %v5399_v24, %v5790_v17  ;;  %v939_v28 = vmul.f32 %v5400_v25, %v5790_v17  ;;  %v840_v29 = vmul.f32 0.01, %v834_v26 }
  0xf6   : > { %v944_v33 = vpack.c.bf16 %v938_v3, %v938_v3  ;;  %v945_v34 = vpack.c.bf16 %v939_v28, %v939_v28  ;;  %v846_v36 = vmax.f32 %v834_v26, %v840_v29 }
  0xf7   : > { %v816_v37 = vpop.f32.mrf.mxu0 }
  0xf8   : > { %950 = vst.msk [vmem:[#allocation2] sm:$0xf] %vm855_vm6, %v944_v33  ;;  %v852_v39 = vpack.c.bf16 %v846_v36, %v846_v36  ;;  %v825_v40 = vadd.f32 %v816_v37, %v765_v31 }
  0xf9   : > { %951 = vst.msk [vmem:[#allocation2 + $0x4] sm:$0xf] %vm855_vm6, %v945_v34 }
  0xfa   : > { %859 = vst.msk [vmem:[#allocation2 + $0xc] sm:$0xf] %vm855_vm6, %v852_v39  ;;  %v835_v43 = vadd.f32 %v5783_v41, %v825_v40 }
  0xfc   : > { %v841_v46 = vmul.f32 0.01, %v835_v43 }
  0xfe   : > { %v847_v48 = vmax.f32 %v835_v43, %v841_v46 }
  0xff   : > { %v818_v49 = vpop.f32.mrf.mxu0  ;;  %v956_v57 = vld [vmem:[#allocation2] sm:$0xe] }
 0x100   : > { %v853_v35 = vpack.c.bf16 %v847_v48, %v847_v48  ;;  %v826_v52 = vadd.f32 %v818_v49, %v766_v47  ;;  %v957_v58 = vld [vmem:[#allocation2 + $0x4] sm:$0xf]  ;;  %v1093_v62 = vld [vmem:[#allocation2] sm:$0xc]  ;;  %v974_v63 = vunpack.c.l.b16 %v956_v57 }
 0x101   : > { %v5425_v53 = vld [vmem:[#allocation2 + $0x8] sm:$0xff]   ;;  %v5819_v0 = vunpack.c.l.b16 %v957_v58  ;;  %v1098_v6 = vunpack.c.l.b16 %v1093_v62 }
 0x102   : > { %v5403_v54 = vunpack.c.l.bf16 %v5425_v53  ;;  %v5404_v55 = vunpack.c.h.bf16 %v5425_v53  ;;  %860 = vst.msk [vmem:[#allocation2 + $0x10] sm:$0xf] %vm855_vm6, %v853_v35  ;;  %v836_v56 = vadd.f32 %v5783_v41, %v826_v52 }
 0x103   : > { %v980_v41 = vpack.c.b16 %v5819_v0, %v974_v63  ;;  %v1099_v8 = vpack.c.b16 %v5819_v0, %v1098_v6 }
 0x104   : > { %v940_v59 = vmul.f32 %v5403_v54, %v5813_v51  ;;  %v941_v60 = vmul.f32 %v5404_v55, %v5813_v51  ;;  %v842_v61 = vmul.f32 0.01, %v836_v56 }
 0x105   : > { %v984_v9 = vshrl.u32 %v980_v41, 16  ;;  %v987_v10 = vshll.u32 %v980_v41, 16  ;;  %v1156_v11 = vshrl.u32 %v1099_v8, 16  ;;  %v1159_v12 = vshll.u32 %v1099_v8, 16 }
 0x106   : > { %v946_v1 = vpack.c.bf16 %v940_v59, %v940_v59  ;;  %v947_v4 = vpack.c.bf16 %v941_v60, %v941_v60  ;;  %v848_v5 = vmax.f32 %v836_v56, %v842_v61  ;;  %v1050_v15 = vrot.slane %v980_v41, 1 }
 0x107   : > { %v1100_v16 = vrot.slane %v1099_v8, 2  ;;  %v986_v18 = vrot.slane %v984_v9, 1  ;;  %v989_v19 = vrot.slane %v987_v10, 2  ;;  %v1158_v26 = vrot.slane %v1156_v11, 2  ;;  %v1219_v10 = vld [vmem:[#allocation2] sm:$0x8] }
 0x108   : > { %952 = vst.msk [vmem:[#allocation2 + $0x8] sm:$0xf] %vm855_vm6, %v946_v1  ;;  %v854_v7 = vpack.c.bf16 %v848_v5, %v848_v5  ;;  %v1161_v27 = vrot.slane %v1159_v12, 3  ;;  %v1224_v11 = vunpack.c.l.b16 %v1219_v10  ;;  %v5184_v10 = vld [vmem:[#allocation6 + $0x38] sm:$0xff] }
 0x109   : > { %953 = vst.msk [vmem:[#allocation2 + $0xc] sm:$0xf] %vm855_vm6, %v947_v4  ;;  %v990_v37 = vor.u32 %v989_v19, %v986_v18  ;;  %1481 = vmatpush.bf16.msra.mxu2 %v5184_v10 }
 0x10a   : > { %861 = vst.msk [vmem:[#allocation2 + $0x14] sm:$0xf] %vm855_vm6, %v854_v7  ;;  %v1162_v39 = vor.u32 %v1161_v27, %v1158_v26  ;;  %v1225_v12 = vpack.c.b16 %v5819_v0, %v1224_v11  ;;  %v5179_v11 = vld [vmem:[#allocation6 + $0x10] sm:$0xff] }
 0x110   : > { %v5826_v13 = vld [vmem:[#allocation2 + $0x8] sm:$0xff] }
 0x111   : > { %v5426_v14 = vld [vmem:[#allocation2 + $0x10] sm:$0xff]   ;;  %v1051_v22 = vrot.slane %v5826_v13, 1  ;;  %v1101_v23 = vrot.slane %v5826_v13, 2  ;;  %v992_v24 = vshrl.u32 %v5826_v13, 16  ;;  %v995_v25 = vshll.u32 %v5826_v13, 16 }
 0x112   : > { %v5407_v20 = vunpack.c.l.bf16 %v5426_v14  ;;  %v5408_v21 = vunpack.c.h.bf16 %v5426_v14  ;;  %v1227_v14 = vrot.slane %v5826_v13, 3 }
 0x113   : > { %v1052_v29 = vsel %vm582_vm2, %v1050_v15, %v1051_v22  ;;  %v1102_v2 = vsel %vm636_vm1, %v1100_v16, %v1101_v23  ;;  %v994_v30 = vrot.slane %v992_v24, 1  ;;  %v997_v31 = vrot.slane %v995_v25, 2 }
 0x114   : > { %v942_v3 = vmul.f32 %v5407_v20, %v5790_v17  ;;  %v943_v28 = vmul.f32 %v5408_v21, %v5790_v17  ;;  %4178 = vmatmul.msk.bf16.vlgmr.msrb.gmra.mxu2 %vm545_vm0, %v1052_v29  ;;  %4187 = vmatmul.msk.bf16.vlgmr.msrb.gmra.mxu3 %vm545_vm0, %v1102_v2  ;;  %v1163_v32 = vrot.slane %v992_v24, 2  ;;  %v1164_v33 = vrot.slane %v995_v25, 3 }
 0x115   : > { %v998_v38 = vor.u32 %v997_v31, %v994_v30  ;;  %v1226_v15 = vrot.slane %v1225_v12, 3  ;;  %v5195_v12 = vld [vmem:[#allocation6 + $0x90] sm:$0xff] }
 0x116   : > { %v948_v34 = vpack.c.bf16 %v942_v3, %v942_v3  ;;  %v949_v36 = vpack.c.bf16 %v943_v28, %v943_v28  ;;  %v1165_v40 = vor.u32 %v1164_v33, %v1163_v32 }
 0x117   : > { %v999_v42 = vsel %vm503_vm4, %v990_v37, %v998_v38  ;;  %v1228_v16 = vsel %vm774_vm5, %v1226_v15, %v1227_v14 }
 0x118   : > { %954 = vst.msk [vmem:[#allocation2 + $0x10] sm:$0xf] %vm855_vm6, %v948_v34  ;;  %v1166_v43 = vsel %vm696_vm3, %v1162_v39, %v1165_v40  ;;  %4171 = vmatmul.msk.bf16.vlgmr.msrb.gmra.mxu1 %vm545_vm0, %v999_v42 }
 0x119   : > { %955 = vst.msk [vmem:[#allocation2 + $0x14] sm:$0xf] %vm855_vm6, %v949_v36  ;;  %4196 = vmatmul.msk.bf16.vlgmr.msra.gmra.mxu0 %vm545_vm0, %v1166_v43 }
 0x11f   : > { %v960_v45 = vld [vmem:[#allocation2 + $0x10] sm:$0xf] }
 0x120   : > { %v961_v46 = vld [vmem:[#allocation2 + $0x14] sm:$0x1]  ;;  %v978_v47 = vunpack.c.l.b16 %v960_v45 }
 0x121   : > { %v964_v48 = vld [vmem:[#allocation2 + $0x14] sm:$0x3]  ;;  %v1048_v50 = vunpack.c.l.b16 %v961_v46  ;;  %v5873_v46 = vld [vmem:[%s6449_s4] ss:$0 sm:$0xff] }
 0x122   : > { %v1148_v49 = vld [vmem:[#allocation2 + $0x14] sm:$0x7]  ;;  %v979_v35 = vunpack.c.l.b16 %v964_v48 }
 0x123   : > { %v1153_v52 = vunpack.c.l.b16 %v1148_v49  ;;  %v1049_v53 = vpack.c.b16 %v1048_v50, %v978_v47 }
 0x124   : > { %v982_v54 = vpack.c.b16 %v979_v35, %v978_v47 }
 0x125   : > { %v1154_v55 = vpack.c.b16 %v1153_v52, %v978_v47  ;;  %v1053_v56 = vrot.slane %v1049_v53, 1 }
 0x126   : > { %v1103_v57 = vrot.slane %v982_v54, 2  ;;  %v1001_v58 = vshrl.u32 %v982_v54, 16  ;;  %v1004_v59 = vshll.u32 %v982_v54, 16 }
 0x127   : > { %v1168_v60 = vshrl.u32 %v1154_v55, 16  ;;  %v1171_v61 = vshll.u32 %v1154_v55, 16  ;;  %v1054_v62 = vsel %vm582_vm2, %v1051_v22, %v1053_v56  ;;  %v1229_v18 = vrot.slane %v1154_v55, 3 }
 0x128   : > { %v1104_v63 = vsel %vm636_vm1, %v1101_v23, %v1103_v57  ;;  %v1003_v1 = vrot.slane %v1001_v58, 1  ;;  %v1006_v4 = vrot.slane %v1004_v59, 2  ;;  %4179 = vmatmul.msk.bf16.gmra.mxu2 %vm545_vm0, %v1054_v62  ;;  %v1311_v55 = vlaneseq }
 0x129   : > { %4188 = vmatmul.msk.bf16.gmra.mxu3 %vm545_vm0, %v1104_v63  ;;  %v1170_v5 = vrot.slane %v1168_v60, 2  ;;  %v1173_v6 = vrot.slane %v1171_v61, 3  ;;  %v1230_v19 = vsel %vm774_vm5, %v1227_v14, %v1229_v18  ;;  %v5180_v63 = vld [vmem:[#allocation6 + $0x18] sm:$0xff] }
 0x12a   : > { %v1007_v7 = vor.u32 %v1006_v4, %v1003_v1  ;;  %v5879_v61 = vshrl.u32 %v1311_v55, 7  ;;  %v5196_v1 = vld [vmem:[#allocation6 + $0x98] sm:$0xff]  ;;  %1538 = vmatpush.bf16.msra.mxu3 %v5180_v63  ;;  %vm3971_vm14 = vcmp.lt.s32.totalorder %v1311_v55, 256 }
 0x12b   : > { %v1174_v41 = vor.u32 %v1173_v6, %v1170_v5  ;;  %1763 = vmatpush.bf16.msrb.mxu0 %v5196_v1 }
 0x12c   : > { %v1008_v8 = vsel %vm503_vm4, %v998_v38, %v1007_v7  ;;  %v1313_v6 = vadd.s32 8, %v5879_v61 }
 0x12d   : > { %4172 = vmatmul.msk.bf16.gmra.mxu1 %vm545_vm0, %v1008_v8  ;;  %v1175_v9 = vsel %vm696_vm3, %v1165_v40, %v1174_v41 }
 0x12e   : > { %4197 = vmatmul.msk.bf16.gmra.mxu0 %vm545_vm0, %v1175_v9  ;;  %v1320_v15 = vadd.s32 4294967284, %v1313_v6  ;;  %1539 = vmatpush.bf16.msra.mxu3 %v5179_v11  ;;  %v5188_v11 = vld [vmem:[#allocation6 + $0x58] sm:$0xff] }
 0x12f   : > { %1764 = vmatpush.bf16.msrb.mxu0 %v5195_v12  ;;  %v5191_v12 = vld [vmem:[#allocation6 + $0x70] sm:$0xff] }
 0x130   : > { %vm1325_vm8 = vcmp.ge.s32.totalorder %v1320_v15, 0  ;;  %v5187_v15 = vld [vmem:[#allocation6 + $0x50] sm:$0xff] }
 0x138   : > { %4180 = vmatmul.msk.bf16.gmra.mxu2 %vm545_vm0, %v1053_v56 }
 0x139   : > { %4189 = vmatmul.msk.bf16.gmra.mxu3 %vm545_vm0, %v1103_v57 }
 0x13d   : > { %4173 = vmatmul.msk.bf16.gmra.mxu1 %vm545_vm0, %v1007_v7 }
 0x13e   : > { %4198 = vmatmul.msk.bf16.gmra.mxu0 %vm545_vm0, %v1174_v41 }
 0x14d   : > { %4205 = vmatmul.msk.bf16.vlgmr.msra.gmra.mxu1 %vm545_vm0, %v1228_v16 }
 0x15d   : > { %4206 = vmatmul.msk.bf16.gmra.mxu1 %vm545_vm0, %v1230_v19 }
 0x16d   : > { %4207 = vmatmul.msk.bf16.gmra.mxu1 %vm545_vm0, %v1229_v18 }
 0x195   : > { %v1033_v20 = vpop.f32.mrf.mxu1 }
 0x196   : > { %v1200_v21 = vpop.f32.mrf.mxu0 }
 0x197   : > { %v1079_v22 = vpop.f32.mrf.mxu2  ;;  %v1129_v23 = vpop.f32.mrf.mxu3 }
 0x198   : > { %v1080_v37 = vadd.f32 %v1079_v22, %v1033_v20  ;;  %v5183_v20 = vld [vmem:[#allocation6 + $0x30] sm:$0xff]  ;;  %v5194_v22 = vld [vmem:[#allocation6 + $0x88] sm:$0xff] }
 0x199   : > { %1482 = vmatpush.bf16.msra.mxu2 %v5183_v20  ;;  %1765 = vmatpush.bf16.msrb.mxu0 %v5194_v22 }
 0x19a   : > { %v1143_v43 = vadd.f32 %v1129_v23, %v1080_v37 }
 0x19c   : > { %v1214_v45 = vadd.f32 %v1200_v21, %v1143_v43  ;;  %v5178_v21 = vld [vmem:[#allocation6 + $0x8] sm:$0xff] }
 0x19d   : > { %v1035_v24 = vpop.f32.mrf.mxu1  ;;  %1540 = vmatpush.bf16.msra.mxu3 %v5178_v21 }
 0x19e   : > { %v1202_v0 = vpop.f32.mrf.mxu0 }
 0x19f   : > { %v1081_v25 = vpop.f32.mrf.mxu2  ;;  %v1131_v13 = vpop.f32.mrf.mxu3 }
 0x1a0   : > { %v1082_v44 = vadd.f32 %v1081_v25, %v1035_v24 }
 0x1a2   : > { %v1144_v49 = vadd.f32 %v1131_v13, %v1082_v44 }
 0x1a4   : > { %v1215_v54 = vadd.f32 %v1202_v0, %v1144_v49 }
 0x1aa   : > { %v1038_v26 = vpop.f32.mrf.mxu1 }
 0x1ab   : > { %v1205_v27 = vpop.f32.mrf.mxu0  ;;  %v1084_v3 = vpop.f32.mrf.mxu2 }
 0x1ac   : > { %v1134_v28 = vpop.f32.mrf.mxu3  ;;  %v1085_v52 = vadd.f32 %v1084_v3, %v1038_v26  ;;  %v5182_v26 = vld [vmem:[#allocation6 + $0x28] sm:$0xff]  ;;  %v5193_v3 = vld [vmem:[#allocation6 + $0x80] sm:$0xff] }
 0x1ad   : > { %1483 = vmatpush.bf16.msra.mxu2 %v5182_v26  ;;  %1766 = vmatpush.bf16.msrb.mxu0 %v5193_v3 }
 0x1ae   : > { %v1145_v59 = vadd.f32 %v1134_v28, %v1085_v52 }
 0x1b0   : > { %v1216_v7 = vadd.f32 %v1205_v27, %v1145_v59  ;;  %v5177_v27 = vld [vmem:[#allocation6] sm:$0xff] }
 0x1b1   : > { %1541 = vmatpush.bf16.msra.mxu3 %v5177_v27 }
 0x1b2   : > { %v1040_v29 = vpop.f32.mrf.mxu1 }
 0x1b3   : > { %v1207_v2 = vpop.f32.mrf.mxu0  ;;  %v1086_v30 = vpop.f32.mrf.mxu2 }
 0x1b4   : > { %v1136_v31 = vpop.f32.mrf.mxu3  ;;  %v1087_v4 = vadd.f32 %v1086_v30, %v1040_v29  ;;  %v5585_v29 = vmov 0.0  }
 0x1b5   : > { %v4208_v30 = vsel %vm1325_vm8, 1.0, %v5585_v29  ;;  %3973 = vst.msk [vmem:[%s468_s26] sm:$0x3] %vm3971_vm14, %v5585_v29 }
 0x1b6   : > { %v1146_v14 = vadd.f32 %v1136_v31, %v1087_v4 }
 0x1b8   : > { %v1217_v24 = vadd.f32 %v1207_v2, %v1146_v14 }
 0x1ba   : > { %v1043_v32 = vpop.f32.mrf.mxu1 }
 0x1bb   : > { %v5866_v33 = vpop.f32.mrf.mxu0  ;;  %v1089_v34 = vpop.f32.mrf.mxu2 }
 0x1bc   : > { %v5868_v36 = vpop.f32.mrf.mxu3  ;;  %v1090_v19 = vadd.f32 %v1089_v34, %v1043_v32 }
 0x1be   : > { %v1147_v28 = vadd.f32 %v5868_v36, %v1090_v19  ;;  %v5181_v36 = vld [vmem:[#allocation6 + $0x20] sm:$0xff] }
 0x1bf   : > { %1484 = vmatpush.bf16.msra.mxu2 %v5181_v36 }
 0x1c2   : > { %v1045_v38 = vpop.f32.mrf.mxu1 }
 0x1c3   : > { %v1212_v39 = vpop.f32.mrf.mxu0  ;;  %v1091_v40 = vpop.f32.mrf.mxu2  ;;  %1605 = vmatpush.bf16.msrb.mxu2 %v5188_v11 }
 0x1c4   : > { %v1141_v42 = vpop.f32.mrf.mxu3  ;;  %v1218_v40 = vadd.f32 %v5866_v33, %v1147_v28 }
 0x1c7   : > { %1606 = vmatpush.bf16.msrb.mxu2 %v5187_v15 }
 0x1ca   : > { %v1255_v47 = vpop.f32.mrf.mxu1 }
 0x1cb   : > { %v1269_v48 = vadd.f32 %v1255_v47, %v1214_v45  ;;  %v1315_v45 = vadd.s32 24, %v5879_v61 }
 0x1cd   : > { %v1278_v50 = vadd.f32 %v5873_v46, %v1269_v48 }
 0x1cf   : > { %v1283_v35 = vmul.f32 0.01, %v1278_v50 }
 0x1d1   : > { %v1288_v53 = vmax.f32 %v1278_v50, %v1283_v35  ;;  %v1322_v50 = vadd.s32 4294967284, %v1315_v45 }
 0x1d2   : > { %v1257_v56 = vpop.f32.mrf.mxu1 }
 0x1d3   : > { %v1293_v57 = vpack.c.bf16 %v1288_v53, %v1288_v53  ;;  %v1270_v58 = vadd.f32 %v1257_v56, %v1215_v54  ;;  %vm1332_vm9 = vcmp.lt.s32.totalorder %v1322_v50, 16 }
 0x1d4   : > { %v4209_v56 = vsel %vm1332_vm9, 1.0, %v5585_v29 }
 0x1d5   : > { %1299 = vst.msk [vmem:[#allocation3] sm:$0xf] %vm1298_vm7, %v1293_v57  ;;  %v1279_v60 = vadd.f32 %v5873_v46, %v1270_v58 }
 0x1d7   : > { %v1284_v62 = vmul.f32 0.01, %v1279_v60 }
 0x1d9   : > { %v1289_v5 = vmax.f32 %v1279_v60, %v1284_v62 }
 0x1da   : > { %v1260_v41 = vpop.f32.mrf.mxu1 }
 0x1db   : > { %v1294_v8 = vpack.c.bf16 %v1289_v5, %v1289_v5  ;;  %v1271_v9 = vadd.f32 %v1260_v41, %v1216_v7 }
 0x1dd   : > { %1300 = vst.msk [vmem:[#allocation3 + $0x4] sm:$0xf] %vm1298_vm7, %v1294_v8  ;;  %v1280_v16 = vadd.f32 %v5873_v46, %v1271_v9 }
 0x1df   : > { %v1285_v18 = vmul.f32 0.01, %v1280_v16 }
 0x1e1   : > { %v1290_v23 = vmax.f32 %v1280_v16, %v1285_v18  ;;  %v5190_v16 = vld [vmem:[#allocation6 + $0x68] sm:$0xff] }
 0x1e2   : > { %v1262_v0 = vpop.f32.mrf.mxu1 }
 0x1e3   : > { %v1295_v25 = vpack.c.bf16 %v1290_v23, %v1290_v23  ;;  %v1272_v13 = vadd.f32 %v1262_v0, %v1217_v24  ;;  %v5186_v23 = vld [vmem:[#allocation6 + $0x48] sm:$0xff]  ;;  %v5189_v24 = vld [vmem:[#allocation6 + $0x60] sm:$0xff] }
 0x1e4   : > { %v5410_v31 = vld [vmem:[#allocation3] sm:$0xff]   ;;  %1607 = vmatpush.bf16.msrb.mxu2 %v5186_v23 }
 0x1e5   : > { %v5411_v32 = vunpack.c.l.bf16 %v5410_v31  ;;  %v5412_v34 = vunpack.c.h.bf16 %v5410_v31  ;;  %1301 = vst.msk [vmem:[#allocation3 + $0x8] sm:$0xf] %vm1298_vm7, %v1295_v25  ;;  %v1281_v2 = vadd.f32 %v5873_v46, %v1272_v13 }
 0x1e7   : > { %v1369_v37 = vmul.f32 %v5411_v32, %v5790_v17  ;;  %v1370_v38 = vmul.f32 %v5412_v34, %v4208_v30  ;;  %v1286_v39 = vmul.f32 0.01, %v1281_v2 }
 0x1e9   : > { %v1374_v42 = vpack.c.bf16 %v1369_v37, %v1369_v37  ;;  %v1375_v43 = vpack.c.bf16 %v1370_v38, %v1370_v38  ;;  %v1291_v44 = vmax.f32 %v1281_v2, %v1286_v39  ;;  %v5185_v38 = vld [vmem:[#allocation6 + $0x40] sm:$0xff] }
 0x1ea   : > { %v1265_v47 = vpop.f32.mrf.mxu1  ;;  %1608 = vmatpush.bf16.msrb.mxu2 %v5185_v38 }
 0x1eb   : > { %1379 = vst.msk [vmem:[#allocation3] sm:$0xf] %vm1298_vm7, %v1374_v42  ;;  %v1296_v48 = vpack.c.bf16 %v1291_v44, %v1291_v44  ;;  %v1273_v49 = vadd.f32 %v1265_v47, %v1218_v40 }
 0x1ec   : > { %1380 = vst.msk [vmem:[#allocation3 + $0x4] sm:$0xf] %vm1298_vm7, %v1375_v43 }
 0x1ed   : > { %1302 = vst.msk [vmem:[#allocation3 + $0xc] sm:$0xf] %vm1298_vm7, %v1296_v48  ;;  %v1282_v35 = vadd.f32 %v5873_v46, %v1273_v49  ;;  %v5192_v46 = vld [vmem:[#allocation6 + $0x78] sm:$0xff] }
 0x1ee   : > { %1692 = vmatpush.bf16.msrb.mxu3 %v5192_v46 }
 0x1ef   : > { %v1287_v33 = vmul.f32 0.01, %v1282_v35 }
 0x1f1   : > { %v1292_v52 = vmax.f32 %v1282_v35, %v1287_v33 }
 0x1f2   : > { %v1267_v53 = vpop.f32.mrf.mxu1  ;;  %v1384_v60 = vld [vmem:[#allocation3] sm:$0xe]  ;;  %1693 = vmatpush.bf16.msrb.mxu3 %v5191_v12 }
 0x1f3   : > { %v1297_v54 = vpack.c.bf16 %v1292_v52, %v1292_v52  ;;  %v1385_v62 = vld [vmem:[#allocation3 + $0x4] sm:$0xf]  ;;  %v1412_v4 = vunpack.c.l.b16 %v1384_v60  ;;  %v1711_v41 = vld [vmem:[#allocation3] sm:$0x8] }
 0x1f4   : > { %v5427_v57 = vld [vmem:[#allocation3 + $0x8] sm:$0xff]   ;;  %v5898_v5 = vunpack.c.l.b16 %v1385_v62  ;;  %v1722_v10 = vunpack.c.l.b16 %v1711_v41  ;;  %v1553_v53 = vld [vmem:[#allocation3] sm:$0xc] }
 0x1f5   : > { %v5415_v58 = vunpack.c.l.bf16 %v5427_v57  ;;  %v5416_v59 = vunpack.c.h.bf16 %v5427_v57  ;;  %1303 = vst.msk [vmem:[#allocation3 + $0x10] sm:$0xf] %vm1298_vm7, %v1297_v54 }
 0x1f6   : > { %v1417_v9 = vpack.c.b16 %v5898_v5, %v1412_v4  ;;  %v1723_v19 = vpack.c.b16 %v5898_v5, %v1722_v10  ;;  %1694 = vmatpush.bf16.msrb.mxu3 %v5190_v16 }
 0x1f7   : > { %v1371_v63 = vmul.f32 %v5415_v58, %v5813_v51  ;;  %v1372_v1 = vmul.f32 %v5416_v59, %v4209_v56  ;;  %v1564_v59 = vunpack.c.l.b16 %v1553_v53 }
 0x1f8   : > { %v1421_v20 = vshrl.u32 %v1417_v9, 16  ;;  %v1424_v21 = vshll.u32 %v1417_v9, 16  ;;  %v1499_v25 = vrot.slane %v1417_v9, 1  ;;  %v1724_v13 = vrot.slane %v1723_v19, 3 }
 0x1f9   : > { %v1376_v6 = vpack.c.bf16 %v1371_v63, %v1371_v63  ;;  %v1377_v7 = vpack.c.bf16 %v1372_v1, %v1372_v1  ;;  %v1565_v1 = vpack.c.b16 %v5898_v5, %v1564_v59 }
 0x1fa   : > { %v1423_v26 = vrot.slane %v1421_v20, 1  ;;  %v1426_v27 = vrot.slane %v1424_v21, 2  ;;  %1695 = vmatpush.bf16.msrb.mxu3 %v5189_v24 }
 0x1fb   : > { %1381 = vst.msk [vmem:[#allocation3 + $0x8] sm:$0xf] %vm1298_vm7, %v1376_v6  ;;  %v1638_v46 = vshrl.u32 %v1565_v1, 16  ;;  %v1641_v6 = vshll.u32 %v1565_v1, 16  ;;  %v1566_v15 = vrot.slane %v1565_v1, 2 }
 0x1fc   : > { %1382 = vst.msk [vmem:[#allocation3 + $0xc] sm:$0xf] %vm1298_vm7, %v1377_v7  ;;  %v1358_v8 = vld [vmem:[#allocation3 + $0x10] sm:$0xf]  ;;  %v1427_v39 = vor.u32 %v1426_v27, %v1423_v26  ;;  %v5204_v1 = vld [vmem:[%s6452_s7 + $0x34] sm:$0xf0] }
 0x1fd   : > { %v1363_v14 = vunpack.c.l.bf16 %v1358_v8  ;;  %v1640_v8 = vrot.slane %v1638_v46, 2  ;;  %v1643_v9 = vrot.slane %v1641_v6, 3 }
 0x1ff   : > { %v1373_v18 = vmul.f32 %v1363_v14, %v5790_v17  ;;  %v1644_v11 = vor.u32 %v1643_v9, %v1640_v8  ;;  %v4338_v9 = vld [vmem:[%s6452_s7 + $0x70] sm:$0xf] }
 0x201   : > { %v1378_v22 = vpack.c.bf16 %v1373_v18, %v1373_v18 }
 0x203   : > { %1383 = vst.msk [vmem:[#allocation3 + $0x10] sm:$0xf] %vm1298_vm7, %v1378_v22  ;;  %v5906_v0 = vld [vmem:[#allocation3 + $0x8] sm:$0xff] }
 0x204   : > { %v1500_v3 = vrot.slane %v5906_v0, 1  ;;  %v1725_v28 = vrot.slane %v5906_v0, 3  ;;  %v1429_v30 = vshrl.u32 %v5906_v0, 16  ;;  %v1432_v31 = vshll.u32 %v5906_v0, 16 }
 0x205   : > { %v1567_v14 = vrot.slane %v5906_v0, 2 }
 0x206   : > { %v1501_v32 = vsel %vm582_vm2, %v1499_v25, %v1500_v3  ;;  %v1726_v34 = vsel %vm774_vm5, %v1724_v13, %v1725_v28  ;;  %v1431_v2 = vrot.slane %v1429_v30, 1  ;;  %v1434_v37 = vrot.slane %v1432_v31, 2 }
 0x207   : > { %4248 = vmatmul.msk.bf16.vlgmr.msra.gmra.mxu3 %vm1470_vm10, %v1501_v32  ;;  %4302 = vmatmul.msk.bf16.vlgmr.msrb.gmra.mxu0 %vm1470_vm10, %v1726_v34  ;;  %v1645_v7 = vrot.slane %v1429_v30, 2  ;;  %v1646_v41 = vrot.slane %v1432_v31, 3  ;;  %v1568_v5 = vsel %vm636_vm1, %v1566_v15, %v1567_v14 }
 0x208   : > { %v1435_v40 = vor.u32 %v1434_v37, %v1431_v2 }
 0x209   : > { %v1647_v10 = vor.u32 %v1646_v41, %v1645_v7  ;;  %v4376_v41 = vld [vmem:[%s6452_s7 + $0x38] sm:$0xf0] }
 0x20a   : > { %v1388_v36 = vld [vmem:[#allocation3 + $0x10] sm:$0x1]  ;;  %v1436_v44 = vsel %vm503_vm4, %v1427_v39, %v1435_v40  ;;  %v5937_v39 = vld [vmem:[%s6451_s6] ss:$0 sm:$0xff] }
 0x20b   : > { %v1624_v42 = vld [vmem:[#allocation3 + $0x10] sm:$0x7]  ;;  %v1497_v45 = vunpack.c.l.b16 %v1388_v36  ;;  %4230 = vmatmul.msk.bf16.vlgmr.msra.gmra.mxu2 %vm1470_vm10, %v1436_v44  ;;  %v1648_v12 = vsel %vm696_vm3, %v1644_v11, %v1647_v10  ;;  %v5211_v11 = vld [vmem:[%s6452_s7 + $0x74] sm:$0xf] }
 0x20c   : > { %v1397_v43 = vld [vmem:[#allocation3 + $0x10] sm:$0x3]  ;;  %v1635_v47 = vunpack.c.l.b16 %v1624_v42 }
 0x20d   : > { %v1416_v48 = vunpack.c.l.b16 %v1397_v43  ;;  %v1498_v50 = vpack.c.b16 %v1497_v45, %v1497_v45 }
 0x20e   : > { %v1636_v35 = vpack.c.b16 %v1635_v47, %v1635_v47 }
 0x20f   : > { %v1419_v49 = vpack.c.b16 %v1416_v48, %v1416_v48  ;;  %v1502_v54 = vrot.slane %v1498_v50, 1 }
 0x210   : > { %v1727_v56 = vrot.slane %v1636_v35, 3  ;;  %v1650_v16 = vshrl.u32 %v1636_v35, 16  ;;  %v1653_v18 = vshll.u32 %v1636_v35, 16 }
 0x211   : > { %v1438_v33 = vshrl.u32 %v1419_v49, 16  ;;  %v1441_v52 = vshll.u32 %v1419_v49, 16  ;;  %v1503_v60 = vsel %vm582_vm2, %v1500_v3, %v1502_v54  ;;  %v1569_v23 = vrot.slane %v1419_v49, 2 }
 0x212   : > { %v1728_v62 = vsel %vm774_vm5, %v1725_v28, %v1727_v56  ;;  %v1652_v19 = vrot.slane %v1650_v16, 2  ;;  %v1655_v20 = vrot.slane %v1653_v18, 3  ;;  %v4366_v16 = vld [vmem:[%s6452_s7 + $0x20] sm:$0xf] }
 0x213   : > { %v1440_v57 = vrot.slane %v1438_v33, 1  ;;  %v1443_v58 = vrot.slane %v1441_v52, 2  ;;  %v1570_v24 = vsel %vm636_vm1, %v1567_v14, %v1569_v23 }
 0x214   : > { %v1656_v21 = vor.u32 %v1655_v20, %v1652_v19  ;;  %v5202_v20 = vld [vmem:[%s6452_s7 + $0x24] sm:$0xf0] }
 0x215   : > { %v1444_v63 = vor.u32 %v1443_v58, %v1440_v57 }
 0x216   : > { %v1657_v22 = vsel %vm696_vm3, %v1647_v10, %v1656_v21  ;;  %v5212_v10 = vld [vmem:[%s6452_s7 + $0x74] sm:$0xf0]  ;;  %v5201_v21 = vld [vmem:[%s6452_s7 + $0x24] sm:$0xf] }
 0x217   : > { %4249 = vmatmul.msk.bf16.gmra.mxu3 %vm1470_vm10, %v1503_v60  ;;  %4303 = vmatmul.msk.bf16.gmra.mxu0 %vm1470_vm10, %v1728_v62  ;;  %v1445_v4 = vsel %vm503_vm4, %v1435_v40, %v1444_v63  ;;  %v4374_v63 = vld [vmem:[%s6452_s7 + $0x30] sm:$0xf]  ;;  %v4339_v15 = vor.u32 %v5212_v10, %v4338_v9  ;;  %v5205_v9 = vld [vmem:[%s6452_s7 + $0x44] sm:$0xf] }
 0x218   : > { %v4375_v7 = vor.u32 %v5204_v1, %v4374_v63 }
 0x219   : > { %1971 = vmatpush.bf16.msrb.mxu1 %v4339_v15 }
 0x21a   : > { %2059 = vmatpush.bf16.msra.mxu3 %v4375_v7 }
 0x21b   : > { %4231 = vmatmul.msk.bf16.gmra.mxu2 %vm1470_vm10, %v1445_v4  ;;  %v5203_v4 = vld [vmem:[%s6452_s7 + $0x34] sm:$0xf] }
 0x21c   : > { %v4379_v8 = vor.u32 %v5203_v4, %v4376_v41 }
 0x21e   : > { %2077 = vmatpush.bf16.msra.mxu0 %v4379_v8  ;;  %v5206_v8 = vld [vmem:[%s6452_s7 + $0x44] sm:$0xf0] }
 0x227   : > { %4284 = vmatmul.msk.bf16.vlgmr.msrb.gmra.mxu3 %vm1470_vm10, %v1648_v12 }
 0x22b   : > { %4266 = vmatmul.msk.bf16.vlgmr.msrb.gmra.mxu2 %vm1470_vm10, %v1568_v5  ;;  %v4340_v5 = vld [vmem:[%s6452_s7 + $0x78] sm:$0xf0] }
 0x22c   : > { %v4343_v19 = vor.u32 %v5211_v11, %v4340_v5 }
 0x22e   : > { %1989 = vmatpush.bf16.msra.mxu2 %v4343_v19 }
 0x237   : > { %4285 = vmatmul.msk.bf16.gmra.mxu3 %vm1470_vm10, %v1657_v22  ;;  %v4368_v22 = vld [vmem:[%s6452_s7 + $0x28] sm:$0xf0] }
 0x23b   : > { %4267 = vmatmul.msk.bf16.gmra.mxu2 %vm1470_vm10, %v1570_v24 }
 0x284   : > { %v1768_v32 = vpop.f32.mrf.mxu0 }
 0x28a   : > { %v1543_v0 = vpop.f32.mrf.mxu3 }
 0x28c   : > { %v1770_v44 = vpop.f32.mrf.mxu0 }
 0x28e   : > { %v1486_v25 = vpop.f32.mrf.mxu2 }
 0x28f   : > { %v1544_v34 = vadd.f32 %v1543_v0, %v1486_v25  ;;  %v4367_v0 = vor.u32 %v5202_v20, %v4366_v16  ;;  %v4371_v25 = vor.u32 %v5201_v21, %v4368_v22  ;;  %v4462_v22 = vld [vmem:[%s6452_s7 + $0xf0] sm:$0xf] }
 0x291   : > { %2060 = vmatpush.bf16.msra.mxu3 %v4367_v0  ;;  %2078 = vmatpush.bf16.msra.mxu0 %v4371_v25 }
 0x292   : > { %v1545_v13 = vpop.f32.mrf.mxu3 }
 0x294   : > { %v1773_v59 = vpop.f32.mrf.mxu0 }
 0x296   : > { %v1488_v26 = vpop.f32.mrf.mxu2 }
 0x297   : > { %v1546_v42 = vadd.f32 %v1545_v13, %v1488_v26  ;;  %v4330_v13 = vld [vmem:[%s6452_s7 + $0x60] sm:$0xf]  ;;  %v5210_v26 = vld [vmem:[%s6452_s7 + $0x64] sm:$0xf0] }
 0x29a   : > { %v1548_v27 = vpop.f32.mrf.mxu3 }
 0x29e   : > { %v1491_v3 = vpop.f32.mrf.mxu2 }
 0x29f   : > { %v1549_v52 = vadd.f32 %v1548_v27, %v1491_v3  ;;  %v4331_v3 = vor.u32 %v5210_v26, %v4330_v13  ;;  %v4418_v26 = vld [vmem:[%s6452_s7 + $0xb0] sm:$0xf] }
 0x2a1   : > { %1972 = vmatpush.bf16.msrb.mxu1 %v4331_v3  ;;  %v5219_v3 = vld [vmem:[%s6452_s7 + $0xb4] sm:$0xf] }
 0x2a2   : > { %v1550_v28 = vpop.f32.mrf.mxu3 }
 0x2a6   : > { %v1493_v30 = vpop.f32.mrf.mxu2 }
 0x2a7   : > { %v1551_v12 = vadd.f32 %v1550_v28, %v1493_v30  ;;  %v5209_v28 = vld [vmem:[%s6452_s7 + $0x64] sm:$0xf]  ;;  %v4332_v30 = vld [vmem:[%s6452_s7 + $0x68] sm:$0xf0] }
 0x2aa   : > { %v1697_v31 = vpop.f32.mrf.mxu3 }
 0x2ae   : > { %v1610_v2 = vpop.f32.mrf.mxu2 }
 0x2af   : > { %v1620_v37 = vadd.f32 %v1610_v2, %v1544_v34  ;;  %v4335_v2 = vor.u32 %v5209_v28, %v4332_v30  ;;  %v4420_v30 = vld [vmem:[%s6452_s7 + $0xb8] sm:$0xf0] }
 0x2b1   : > { %v1707_v38 = vadd.f32 %v1697_v31, %v1620_v37  ;;  %v4358_v31 = vld [vmem:[%s6452_s7 + $0x10] sm:$0xf]  ;;  %v5200_v37 = vld [vmem:[%s6452_s7 + $0x14] sm:$0xf0]  ;;  %1990 = vmatpush.bf16.msra.mxu2 %v4335_v2 }
 0x2b2   : > { %v1699_v36 = vpop.f32.mrf.mxu3 }
 0x2b3   : > { %v1778_v40 = vadd.f32 %v1768_v32, %v1707_v38  ;;  %v5199_v38 = vld [vmem:[%s6452_s7 + $0x14] sm:$0xf] }
 0x2b5   : > { %v1786_v43 = vadd.f32 %v5937_v39, %v1778_v40  ;;  %v4360_v40 = vld [vmem:[%s6452_s7 + $0x18] sm:$0xf0] }
 0x2b6   : > { %v1612_v45 = vpop.f32.mrf.mxu2 }
 0x2b7   : > { %v1790_v47 = vmul.f32 0.01, %v1786_v43  ;;  %v1621_v48 = vadd.f32 %v1612_v45, %v1546_v42  ;;  %v4359_v42 = vor.u32 %v5200_v37, %v4358_v31  ;;  %v5208_v45 = vld [vmem:[%s6452_s7 + $0x54] sm:$0xf0]  ;;  %v4454_v31 = vld [vmem:[%s6452_s7 + $0xe0] sm:$0xf] }
 0x2b8   : > { %v5225_v37 = vld [vmem:[%s6452_s7 + $0xe4] sm:$0xf] }
 0x2b9   : > { %v1794_v49 = vmax.f32 %v1786_v43, %v1790_v47  ;;  %v1708_v50 = vadd.f32 %v1699_v36, %v1621_v48  ;;  %v1775_v36 = vpop.f32.mrf.mxu0  ;;  %v4363_v43 = vor.u32 %v5199_v38, %v4360_v40  ;;  %v5207_v47 = vld [vmem:[%s6452_s7 + $0x54] sm:$0xf]  ;;  %2061 = vmatpush.bf16.msra.mxu3 %v4359_v42  ;;  %v4456_v38 = vld [vmem:[%s6452_s7 + $0xe8] sm:$0xf0]  ;;  %v4410_v40 = vld [vmem:[%s6452_s7 + $0xa0] sm:$0xf] }
 0x2ba   : > { %v1702_v54 = vpop.f32.mrf.mxu3  ;;  %v5218_v42 = vld [vmem:[%s6452_s7 + $0xa4] sm:$0xf0] }
 0x2bb   : > { %v1798_v35 = vpack.c.bf16 %v1794_v49, %v1794_v49  ;;  %v1779_v33 = vadd.f32 %v1770_v44, %v1708_v50  ;;  %v4322_v44 = vld [vmem:[%s6452_s7 + $0x50] sm:$0xf]  ;;  %2079 = vmatpush.bf16.msra.mxu0 %v4363_v43  ;;  %v5217_v43 = vld [vmem:[%s6452_s7 + $0xa4] sm:$0xf] }
 0x2bc   : > { %v4323_v50 = vor.u32 %v5208_v45, %v4322_v44  ;;  %v4412_v44 = vld [vmem:[%s6452_s7 + $0xa8] sm:$0xf0] }
 0x2bd   : > { %1802 = vst.msk [vmem:[#allocation4] sm:$0xf] %vm1298_vm7, %v1798_v35  ;;  %v1787_v53 = vadd.f32 %v5937_v39, %v1779_v33  ;;  %v4324_v35 = vld [vmem:[%s6452_s7 + $0x58] sm:$0xf0]  ;;  %v4350_v33 = vld [vmem:[%s6452_s7] sm:$0xf] }
 0x2be   : > { %v1615_v56 = vpop.f32.mrf.mxu2  ;;  %1973 = vmatpush.bf16.msrb.mxu1 %v4323_v50  ;;  %v5224_v50 = vld [vmem:[%s6452_s7 + $0xd4] sm:$0xf0] }
 0x2bf   : > { %v1791_v57 = vmul.f32 0.01, %v1787_v53  ;;  %v1622_v58 = vadd.f32 %v1615_v56, %v1549_v52  ;;  %v5198_v52 = vld [vmem:[%s6452_s7 + $0x4] sm:$0xf0]  ;;  %v5197_v56 = vld [vmem:[%s6452_s7 + $0x4] sm:$0xf] }
 0x2c1   : > { %v1795_v60 = vmax.f32 %v1787_v53, %v1791_v57  ;;  %v1709_v62 = vadd.f32 %v1702_v54, %v1622_v58  ;;  %v4327_v54 = vor.u32 %v5207_v47, %v4324_v35  ;;  %v4352_v57 = vld [vmem:[%s6452_s7 + $0x8] sm:$0xf0]  ;;  %v4411_v47 = vor.u32 %v5218_v42, %v4410_v40 }
 0x2c2   : > { %v1704_v27 = vpop.f32.mrf.mxu3  ;;  %v4355_v63 = vor.u32 %v5197_v56, %v4352_v57 }
 0x2c3   : > { %v1799_v46 = vpack.c.bf16 %v1795_v60, %v1795_v60  ;;  %v1780_v6 = vadd.f32 %v1773_v59, %v1709_v62  ;;  %v4351_v62 = vor.u32 %v5198_v52, %v4350_v33  ;;  %1991 = vmatpush.bf16.msra.mxu2 %v4327_v54 }
 0x2c4   : > { %2080 = vmatpush.bf16.msra.mxu0 %v4355_v63 }
 0x2c5   : > { %1803 = vst.msk [vmem:[#allocation4 + $0x4] sm:$0xf] %vm1298_vm7, %v1799_v46  ;;  %v1788_v14 = vadd.f32 %v5937_v39, %v1780_v6  ;;  %2062 = vmatpush.bf16.msra.mxu3 %v4351_v62  ;;  %v4402_v62 = vld [vmem:[%s6452_s7 + $0x90] sm:$0xf] }
 0x2c6   : > { %v1617_v18 = vpop.f32.mrf.mxu2 }
 0x2c7   : > { %v1792_v23 = vmul.f32 0.01, %v1788_v14  ;;  %v1623_v24 = vadd.f32 %v1617_v18, %v1551_v12  ;;  %v4316_v12 = vld [vmem:[%s6452_s7 + $0x48] sm:$0xf0] }
 0x2c9   : > { %v1796_v32 = vmax.f32 %v1788_v14, %v1792_v23  ;;  %v1710_v34 = vadd.f32 %v1704_v27, %v1623_v24  ;;  %v4319_v14 = vor.u32 %v5205_v9, %v4316_v12  ;;  %v5228_v23 = vld [vmem:[%s6452_s7 + $0xf4] sm:$0xf0]  ;;  %v5227_v24 = vld [vmem:[%s6452_s7 + $0xf4] sm:$0xf]  ;;  %v5221_v9 = vld [vmem:[%s6452_s7 + $0xc4] sm:$0xf] }
 0x2ca   : > { %v4463_v0 = vor.u32 %v5228_v23, %v4462_v22  ;;  %v5220_v27 = vld [vmem:[%s6452_s7 + $0xb4] sm:$0xf0] }
 0x2cb   : > { %v1800_v48 = vpack.c.bf16 %v1796_v32, %v1796_v32  ;;  %v1781_v49 = vadd.f32 %v1775_v36, %v1710_v34  ;;  %1992 = vmatpush.bf16.msra.mxu2 %v4319_v14  ;;  %v4419_v28 = vor.u32 %v5220_v27, %v4418_v26  ;;  %v5226_v32 = vld [vmem:[%s6452_s7 + $0xe4] sm:$0xf0]  ;;  %v4423_v34 = vor.u32 %v5219_v3, %v4420_v30  ;;  %v5213_v3 = vld [vmem:[%s6452_s7 + $0x84] sm:$0xf]  ;;  %v4396_v30 = vld [vmem:[%s6452_s7 + $0x88] sm:$0xf0] }
 0x2cc   : > { %v5418_v53 = vld [vmem:[#allocation4] sm:$0xff]   ;;  %2275 = vmatpush.bf16.msrb.mxu3 %v4463_v0  ;;  %v4455_v2 = vor.u32 %v5226_v32, %v4454_v31  ;;  %v4459_v36 = vor.u32 %v5225_v37, %v4456_v38  ;;  %v5214_v27 = vld [vmem:[%s6452_s7 + $0x84] sm:$0xf0]  ;;  %v4399_v32 = vor.u32 %v5213_v3, %v4396_v30 }
 0x2cd   : > { %v5419_v58 = vunpack.c.l.bf16 %v5418_v53  ;;  %v5420_v59 = vunpack.c.h.bf16 %v5418_v53  ;;  %1804 = vst.msk [vmem:[#allocation4 + $0x8] sm:$0xf] %vm1298_vm7, %v1800_v48  ;;  %v1789_v60 = vadd.f32 %v5937_v39, %v1781_v49  ;;  %v4314_v39 = vld [vmem:[%s6452_s7 + $0x40] sm:$0xf]  ;;  %v4415_v48 = vor.u32 %v5217_v43, %v4412_v44  ;;  %v4446_v49 = vld [vmem:[%s6452_s7 + $0xd0] sm:$0xf] }
 0x2ce   : > { %v4315_v11 = vor.u32 %v5206_v8, %v4314_v39  ;;  %v4447_v56 = vor.u32 %v5224_v50, %v4446_v49  ;;  %v4438_v39 = vld [vmem:[%s6452_s7 + $0xc0] sm:$0xf]  ;;  %v5222_v8 = vld [vmem:[%s6452_s7 + $0xc4] sm:$0xf0]  ;;  %v5235_v49 = vld [vmem:[%s6452_s7 + $0x134] sm:$0xf] }
 0x2cf   : > { %v1860_v1 = vmul.f32 %v5419_v58, %v5790_v17  ;;  %v1861_v4 = vmul.f32 %v5420_v59, %v5813_v51  ;;  %v1793_v46 = vmul.f32 0.01, %v1789_v60  ;;  %2175 = vmatpush.bf16.msrb.mxu2 %v4423_v34  ;;  %v5223_v59 = vld [vmem:[%s6452_s7 + $0xd4] sm:$0xf]  ;;  %v4439_v22 = vor.u32 %v5222_v8, %v4438_v39 }
 0x2d0   : > { %1974 = vmatpush.bf16.msrb.mxu1 %v4315_v11  ;;  %2276 = vmatpush.bf16.msrb.mxu3 %v4455_v2 }
 0x2d1   : > { %v1864_v6 = vpack.c.bf16 %v1860_v1, %v1860_v1  ;;  %v1865_v7 = vpack.c.bf16 %v1861_v4, %v1861_v4  ;;  %v1797_v41 = vmax.f32 %v1789_v60, %v1793_v46  ;;  %v4448_v60 = vld [vmem:[%s6452_s7 + $0xd8] sm:$0xf0]  ;;  %v5216_v4 = vld [vmem:[%s6452_s7 + $0x94] sm:$0xf0]  ;;  %v5215_v46 = vld [vmem:[%s6452_s7 + $0x94] sm:$0xf] }
 0x2d2   : > { %v4451_v1 = vor.u32 %v5223_v59, %v4448_v60  ;;  %v4403_v14 = vor.u32 %v5216_v4, %v4402_v62  ;;  %v4490_v4 = vld [vmem:[%s6452_s7 + $0x110] sm:$0xf] }
 0x2d3   : > { %1868 = vst.msk [vmem:[#allocation4] sm:$0xf] %vm1298_vm7, %v1864_v6  ;;  %v1801_v10 = vpack.c.bf16 %v1797_v41, %v1797_v41  ;;  %v4404_v6 = vld [vmem:[%s6452_s7 + $0x98] sm:$0xf0]  ;;  %2176 = vmatpush.bf16.msrb.mxu2 %v4415_v48  ;;  %v5236_v48 = vld [vmem:[%s6452_s7 + $0x134] sm:$0xf0] }
 0x2d4   : > { %1869 = vst.msk [vmem:[#allocation4 + $0x4] sm:$0xf] %vm1298_vm7, %v1865_v7  ;;  %2157 = vmatpush.bf16.msra.mxu1 %v4419_v28  ;;  %2277 = vmatpush.bf16.msrb.mxu3 %v4447_v56 }
 0x2d5   : > { %1805 = vst.msk [vmem:[#allocation4 + $0xc] sm:$0xf] %vm1298_vm7, %v1801_v10 }
 0x2d8   : > { %2158 = vmatpush.bf16.msra.mxu1 %v4411_v47  ;;  %2278 = vmatpush.bf16.msrb.mxu3 %v4439_v22  ;;  %v4506_v47 = vld [vmem:[%s6452_s7 + $0x130] sm:$0xf] }
 0x2d9   : > { %v4507_v50 = vor.u32 %v5236_v48, %v4506_v47  ;;  %v4576_v47 = vld [vmem:[#allocation8 + $0x170] sm:$0xf]  ;;  %v5284_v48 = vld [vmem:[#allocation8 + $0x174] sm:$0xf0] }
 0x2da   : > { %v1872_v13 = vld [vmem:[#allocation4] sm:$0xe] }
 0x2db   : > { %v1898_v33 = vunpack.c.l.b16 %v1872_v13  ;;  %v4394_v13 = vld [vmem:[%s6452_s7 + $0x80] sm:$0xf]  ;;  %v2091_v2 = vld [vmem:[#allocation4] sm:$0xc] }
 0x2dc   : > { %v5428_v15 = vld [vmem:[#allocation4 + $0x8] sm:$0xff]   ;;  %2159 = vmatpush.bf16.msra.mxu1 %v4403_v14  ;;  %v4395_v28 = vor.u32 %v5214_v27, %v4394_v13  ;;  %v2102_v38 = vunpack.c.l.b16 %v2091_v2  ;;  %v5229_v14 = vld [vmem:[%s6452_s7 + $0x104] sm:$0xf] }
 0x2dd   : > { %v5423_v5 = vunpack.c.l.bf16 %v5428_v15  ;;  %v5424_v16 = vunpack.c.h.bf16 %v5428_v15  ;;  %v4440_v15 = vld [vmem:[%s6452_s7 + $0xc8] sm:$0xf0] }
 0x2de   : > { %v4443_v23 = vor.u32 %v5221_v9, %v4440_v15  ;;  %v4484_v15 = vld [vmem:[%s6452_s7 + $0x108] sm:$0xf0] }
 0x2df   : > { %v1862_v18 = vmul.f32 %v5423_v5, %v5813_v51  ;;  %v1863_v19 = vmul.f32 %v5424_v16, %v5790_v17  ;;  %v4464_v17 = vld [vmem:[%s6452_s7 + $0xf8] sm:$0xf0] }
 0x2e0   : > { %v4467_v25 = vor.u32 %v5227_v24, %v4464_v17  ;;  %2160 = vmatpush.bf16.msra.mxu1 %v4395_v28 }
 0x2e1   : > { %v1866_v20 = vpack.c.bf16 %v1862_v18, %v1862_v18  ;;  %v1867_v21 = vpack.c.bf16 %v1863_v19, %v1863_v19  ;;  %v4407_v19 = vor.u32 %v5215_v46, %v4404_v6  ;;  %v5232_v46 = vld [vmem:[%s6452_s7 + $0x114] sm:$0xf0]  ;;  %v5231_v6 = vld [vmem:[%s6452_s7 + $0x114] sm:$0xf] }
 0x2e2   : > { %2293 = vmatpush.bf16.msrb.mxu0 %v4467_v25  ;;  %v4491_v9 = vor.u32 %v5232_v46, %v4490_v4  ;;  %v4632_v4 = vld [vmem:[#allocation8 + $0x1e0] sm:$0xf] }
 0x2e3   : > { %1870 = vst.msk [vmem:[#allocation4 + $0x8] sm:$0xf] %vm1298_vm7, %v1866_v20  ;;  %2177 = vmatpush.bf16.msrb.mxu2 %v4407_v19 }
 0x2e4   : > { %1871 = vst.msk [vmem:[#allocation4 + $0xc] sm:$0xf] %vm1298_vm7, %v1867_v21 }
 0x2e6   : > { %2294 = vmatpush.bf16.msrb.mxu0 %v4459_v36 }
 0x2e7   : > { %2178 = vmatpush.bf16.msrb.mxu2 %v4399_v32 }
 0x2ea   : > { %v1873_v45 = vld [vmem:[#allocation4 + $0x4] sm:$0xff]   ;;  %2295 = vmatpush.bf16.msrb.mxu0 %v4451_v1 }
 0x2eb   : > { %v1875_v35 = vld [vmem:[#allocation4 + $0xc] sm:$0x1]  ;;  %v6105_v52 = vunpack.c.l.b16 %v1873_v45  ;;  %v6107_v53 = vunpack.c.h.b16 %v1873_v45 }
 0x2ec   : > { %v1884_v54 = vld [vmem:[#allocation4 + $0xc] sm:$0x3]  ;;  %v2004_v57 = vunpack.c.l.b16 %v1875_v35  ;;  %v4508_v35 = vld [vmem:[%s6452_s7 + $0x138] sm:$0xf0] }
 0x2ed   : > { %v1901_v58 = vunpack.c.l.b16 %v1884_v54  ;;  %v1902_v63 = vpack.c.b16 %v6105_v52, %v1898_v33  ;;  %v2195_v34 = vld [vmem:[#allocation4 + $0xc] sm:$0x7]  ;;  %v2103_v40 = vpack.c.b16 %v6105_v52, %v2102_v38  ;;  %v4498_v33 = vld [vmem:[%s6452_s7 + $0x120] sm:$0xf]  ;;  %v4511_v56 = vor.u32 %v5235_v49, %v4508_v35  ;;  %v4640_v49 = vld [vmem:[#allocation8 + $0x1f0] sm:$0xf] }
 0x2ee   : > { %v2005_v7 = vpack.c.b16 %v2004_v57, %v6107_v53  ;;  %2296 = vmatpush.bf16.msrb.mxu0 %v4443_v23  ;;  %v2206_v37 = vunpack.c.l.b16 %v2195_v34  ;;  %v5233_v57 = vld [vmem:[%s6452_s7 + $0x124] sm:$0xf]  ;;  %v5300_v35 = vld [vmem:[#allocation8 + $0x1f4] sm:$0xf0] }
 0x2ef   : > { %v6130_v41 = vpack.c.b16 %v1901_v58, %v6107_v53  ;;  %v2006_v10 = vrot.slane %v1902_v63, 1  ;;  %v1905_v11 = vshrl.u32 %v1902_v63, 16  ;;  %v1908_v12 = vshll.u32 %v1902_v63, 16  ;;  %v4500_v58 = vld [vmem:[%s6452_s7 + $0x128] sm:$0xf0] }
 0x2f0   : > { %v2007_v5 = vrot.slane %v2005_v7, 1  ;;  %v2207_v36 = vpack.c.b16 %v2206_v37, %v6107_v53  ;;  %v2209_v42 = vshrl.u32 %v2103_v40, 16  ;;  %v2212_v43 = vshll.u32 %v2103_v40, 16  ;;  %v5234_v53 = vld [vmem:[%s6452_s7 + $0x124] sm:$0xf0] }
 0x2f1   : > { %v1913_v16 = vshrl.u32 %v6130_v41, 16  ;;  %v1916_v18 = vshll.u32 %v6130_v41, 16  ;;  %v1907_v20 = vrot.slane %v1905_v11, 1  ;;  %v1910_v21 = vrot.slane %v1908_v12, 2  ;;  %v4492_v7 = vld [vmem:[%s6452_s7 + $0x118] sm:$0xf0] }
 0x2f2   : > { %v2008_v24 = vsel %vm582_vm2, %v2006_v10, %v2007_v5  ;;  %v2217_v44 = vshrl.u32 %v2207_v36, 16  ;;  %v2220_v45 = vshll.u32 %v2207_v36, 16  ;;  %v2211_v54 = vrot.slane %v2209_v42, 2  ;;  %v4482_v10 = vld [vmem:[%s6452_s7 + $0x100] sm:$0xf] }
 0x2f3   : > { %v1915_v0 = vrot.slane %v1913_v16, 1  ;;  %v1918_v17 = vrot.slane %v1916_v18, 2  ;;  %4380 = vmatmul.msk.bf16.vlgmr.msra.gmra.mxu3 %vm1470_vm10, %v2008_v24  ;;  %4382 = vmatmul.msk.bf16.vlgmr.msra.gmra.mxu0 %vm1470_vm10, %v2008_v24  ;;  %v1911_v25 = vor.u32 %v1910_v21, %v1907_v20  ;;  %v2214_v59 = vrot.slane %v2212_v43, 3  ;;  %v5230_v11 = vld [vmem:[%s6452_s7 + $0x104] sm:$0xf0] }
 0x2f4   : > { %v2219_v60 = vrot.slane %v2217_v44, 2  ;;  %v2222_v62 = vrot.slane %v2220_v45, 3  ;;  %v4499_v63 = vor.u32 %v5234_v53, %v4498_v33  ;;  %v4503_v1 = vor.u32 %v5233_v57, %v4500_v58  ;;  %v5283_v33 = vld [vmem:[#allocation8 + $0x174] sm:$0xf]  ;;  %v4578_v53 = vld [vmem:[#allocation8 + $0x178] sm:$0xf0] }
 0x2f5   : > { %v1919_v26 = vor.u32 %v1918_v17, %v1915_v0  ;;  %v2215_v39 = vor.u32 %v2214_v59, %v2211_v54  ;;  %v4495_v12 = vor.u32 %v5231_v6, %v4492_v7  ;;  %v2104_v16 = vrot.slane %v2103_v40, 2  ;;  %v5299_v58 = vld [vmem:[#allocation8 + $0x1f4] sm:$0xf]  ;;  %v4642_v59 = vld [vmem:[#allocation8 + $0x1f8] sm:$0xf0] }
 0x2f6   : > { %v2223_v8 = vor.u32 %v2222_v62, %v2219_v60  ;;  %v2105_v18 = vrot.slane %v6130_v41, 2  ;;  %v4483_v19 = vor.u32 %v5230_v11, %v4482_v10  ;;  %v4487_v20 = vor.u32 %v5229_v14, %v4484_v15  ;;  %v2313_v41 = vld [vmem:[#allocation4] sm:$0x8]  ;;  %v5298_v6 = vld [vmem:[#allocation8 + $0x1e4] sm:$0xf0] }
 0x2f7   : > { %v1920_v31 = vsel %vm503_vm4, %v1911_v25, %v1919_v26  ;;  %v2324_v22 = vunpack.c.l.b16 %v2313_v41  ;;  %v2327_v0 = vrot.slane %v2207_v36, 3  ;;  %v4581_v57 = vor.u32 %v5283_v33, %v4578_v53  ;;  %v5281_v7 = vld [vmem:[#allocation8 + $0x164] sm:$0xf]  ;;  %v4562_v41 = vld [vmem:[#allocation8 + $0x158] sm:$0xf0] }
 0x2f8   : > { %4344 = vmatmul.msk.bf16.vlgmr.msrb.gmra.mxu1 %vm1470_vm10, %v1920_v31  ;;  %4346 = vmatmul.msk.bf16.vlgmr.msra.gmra.mxu2 %vm1470_vm10, %v1920_v31  ;;  %v2106_v21 = vsel %vm636_vm1, %v2104_v16, %v2105_v18  ;;  %v4645_v60 = vor.u32 %v5299_v58, %v4642_v59  ;;  %v5297_v11 = vld [vmem:[#allocation8 + $0x1e4] sm:$0xf]  ;;  %v5280_v16 = vld [vmem:[#allocation8 + $0x154] sm:$0xf0]  ;;  %v4554_v53 = vld [vmem:[#allocation8 + $0x148] sm:$0xf0] }
 0x2f9   : > { %2379 = vmatpush.bf16.msrb.mxu1 %v4507_v50  ;;  %2397 = vmatpush.bf16.msra.mxu2 %v4511_v56  ;;  %v2325_v23 = vpack.c.b16 %v6105_v52, %v2324_v22  ;;  %v4577_v50 = vor.u32 %v5284_v48, %v4576_v47  ;;  %v4641_v56 = vor.u32 %v5300_v35, %v4640_v49  ;;  %v4616_v47 = vld [vmem:[#allocation8 + $0x1c0] sm:$0xf]  ;;  %v5294_v49 = vld [vmem:[#allocation8 + $0x1c4] sm:$0xf0]  ;;  %v4618_v58 = vld [vmem:[#allocation8 + $0x1c8] sm:$0xf0] }
 0x2fa   : > { %v4617_v33 = vor.u32 %v5294_v49, %v4616_v47  ;;  %v4602_v47 = vld [vmem:[#allocation8 + $0x1a8] sm:$0xf0] }
 0x2fb   : > { %v2326_v24 = vrot.slane %v2325_v23, 3  ;;  %2783 = vmatpush.bf16.msra.mxu3 %v4577_v50  ;;  %2797 = vmatpush.bf16.msra.mxu0 %v4641_v56  ;;  %v5277_v50 = vld [vmem:[#allocation8 + $0x144] sm:$0xf]  ;;  %v2417_v49 = vld [vmem:[%s6453_s8] sm:$0x3] }
 0x2fc   : > { %v5293_v56 = vld [vmem:[#allocation8 + $0x1c4] sm:$0xf] }
 0x2fd   : > { %2380 = vmatpush.bf16.msrb.mxu1 %v4499_v63  ;;  %2398 = vmatpush.bf16.msra.mxu2 %v4503_v1  ;;  %v2328_v17 = vsel %vm774_vm5, %v2326_v24, %v2327_v0  ;;  %v4568_v63 = vld [vmem:[#allocation8 + $0x160] sm:$0xf]  ;;  %v5282_v1 = vld [vmem:[#allocation8 + $0x164] sm:$0xf0] }
 0x2fe   : > { %v4569_v46 = vor.u32 %v5282_v1, %v4568_v63  ;;  %v4544_v63 = vld [vmem:[#allocation8 + $0x130] sm:$0xf]  ;;  %v5276_v1 = vld [vmem:[#allocation8 + $0x134] sm:$0xf0] }
 0x300   : > { %2784 = vmatpush.bf16.msra.mxu3 %v4569_v46  ;;  %v4545_v46 = vor.u32 %v5276_v1, %v4544_v63  ;;  %v5287_v1 = vld [vmem:[#allocation8 + $0x194] sm:$0xf] }
 0x301   : > { %2381 = vmatpush.bf16.msrb.mxu1 %v4491_v9  ;;  %2399 = vmatpush.bf16.msra.mxu2 %v4495_v12  ;;  %v4633_v9 = vor.u32 %v5298_v6, %v4632_v4  ;;  %v4634_v12 = vld [vmem:[#allocation8 + $0x1e8] sm:$0xf0]  ;;  %v4608_v4 = vld [vmem:[#allocation8 + $0x1b0] sm:$0xf]  ;;  %v5292_v6 = vld [vmem:[#allocation8 + $0x1b4] sm:$0xf0] }
 0x302   : > { %v4637_v14 = vor.u32 %v5297_v11, %v4634_v12  ;;  %v5291_v12 = vld [vmem:[#allocation8 + $0x1b4] sm:$0xf] }
 0x303   : > { %4381 = vmatmul.msk.bf16.gmra.mxu3 %vm1470_vm10, %v2007_v5  ;;  %4383 = vmatmul.msk.bf16.gmra.mxu0 %vm1470_vm10, %v2007_v5  ;;  %v2224_v5 = vsel %vm696_vm3, %v2215_v39, %v2223_v8  ;;  %v4570_v39 = vld [vmem:[#allocation8 + $0x168] sm:$0xf0] }
 0x304   : > { %v4573_v10 = vor.u32 %v5281_v7, %v4570_v39  ;;  %2798 = vmatpush.bf16.msra.mxu0 %v4633_v9  ;;  %v5275_v7 = vld [vmem:[#allocation8 + $0x134] sm:$0xf]  ;;  %v4546_v39 = vld [vmem:[#allocation8 + $0x138] sm:$0xf0] }
 0x305   : > { %2382 = vmatpush.bf16.msrb.mxu1 %v4483_v19  ;;  %2400 = vmatpush.bf16.msra.mxu2 %v4487_v20  ;;  %v5296_v20 = vld [vmem:[#allocation8 + $0x1d4] sm:$0xf0]  ;;  %v4549_v11 = vor.u32 %v5275_v7, %v4546_v39  ;;  %v6295_v7 = vadd.s32 4294967292, %v5879_v61 }
 0x307   : > { %vm2463_vm11 = vcmp.ge.s32.totalorder %v6295_v7, 0 }
 0x308   : > { %4345 = vmatmul.msk.bf16.gmra.mxu1 %vm1470_vm10, %v1919_v26  ;;  %4347 = vmatmul.msk.bf16.gmra.mxu2 %vm1470_vm10, %v1919_v26 }
 0x313   : > { %4468 = vmatmul.msk.bf16.vlgmr.msrb.gmra.mxu3 %vm1470_vm10, %v2224_v5  ;;  %4470 = vmatmul.msk.bf16.vlgmr.msrb.gmra.mxu0 %vm1470_vm10, %v2224_v5  ;;  %v4560_v5 = vld [vmem:[#allocation8 + $0x150] sm:$0xf] }
 0x314   : > { %v4561_v19 = vor.u32 %v5280_v16, %v4560_v5 }
 0x316   : > { %2785 = vmatpush.bf16.msra.mxu3 %v4561_v19  ;;  %v5274_v19 = vld [vmem:[#allocation8 + $0x124] sm:$0xf0] }
 0x318   : > { %4424 = vmatmul.msk.bf16.vlgmr.msra.gmra.mxu1 %vm1470_vm10, %v2106_v21  ;;  %4426 = vmatmul.msk.bf16.vlgmr.msrb.gmra.mxu2 %vm1470_vm10, %v2106_v21  ;;  %v5279_v21 = vld [vmem:[#allocation8 + $0x154] sm:$0xf] }
 0x319   : > { %2811 = vmatpush.bf16.msra.mxu1 %v4581_v57  ;;  %2825 = vmatpush.bf16.msrb.mxu2 %v4645_v60  ;;  %v4565_v24 = vor.u32 %v5279_v21, %v4562_v41  ;;  %v4557_v57 = vor.u32 %v5277_v50, %v4554_v53  ;;  %v4621_v60 = vor.u32 %v5293_v56, %v4618_v58  ;;  %v5288_v56 = vld [vmem:[#allocation8 + $0x194] sm:$0xf0]  ;;  %v4530_v58 = vld [vmem:[#allocation8 + $0x118] sm:$0xf0] }
 0x31d   : > { %2812 = vmatpush.bf16.msra.mxu1 %v4573_v10  ;;  %2826 = vmatpush.bf16.msrb.mxu2 %v4637_v14  ;;  %v4609_v10 = vor.u32 %v5292_v6, %v4608_v4  ;;  %v4610_v14 = vld [vmem:[#allocation8 + $0x1b8] sm:$0xf0]  ;;  %v6292_v6 = vperm.slane %v2417_v49, 0 }
 0x31e   : > { %v4613_v5 = vor.u32 %v5291_v12, %v4610_v14  ;;  %v4594_v4 = vld [vmem:[#allocation8 + $0x198] sm:$0xf0]  ;;  %v5270_v12 = vld [vmem:[#allocation8 + $0x104] sm:$0xf0] }
 0x31f   : > { %v4597_v39 = vor.u32 %v5287_v1, %v4594_v4 }
 0x321   : > { %2813 = vmatpush.bf16.msra.mxu1 %v4565_v24  ;;  %v5273_v24 = vld [vmem:[#allocation8 + $0x124] sm:$0xf] }
 0x323   : > { %4469 = vmatmul.msk.bf16.gmra.mxu3 %vm1470_vm10, %v2223_v8  ;;  %4471 = vmatmul.msk.bf16.gmra.mxu0 %vm1470_vm10, %v2223_v8 }
 0x325   : > { %2814 = vmatpush.bf16.msra.mxu1 %v4557_v57  ;;  %v5271_v57 = vld [vmem:[#allocation8 + $0x114] sm:$0xf] }
 0x326   : > { %v4533_v63 = vor.u32 %v5271_v57, %v4530_v58  ;;  %v4696_v57 = vld [vmem:[#allocation8 + $0x60] sm:$0xf] }
 0x328   : > { %4425 = vmatmul.msk.bf16.gmra.mxu1 %vm1470_vm10, %v2105_v18  ;;  %4427 = vmatmul.msk.bf16.gmra.mxu2 %vm1470_vm10, %v2105_v18  ;;  %v4624_v18 = vld [vmem:[#allocation8 + $0x1d0] sm:$0xf] }
 0x329   : > { %v4625_v23 = vor.u32 %v5296_v20, %v4624_v18  ;;  %v4536_v18 = vld [vmem:[#allocation8 + $0x120] sm:$0xf]  ;;  %2815 = vmatpush.bf16.msra.mxu1 %v4549_v11 }
 0x32a   : > { %v4600_v20 = vld [vmem:[#allocation8 + $0x1a0] sm:$0xf]  ;;  %v4537_v41 = vor.u32 %v5274_v19, %v4536_v18  ;;  %v5269_v18 = vld [vmem:[#allocation8 + $0x104] sm:$0xf] }
 0x32b   : > { %2799 = vmatpush.bf16.msra.mxu0 %v4625_v23  ;;  %v5290_v23 = vld [vmem:[#allocation8 + $0x1a4] sm:$0xf0]  ;;  %v4520_v11 = vld [vmem:[#allocation8 + $0x100] sm:$0xf] }
 0x32f   : > { %2800 = vmatpush.bf16.msra.mxu0 %v4617_v33  ;;  %v4592_v33 = vld [vmem:[#allocation8 + $0x190] sm:$0xf] }
 0x333   : > { %2801 = vmatpush.bf16.msra.mxu0 %v4609_v10 }
 0x338   : > { %4512 = vmatmul.msk.bf16.vlgmr.msrb.gmra.mxu1 %vm1470_vm10, %v2328_v17  ;;  %4514 = vmatmul.msk.bf16.vlgmr.msra.gmra.mxu2 %vm1470_vm10, %v2328_v17  ;;  %v4626_v17 = vld [vmem:[#allocation8 + $0x1d8] sm:$0xf0] }
 0x348   : > { %4513 = vmatmul.msk.bf16.gmra.mxu1 %vm1470_vm10, %v2327_v0  ;;  %4515 = vmatmul.msk.bf16.gmra.mxu2 %vm1470_vm10, %v2327_v0  ;;  %v5295_v0 = vld [vmem:[#allocation8 + $0x1d4] sm:$0xf] }
 0x370   : > { %v6235_v25 = vpop.f32.mrf.mxu0 }
 0x375   : > { %v6237_v13 = vpop.f32.mrf.mxu1 }
 0x376   : > { %v6239_v26 = vpop.f32.mrf.mxu3 }
 0x377   : > { %v2065_v21 = vadd.f32 %v6239_v26, %v6237_v13  ;;  %v4528_v13 = vld [vmem:[#allocation8 + $0x110] sm:$0xf]  ;;  %v5272_v26 = vld [vmem:[#allocation8 + $0x114] sm:$0xf0] }
 0x378   : > { %v6241_v27 = vpop.f32.mrf.mxu0  ;;  %v4529_v53 = vor.u32 %v5272_v26, %v4528_v13  ;;  %v4706_v13 = vld [vmem:[#allocation8 + $0x78] sm:$0xf0] }
 0x37b   : > { %v6243_v52 = vpop.f32.mrf.mxu2 }
 0x37d   : > { %v6245_v3 = vpop.f32.mrf.mxu1 }
 0x37e   : > { %v6247_v28 = vpop.f32.mrf.mxu3 }
 0x380   : > { %v6249_v30 = vpop.f32.mrf.mxu0 }
 0x383   : > { %v6251_v31 = vpop.f32.mrf.mxu2 }
 0x384   : > { %v2085_v26 = vadd.f32 %v6241_v27, %v6251_v31 }
 0x385   : > { %v6253_v32 = vpop.f32.mrf.mxu1 }
 0x386   : > { %v6255_v34 = vpop.f32.mrf.mxu3 }
 0x388   : > { %v2089_v2 = vpop.f32.mrf.mxu0 }
 0x389   : > { %v4629_v2 = vor.u32 %v5295_v0, %v4626_v17  ;;  %v4538_v0 = vld [vmem:[#allocation8 + $0x128] sm:$0xf0] }
 0x38b   : > { %v6257_v37 = vpop.f32.mrf.mxu2  ;;  %2827 = vmatpush.bf16.msrb.mxu2 %v4629_v2  ;;  %v4601_v2 = vor.u32 %v5290_v23, %v4600_v20  ;;  %v4522_v20 = vld [vmem:[#allocation8 + $0x108] sm:$0xf0] }
 0x38d   : > { %v1983_v38 = vpop.f32.mrf.mxu1  ;;  %2802 = vmatpush.bf16.msra.mxu0 %v4601_v2 }
 0x38e   : > { %v2071_v40 = vpop.f32.mrf.mxu3 }
 0x38f   : > { %v4552_v40 = vld [vmem:[#allocation8 + $0x140] sm:$0xf]  ;;  %2828 = vmatpush.bf16.msrb.mxu2 %v4621_v60 }
 0x390   : > { %v6259_v36 = vpop.f32.mrf.mxu0 }
 0x393   : > { %v2001_v42 = vpop.f32.mrf.mxu2  ;;  %2829 = vmatpush.bf16.msrb.mxu2 %v4613_v5 }
 0x394   : > { %v5278_v42 = vld [vmem:[#allocation8 + $0x144] sm:$0xf0] }
 0x395   : > { %v6261_v43 = vpop.f32.mrf.mxu1  ;;  %v4553_v48 = vor.u32 %v5278_v42, %v4552_v40  ;;  %v4541_v40 = vor.u32 %v5273_v24, %v4538_v0  ;;  %v5289_v42 = vld [vmem:[#allocation8 + $0x1a4] sm:$0xf]  ;;  %v4525_v0 = vor.u32 %v5269_v18, %v4522_v20  ;;  %v5264_v18 = vld [vmem:[#allocation8 + $0xd4] sm:$0xf0] }
 0x396   : > { %v6263_v44 = vpop.f32.mrf.mxu3  ;;  %v4605_v50 = vor.u32 %v5289_v42, %v4602_v47  ;;  %v5268_v42 = vld [vmem:[#allocation8 + $0xf4] sm:$0xf0] }
 0x397   : > { %2786 = vmatpush.bf16.msra.mxu3 %v4553_v48  ;;  %v2189_v48 = vadd.f32 %v6261_v43, %v2065_v21  ;;  %2816 = vmatpush.bf16.msra.mxu1 %v4541_v40  ;;  %v4593_v43 = vor.u32 %v5288_v56, %v4592_v33  ;;  %v5285_v21 = vld [vmem:[#allocation8 + $0x184] sm:$0xf]  ;;  %v4768_v40 = vld [vmem:[#allocation8 + $0xf0] sm:$0xf]  ;;  %v4770_v56 = vld [vmem:[#allocation8 + $0xf8] sm:$0xf0] }
 0x398   : > { %v6265_v45 = vpop.f32.mrf.mxu0  ;;  %2830 = vmatpush.bf16.msrb.mxu2 %v4605_v50  ;;  %v5251_v50 = vld [vmem:[#allocation8 + $0x74] sm:$0xf] }
 0x399   : > { %2803 = vmatpush.bf16.msra.mxu0 %v4593_v43  ;;  %v4709_v33 = vor.u32 %v5251_v50, %v4706_v13  ;;  %v4760_v43 = vld [vmem:[#allocation8 + $0xe0] sm:$0xf]  ;;  %v5262_v50 = vld [vmem:[#allocation8 + $0xc4] sm:$0xf0] }
 0x39b   : > { %v6267_v54 = vpop.f32.mrf.mxu2  ;;  %2787 = vmatpush.bf16.msra.mxu3 %v4545_v46  ;;  %v2307_v46 = vadd.f32 %v6263_v44, %v2189_v48  ;;  %2817 = vmatpush.bf16.msra.mxu1 %v4533_v63  ;;  %v4521_v44 = vor.u32 %v5270_v12, %v4520_v11  ;;  %v4769_v48 = vor.u32 %v5268_v42, %v4768_v40  ;;  %v5266_v63 = vld [vmem:[#allocation8 + $0xe4] sm:$0xf0] }
 0x39c   : > { %2831 = vmatpush.bf16.msrb.mxu2 %v4597_v39  ;;  %v4761_v31 = vor.u32 %v5266_v63, %v4760_v43  ;;  %v4698_v39 = vld [vmem:[#allocation8 + $0x68] sm:$0xf0]  ;;  %v2070_v11 = vadd.f32 %v6255_v34, %v6253_v32  ;;  %v4690_v32 = vld [vmem:[#allocation8 + $0x58] sm:$0xf0]  ;;  %v5263_v34 = vld [vmem:[#allocation8 + $0xd4] sm:$0xf] }
 0x39d   : > { %v6269_v62 = vpop.f32.mrf.mxu1  ;;  %v4736_v63 = vld [vmem:[#allocation8 + $0xb0] sm:$0xf] }
 0x39e   : > { %v6271_v8 = vpop.f32.mrf.mxu3 }
 0x39f   : > { %2788 = vmatpush.bf16.msra.mxu3 %v4537_v41  ;;  %v4586_v41 = vld [vmem:[#allocation8 + $0x188] sm:$0xf0]  ;;  %2818 = vmatpush.bf16.msra.mxu1 %v4525_v0 }
 0x3a0   : > { %v6273_v15 = vpop.f32.mrf.mxu0 }
 0x3a3   : > { %v6275_v22 = vpop.f32.mrf.mxu2  ;;  %2789 = vmatpush.bf16.msra.mxu3 %v4529_v53  ;;  %v5267_v53 = vld [vmem:[#allocation8 + $0xf4] sm:$0xf]  ;;  %3040 = vmatpush.bf16.msrb.mxu1 %v4709_v33  ;;  %v4682_v33 = vld [vmem:[#allocation8 + $0x48] sm:$0xf0] }
 0x3a4   : > { %v2192_v1 = vadd.f32 %v6275_v22, %v2085_v26 }
 0x3a5   : > { %v6277_v38 = vpop.f32.mrf.mxu1 }
 0x3a6   : > { %v6279_v35 = vpop.f32.mrf.mxu3  ;;  %v2193_v20 = vadd.f32 %v6277_v38, %v2070_v11  ;;  %v2310_v0 = vadd.f32 %v6265_v45, %v2192_v1  ;;  %v4516_v38 = vsel %vm2463_vm11, 1.0, %v5585_v29  ;;  %v2088_v45 = vadd.f32 %v6249_v30, %v6257_v37  ;;  %v5260_v1 = vld [vmem:[#allocation8 + $0xb4] sm:$0xf0]  ;;  %v5259_v11 = vld [vmem:[#allocation8 + $0xb4] sm:$0xf] }
 0x3a7   : > { %2790 = vmatpush.bf16.msra.mxu3 %v4521_v44 }
 0x3a8   : > { %v2305_v59 = vpop.f32.mrf.mxu0 }
 0x3a9   : > { %v2083_v59 = vadd.f32 %v6235_v25, %v6243_v52  ;;  %v4584_v25 = vld [vmem:[#allocation8 + $0x180] sm:$0xf]  ;;  %v2067_v52 = vadd.f32 %v6247_v28, %v6245_v3  ;;  %v4589_v3 = vor.u32 %v5285_v21, %v4586_v41  ;;  %v4704_v28 = vld [vmem:[#allocation8 + $0x70] sm:$0xf] }
 0x3ab   : > { %v6281_v9 = vpop.f32.mrf.mxu2  ;;  %v2190_v14 = vadd.f32 %v6267_v54, %v2083_v59  ;;  %v2191_v23 = vadd.f32 %v6269_v62, %v2067_v52  ;;  %v5252_v54 = vld [vmem:[#allocation8 + $0x74] sm:$0xf0]  ;;  %2832 = vmatpush.bf16.msrb.mxu2 %v4589_v3  ;;  %v4762_v52 = vld [vmem:[#allocation8 + $0xe8] sm:$0xf0] }
 0x3ac   : > { %v4705_v2 = vor.u32 %v5252_v54, %v4704_v28  ;;  %v4754_v28 = vld [vmem:[#allocation8 + $0xd8] sm:$0xf0]  ;;  %v4680_v54 = vld [vmem:[#allocation8 + $0x40] sm:$0xf] }
 0x3ad   : > { %v2169_v16 = vpop.f32.mrf.mxu1  ;;  %v2308_v62 = vadd.f32 %v6259_v36, %v2190_v14  ;;  %v2309_v58 = vadd.f32 %v6271_v8, %v2191_v23  ;;  %v5250_v36 = vld [vmem:[#allocation8 + $0x64] sm:$0xf0]  ;;  %v4688_v14 = vld [vmem:[#allocation8 + $0x50] sm:$0xf] }
 0x3ae   : > { %v2287_v17 = vpop.f32.mrf.mxu3  ;;  %v5286_v16 = vld [vmem:[#allocation8 + $0x184] sm:$0xf0]  ;;  %3012 = vmatpush.bf16.msrb.mxu3 %v4705_v2  ;;  %v4697_v27 = vor.u32 %v5250_v36, %v4696_v57  ;;  %v4746_v57 = vld [vmem:[#allocation8 + $0xc8] sm:$0xf0] }
 0x3af   : > { %v4585_v19 = vor.u32 %v5286_v16, %v4584_v25  ;;  %v6304_v17 = vperm.slane %v2417_v49, 1  ;;  %v4752_v16 = vld [vmem:[#allocation8 + $0xd0] sm:$0xf]  ;;  %v5246_v2 = vld [vmem:[#allocation8 + $0x44] sm:$0xf0] }
 0x3b0   : > { %v4753_v41 = vor.u32 %v5264_v18, %v4752_v16  ;;  %v4681_v26 = vor.u32 %v5246_v2, %v4680_v54  ;;  %v5257_v54 = vld [vmem:[#allocation8 + $0xa4] sm:$0xf] }
 0x3b1   : > { %2804 = vmatpush.bf16.msra.mxu0 %v4585_v19  ;;  %v5247_v19 = vld [vmem:[#allocation8 + $0x54] sm:$0xf] }
 0x3b2   : > { %3013 = vmatpush.bf16.msrb.mxu3 %v4697_v27  ;;  %v4693_v3 = vor.u32 %v5247_v19, %v4690_v32  ;;  %v4728_v19 = vld [vmem:[#allocation8 + $0xa0] sm:$0xf] }
 0x3b3   : > { %v2187_v60 = vpop.f32.mrf.mxu2 }
 0x3b4   : > { %v4773_v60 = vor.u32 %v5267_v53, %v4770_v56  ;;  %v5261_v53 = vld [vmem:[#allocation8 + $0xc4] sm:$0xf] }
 0x3b5   : > { %v2384_v10 = vpop.f32.mrf.mxu1  ;;  %3026 = vmatpush.bf16.msrb.mxu0 %v4769_v48  ;;  %v4744_v48 = vld [vmem:[#allocation8 + $0xc0] sm:$0xf]  ;;  %v4749_v43 = vor.u32 %v5261_v53, %v4746_v57  ;;  %v4722_v57 = vld [vmem:[#allocation8 + $0x98] sm:$0xf0] }
 0x3b6   : > { %v2411_v5 = vadd.f32 %v2384_v10, %v2307_v46  ;;  %v5249_v46 = vld [vmem:[#allocation8 + $0x64] sm:$0xf]  ;;  %3054 = vmatpush.bf16.msra.mxu2 %v4773_v60  ;;  %v4745_v7 = vor.u32 %v5262_v50, %v4744_v48  ;;  %v2194_v60 = vadd.f32 %v6281_v9, %v2088_v45  ;;  %v4720_v45 = vld [vmem:[#allocation8 + $0x90] sm:$0xf] }
 0x3b7   : > { %v5265_v10 = vld [vmem:[#allocation8 + $0xe4] sm:$0xf]  ;;  %v4701_v25 = vor.u32 %v5249_v46, %v4698_v39  ;;  %v5243_v46 = vld [vmem:[#allocation8 + $0x34] sm:$0xf]  ;;  %v4674_v39 = vld [vmem:[#allocation8 + $0x38] sm:$0xf0] }
 0x3b8   : > { %v6302_v24 = vadd.f32 %v6292_v6, %v2411_v5  ;;  %v5248_v5 = vld [vmem:[#allocation8 + $0x54] sm:$0xf0]  ;;  %v4765_v22 = vor.u32 %v5265_v10, %v4762_v52  ;;  %v2457_v10 = vadd.s32 16, %v5879_v61  ;;  %v2312_v16 = vadd.f32 %v6273_v15, %v2194_v60  ;;  %v5258_v61 = vld [vmem:[#allocation8 + $0xa4] sm:$0xf0] }
 0x3b9   : > { %v4689_v44 = vor.u32 %v5248_v5, %v4688_v14  ;;  %3027 = vmatpush.bf16.msrb.mxu0 %v4761_v31  ;;  %3041 = vmatpush.bf16.msrb.mxu1 %v4701_v25  ;;  %v4737_v14 = vor.u32 %v5260_v1, %v4736_v63  ;;  %v4664_v5 = vld [vmem:[#allocation8 + $0x20] sm:$0xf]  ;;  %v4677_v18 = vor.u32 %v5243_v46, %v4674_v39  ;;  %v5254_v63 = vld [vmem:[#allocation8 + $0x84] sm:$0xf0]  ;;  %v4650_v46 = vld [vmem:[#allocation8 + $0x8] sm:$0xf0] }
 0x3ba   : > { %v6308_v47 = vmul.f32 0.01, %v6302_v24  ;;  %3055 = vmatpush.bf16.msra.mxu2 %v4765_v22  ;;  %v5242_v22 = vld [vmem:[#allocation8 + $0x24] sm:$0xf0] }
 0x3bb   : > { %v2402_v49 = vpop.f32.mrf.mxu2  ;;  %3014 = vmatpush.bf16.msrb.mxu3 %v4689_v44 }
 0x3bc   : > { %v2412_v59 = vadd.f32 %v2402_v49, %v2308_v62  ;;  %v2435_v40 = vmax.f32 %v6302_v24, %v6308_v47  ;;  %v4757_v62 = vor.u32 %v5263_v34, %v4754_v28  ;;  %v5245_v49 = vld [vmem:[#allocation8 + $0x44] sm:$0xf]  ;;  %v2311_v24 = vadd.f32 %v6279_v35, %v2193_v20 }
 0x3bd   : > { %v2386_v4 = vpop.f32.mrf.mxu1  ;;  %3028 = vmatpush.bf16.msrb.mxu0 %v4753_v41  ;;  %3042 = vmatpush.bf16.msrb.mxu1 %v4693_v3  ;;  %v4685_v37 = vor.u32 %v5245_v49, %v4682_v33  ;;  %v5241_v34 = vld [vmem:[#allocation8 + $0x24] sm:$0xf]  ;;  %v4665_v28 = vor.u32 %v5242_v22, %v4664_v5 }
 0x3be   : > { %v2424_v8 = vadd.f32 %v6304_v17, %v2412_v59  ;;  %v2413_v12 = vadd.f32 %v2386_v4, %v2309_v58  ;;  %v4672_v58 = vld [vmem:[#allocation8 + $0x30] sm:$0xf]  ;;  %v5244_v59 = vld [vmem:[#allocation8 + $0x34] sm:$0xf0]  ;;  %3056 = vmatpush.bf16.msra.mxu2 %v4757_v62 }
 0x3bf   : > { %3015 = vmatpush.bf16.msrb.mxu3 %v4681_v26  ;;  %v4673_v9 = vor.u32 %v5244_v59, %v4672_v58  ;;  %v5240_v62 = vld [vmem:[#allocation8 + $0x14] sm:$0xf0] }
 0x3c0   : > { %v2430_v21 = vmul.f32 0.01, %v2424_v8  ;;  %v6320_v23 = vadd.f32 %v6292_v6, %v2413_v12 }
 0x3c1   : > { %3029 = vmatpush.bf16.msrb.mxu0 %v4745_v7  ;;  %3043 = vmatpush.bf16.msrb.mxu1 %v4685_v37  ;;  %v5255_v7 = vld [vmem:[#allocation8 + $0x94] sm:$0xf]  ;;  %v5238_v37 = vld [vmem:[#allocation8 + $0x4] sm:$0xf0] }
 0x3c2   : > { %v2436_v42 = vmax.f32 %v2424_v8, %v2430_v21  ;;  %v2431_v36 = vmul.f32 0.01, %v6320_v23  ;;  %v4738_v8 = vld [vmem:[#allocation8 + $0xb8] sm:$0xf0]  ;;  %3057 = vmatpush.bf16.msra.mxu2 %v4749_v43  ;;  %v4712_v43 = vld [vmem:[#allocation8 + $0x80] sm:$0xf] }
 0x3c3   : > { %v2404_v13 = vpop.f32.mrf.mxu2  ;;  %v4741_v32 = vor.u32 %v5259_v11, %v4738_v8  ;;  %3016 = vmatpush.bf16.msrb.mxu3 %v4673_v9  ;;  %v4714_v9 = vld [vmem:[#allocation8 + $0x88] sm:$0xf0]  ;;  %v4713_v8 = vor.u32 %v5254_v63, %v4712_v43 }
 0x3c4   : > { %v2441_v47 = vpack.c.bf16 %v2436_v42, %v2435_v40  ;;  %v2414_v56 = vadd.f32 %v2404_v13, %v2310_v0  ;;  %v2437_v21 = vmax.f32 %v6320_v23, %v2431_v36  ;;  %v4666_v0 = vld [vmem:[#allocation8 + $0x28] sm:$0xf0]  ;;  %v2462_v40 = vadd.s32 4294967292, %v2457_v10  ;;  %v5256_v13 = vld [vmem:[#allocation8 + $0x94] sm:$0xf0] }
 0x3c5   : > { %v2389_v30 = vpop.f32.mrf.mxu1  ;;  %3030 = vmatpush.bf16.msrb.mxu0 %v4737_v14  ;;  %v4729_v42 = vor.u32 %v5258_v61, %v4728_v19  ;;  %3044 = vmatpush.bf16.msrb.mxu1 %v4677_v18  ;;  %v4669_v50 = vor.u32 %v5241_v34, %v4666_v0  ;;  %v4721_v36 = vor.u32 %v5256_v13, %v4720_v45  ;;  %v5253_v10 = vld [vmem:[#allocation8 + $0x84] sm:$0xf] }
 0x3c6   : > { %v2484_v4 = vunpack.c.l.bf16 %v2441_v47  ;;  %v2485_v27 = vunpack.c.h.bf16 %v2441_v47  ;;  %v2426_v35 = vadd.f32 %v6304_v17, %v2414_v56  ;;  %v2415_v31 = vadd.f32 %v2389_v30, %v2311_v24  ;;  %3058 = vmatpush.bf16.msra.mxu2 %v4741_v32  ;;  %v5239_v24 = vld [vmem:[#allocation8 + $0x14] sm:$0xf]  ;;  %v4658_v47 = vld [vmem:[#allocation8 + $0x18] sm:$0xf0]  ;;  %v4648_v30 = vld [vmem:[#allocation8] sm:$0xf] }
 0x3c7   : > { %3017 = vmatpush.bf16.msrb.mxu3 %v4665_v28  ;;  %vm2468_vm12 = vcmp.lt.s32.totalorder %v2462_v40, 16  ;;  %v4717_v5 = vor.u32 %v5253_v10, %v4714_v9  ;;  %v5313_v10 = vld [vmem:[#allocation8 + $0x264] sm:$0xf]  ;;  %v4826_v9 = vld [vmem:[#allocation8 + $0x268] sm:$0xf0] }
 0x3c8   : > { %v2493_v12 = vmul.f32 %v4516_v38, %v2484_v4  ;;  %v2494_v25 = vmul.f32 %v4516_v38, %v2485_v27  ;;  %v2432_v52 = vmul.f32 0.01, %v2426_v35  ;;  %v6336_v44 = vadd.f32 %v6292_v6, %v2415_v31  ;;  %v4730_v6 = vld [vmem:[#allocation8 + $0xa8] sm:$0xf0]  ;;  %v4656_v38 = vld [vmem:[#allocation8 + $0x10] sm:$0xf] }
 0x3c9   : > { %v4733_v53 = vor.u32 %v5257_v54, %v4730_v6  ;;  %v4657_v56 = vor.u32 %v5240_v62, %v4656_v38  ;;  %3031 = vmatpush.bf16.msrb.mxu0 %v4729_v42  ;;  %3045 = vmatpush.bf16.msrb.mxu1 %v4669_v50  ;;  %v5237_v31 = vld [vmem:[#allocation8 + $0x4] sm:$0xf] }
 0x3ca   : > { %v2499_v20 = vpack.c.bf16 %v2494_v25, %v2493_v12  ;;  %v2438_v41 = vmax.f32 %v2426_v35, %v2432_v52  ;;  %v2433_v23 = vmul.f32 0.01, %v6336_v44  ;;  %v4725_v35 = vor.u32 %v5255_v7, %v4722_v57  ;;  %v5315_v57 = vld [vmem:[#allocation8 + $0x274] sm:$0xf] }
 0x3cb   : > { %v2407_v3 = vpop.f32.mrf.mxu2  ;;  %3059 = vmatpush.bf16.msra.mxu2 %v4733_v53  ;;  %3018 = vmatpush.bf16.msrb.mxu3 %v4657_v56  ;;  %v4517_v12 = vsel %vm2468_vm12, 1.0, %v5585_v29  ;;  %v4653_v25 = vor.u32 %v5237_v31, %v4650_v46  ;;  %v5332_v53 = vld [vmem:[#allocation8 + $0x2f4] sm:$0xf0] }
 0x3cc   : > { %2502 = vst [vmem:[#allocation5 + $0x10] sm:$0xff] %v2499_v20  ;;  %v2442_v2 = vpack.c.bf16 %v2438_v41, %v2437_v21  ;;  %v2416_v15 = vadd.f32 %v2407_v3, %v2312_v16  ;;  %v2439_v4 = vmax.f32 %v6336_v44, %v2433_v23 }
 0x3cd   : > { %v2391_v48 = vpop.f32.mrf.mxu1  ;;  %3032 = vmatpush.bf16.msrb.mxu0 %v4721_v36 }
 0x3ce   : > { %v2486_v26 = vunpack.c.l.bf16 %v2442_v2  ;;  %v2487_v49 = vunpack.c.h.bf16 %v2442_v2  ;;  %v2428_v33 = vadd.f32 %v6304_v17, %v2416_v15  ;;  %v4661_v17 = vor.u32 %v5239_v24, %v4658_v47 }
 0x3cf   : > { %3060 = vmatpush.bf16.msra.mxu2 %v4725_v35 }
 0x3d0   : > { %v2495_v58 = vmul.f32 %v2486_v26, %v5813_v51  ;;  %v2496_v59 = vmul.f32 %v2487_v49, %v5813_v51  ;;  %v2434_v60 = vmul.f32 0.01, %v2428_v33  ;;  %v4649_v51 = vor.u32 %v5238_v37, %v4648_v30  ;;  %3046 = vmatpush.bf16.msrb.mxu1 %v4661_v17  ;;  %v4832_v26 = vld [vmem:[#allocation8 + $0x270] sm:$0xf]  ;;  %v5316_v49 = vld [vmem:[#allocation8 + $0x274] sm:$0xf0] }
 0x3d1   : > { %3033 = vmatpush.bf16.msrb.mxu0 %v4713_v8  ;;  %v4833_v43 = vor.u32 %v5316_v49, %v4832_v26  ;;  %v4890_v8 = vld [vmem:[#allocation8 + $0x2e8] sm:$0xf0]  ;;  %v5325_v49 = vld [vmem:[#allocation8 + $0x2c4] sm:$0xf] }
 0x3d2   : > { %v2500_v1 = vpack.c.bf16 %v2496_v59, %v2495_v58  ;;  %v2440_v27 = vmax.f32 %v2428_v33, %v2434_v60  ;;  %3019 = vmatpush.bf16.msrb.mxu3 %v4649_v51  ;;  %v4896_v33 = vld [vmem:[#allocation8 + $0x2f0] sm:$0xf]  ;;  %v4834_v58 = vld [vmem:[#allocation8 + $0x278] sm:$0xf0]  ;;  %v5331_v59 = vld [vmem:[#allocation8 + $0x2f4] sm:$0xf] }
 0x3d3   : > { %v2409_v39 = vpop.f32.mrf.mxu2  ;;  %v2505_v16 = vld [vmem:[#allocation5 + $0x10] sm:$0xee]  ;;  %3061 = vmatpush.bf16.msra.mxu2 %v4717_v5  ;;  %v4897_v63 = vor.u32 %v5332_v53, %v4896_v33  ;;  %v4837_v46 = vor.u32 %v5315_v57, %v4834_v58  ;;  %v5330_v51 = vld [vmem:[#allocation8 + $0x2e4] sm:$0xf0]  ;;  %v4810_v26 = vld [vmem:[#allocation8 + $0x248] sm:$0xf0] }
 0x3d4   : > { %v2443_v11 = vpack.c.bf16 %v2440_v27, %v2439_v4  ;;  %3047 = vmatpush.bf16.msrb.mxu1 %v4653_v25  ;;  %v2577_v19 = vunpack.c.l.b16 %v2505_v16  ;;  %v6347_v61 = vunpack.c.l.b16 %v2500_v1  ;;  %v2578_v20 = vunpack.c.h.b16 %v2505_v16  ;;  %v4898_v60 = vld [vmem:[#allocation8 + $0x2f8] sm:$0xf0]  ;;  %v5314_v4 = vld [vmem:[#allocation8 + $0x264] sm:$0xf0]  ;;  %v4888_v27 = vld [vmem:[#allocation8 + $0x2e0] sm:$0xf] }
 0x3d5   : > { %v6349_v21 = vunpack.c.h.b16 %v2500_v1  ;;  %v4824_v1 = vld [vmem:[#allocation8 + $0x260] sm:$0xf]  ;;  %v4901_v39 = vor.u32 %v5331_v59, %v4898_v60  ;;  %v5312_v5 = vld [vmem:[#allocation8 + $0x254] sm:$0xf0]  ;;  %v4874_v33 = vld [vmem:[#allocation8 + $0x2c8] sm:$0xf0] }
 0x3d6   : > { %v2488_v52 = vunpack.c.l.bf16 %v2443_v11  ;;  %v2489_v14 = vunpack.c.h.bf16 %v2443_v11  ;;  %v6352_v41 = vpack.c.b16 %v6347_v61, %v2577_v19  ;;  %v5329_v11 = vld [vmem:[#allocation8 + $0x2e4] sm:$0xf]  ;;  %v4825_v25 = vor.u32 %v5314_v4, %v4824_v1  ;;  %v5311_v19 = vld [vmem:[#allocation8 + $0x254] sm:$0xf]  ;;  %v4800_v53 = vld [vmem:[#allocation8 + $0x230] sm:$0xf] }
 0x3d7   : > { %v6355_v32 = vpack.c.b16 %v6349_v21, %v2578_v20  ;;  %v4893_v16 = vor.u32 %v5329_v11, %v4890_v8  ;;  %v4818_v20 = vld [vmem:[#allocation8 + $0x258] sm:$0xf0]  ;;  %v5324_v57 = vld [vmem:[#allocation8 + $0x2b4] sm:$0xf0]  ;;  %v4877_v59 = vor.u32 %v5325_v49, %v4874_v33  ;;  %v4856_v11 = vld [vmem:[#allocation8 + $0x2a0] sm:$0xf] }
 0x3d8   : > { %v2497_v22 = vmul.f32 %v4517_v12, %v2488_v52  ;;  %v2498_v44 = vmul.f32 %v4517_v12, %v2489_v14  ;;  %v2588_v0 = vshrl.u32 %v6352_v41, 16  ;;  %v2591_v3 = vshll.u32 %v6352_v41, 16  ;;  %v4816_v14 = vld [vmem:[#allocation8 + $0x250] sm:$0xf]  ;;  %v5305_v8 = vld [vmem:[#allocation8 + $0x224] sm:$0xf] }
 0x3d9   : > { %v2605_v28 = vshrl.u32 %v6355_v32, 16  ;;  %v2608_v54 = vshll.u32 %v6355_v32, 16  ;;  %v4889_v52 = vor.u32 %v5330_v51, %v4888_v27  ;;  %v2847_v1 = vrot.slane %v6355_v32, 1  ;;  %v4794_v32 = vld [vmem:[#allocation8 + $0x228] sm:$0xf0] }
 0x3da   : > { %v2501_v18 = vpack.c.bf16 %v2498_v44, %v2497_v22  ;;  %v2590_v42 = vrot.slane %v2588_v0, 1  ;;  %v2593_v38 = vrot.slane %v2591_v3, 2  ;;  %v4880_v22 = vld [vmem:[#allocation8 + $0x2d0] sm:$0xf]  ;;  %v4829_v44 = vor.u32 %v5313_v10, %v4826_v9  ;;  %v5327_v3 = vld [vmem:[#allocation8 + $0x2d4] sm:$0xf] }
 0x3db   : > { %v2607_v62 = vrot.slane %v2605_v28, 1  ;;  %v2610_v23 = vrot.slane %v2608_v54, 2  ;;  %v4882_v28 = vld [vmem:[#allocation8 + $0x2d8] sm:$0xf0]  ;;  %v4817_v54 = vor.u32 %v5312_v5, %v4816_v14  ;;  %v4784_v5 = vld [vmem:[#allocation8 + $0x210] sm:$0xf] }
 0x3dc   : > { %2504 = vst [vmem:[#allocation5 + $0x8] sm:$0xff] %v2501_v18  ;;  %v2594_v36 = vor.u32 %v2593_v38, %v2590_v42  ;;  %v5328_v18 = vld [vmem:[#allocation8 + $0x2d4] sm:$0xf0]  ;;  %v4808_v42 = vld [vmem:[#allocation8 + $0x240] sm:$0xf] }
 0x3dd   : > { %v2611_v37 = vor.u32 %v2610_v23, %v2607_v62  ;;  %v5310_v38 = vld [vmem:[#allocation8 + $0x244] sm:$0xf0]  ;;  %v4885_v62 = vor.u32 %v5327_v3, %v4882_v28  ;;  %v4872_v23 = vld [vmem:[#allocation8 + $0x2c0] sm:$0xf]  ;;  %v5319_v3 = vld [vmem:[#allocation8 + $0x294] sm:$0xf] }
 0x3de   : > { %v4850_v28 = vld [vmem:[#allocation8 + $0x298] sm:$0xf0]  ;;  %v4842_v33 = vld [vmem:[#allocation8 + $0x288] sm:$0xf0] }
 0x3e3   : > { %v2540_v34 = vld [vmem:[#allocation5 + $0x8] sm:$0x33] }
 0x3e4   : > { %v2581_v6 = vunpack.c.l.b16 %v2540_v34  ;;  %v2582_v2 = vunpack.c.h.b16 %v2540_v34  ;;  %v2507_v12 = vld [vmem:[#allocation5 + $0x8] sm:$0x11] }
 0x3e5   : > { %v2840_v34 = vunpack.c.l.b16 %v2507_v12  ;;  %v2841_v0 = vunpack.c.h.b16 %v2507_v12  ;;  %v5321_v12 = vld [vmem:[#allocation8 + $0x2a4] sm:$0xf] }
 0x3e6   : > { %v6361_v15 = vpack.c.b16 %v2581_v6, %v2581_v6  ;;  %v6363_v40 = vpack.c.b16 %v2582_v2, %v2582_v2  ;;  %v4881_v6 = vor.u32 %v5328_v18, %v4880_v22  ;;  %v4821_v2 = vor.u32 %v5311_v19, %v4818_v20  ;;  %v5304_v22 = vld [vmem:[#allocation8 + $0x214] sm:$0xf0]  ;;  %v4848_v18 = vld [vmem:[#allocation8 + $0x290] sm:$0xf]  ;;  %v5303_v20 = vld [vmem:[#allocation8 + $0x214] sm:$0xf] }
 0x3e7   : > { %v5320_v19 = vld [vmem:[#allocation8 + $0x294] sm:$0xf0] }
 0x3e8   : > { %v2596_v48 = vshrl.u32 %v6361_v15, 16  ;;  %v2599_v50 = vshll.u32 %v6361_v15, 16  ;;  %v2613_v45 = vshrl.u32 %v6363_v40, 16  ;;  %v2616_v13 = vshll.u32 %v6363_v40, 16 }
 0x3ea   : > { %v2598_v24 = vrot.slane %v2596_v48, 1  ;;  %v2601_v47 = vrot.slane %v2599_v50, 2  ;;  %v2615_v56 = vrot.slane %v2613_v45, 1  ;;  %v2618_v7 = vrot.slane %v2616_v13, 2  ;;  %v5326_v48 = vld [vmem:[#allocation8 + $0x2c4] sm:$0xf0] }
 0x3eb   : > { %v5309_v50 = vld [vmem:[#allocation8 + $0x244] sm:$0xf]  ;;  %v2842_v45 = vpack.c.b16 %v2840_v34, %v2840_v34  ;;  %v2843_v13 = vpack.c.b16 %v2841_v0, %v2841_v0  ;;  %v4786_v0 = vld [vmem:[#allocation8 + $0x218] sm:$0xf0] }
 0x3ec   : > { %v2602_v30 = vor.u32 %v2601_v47, %v2598_v24  ;;  %v2619_v17 = vor.u32 %v2618_v7, %v2615_v56  ;;  %v4809_v24 = vor.u32 %v5310_v38, %v4808_v42  ;;  %v4873_v47 = vor.u32 %v5326_v48, %v4872_v23  ;;  %v5308_v56 = vld [vmem:[#allocation8 + $0x234] sm:$0xf0]  ;;  %v4864_v7 = vld [vmem:[#allocation8 + $0x2b0] sm:$0xf]  ;;  %v5302_v42 = vld [vmem:[#allocation8 + $0x204] sm:$0xf0] }
 0x3ed   : > { %v4813_v58 = vor.u32 %v5309_v50, %v4810_v26  ;;  %v2845_v60 = vrot.slane %v2842_v45, 1  ;;  %v4801_v4 = vor.u32 %v5308_v56, %v4800_v53  ;;  %v4865_v27 = vor.u32 %v5324_v57, %v4864_v7  ;;  %v4840_v38 = vld [vmem:[#allocation8 + $0x280] sm:$0xf]  ;;  %v5301_v50 = vld [vmem:[#allocation8 + $0x204] sm:$0xf] }
 0x3ee   : > { %v2603_v35 = vsel %vm503_vm4, %v2594_v36, %v2602_v30  ;;  %v2620_v31 = vsel %vm503_vm4, %v2611_v37, %v2619_v17  ;;  %v2848_v36 = vrot.slane %v2843_v13, 1  ;;  %v5307_v30 = vld [vmem:[#allocation8 + $0x234] sm:$0xf]  ;;  %v4802_v37 = vld [vmem:[#allocation8 + $0x238] sm:$0xf0]  ;;  %v4789_v23 = vor.u32 %v5303_v20, %v4786_v0 }
 0x3ef   : > { %2791 = vmatmul.bf16.vlgmr.msra.gmra.mxu3 %v2603_v35  ;;  %2805 = vmatmul.bf16.vlgmr.msra.gmra.mxu0 %v2620_v31  ;;  %v5323_v17 = vld [vmem:[#allocation8 + $0x2b4] sm:$0xf]  ;;  %v4853_v48 = vor.u32 %v5319_v3, %v4850_v28  ;;  %v4778_v45 = vld [vmem:[#allocation8 + $0x208] sm:$0xf0]  ;;  %v5317_v13 = vld [vmem:[#allocation8 + $0x284] sm:$0xf] }
 0x3f0   : > { %2819 = vmatmul.bf16.vlgmr.msra.gmra.mxu1 %v2603_v35  ;;  %2833 = vmatmul.bf16.vlgmr.msrb.gmra.mxu2 %v2620_v31  ;;  %v4805_v35 = vor.u32 %v5307_v30, %v4802_v37  ;;  %v4792_v31 = vld [vmem:[#allocation8 + $0x220] sm:$0xf]  ;;  %v2849_v10 = vsel %vm582_vm2, %v2847_v1, %v2848_v36  ;;  %v4960_v53 = vld [vmem:[#allocation8 + $0x370] sm:$0xf]  ;;  %v5364_v56 = vld [vmem:[#allocation8 + $0x3f4] sm:$0xf0]  ;;  %v4781_v30 = vor.u32 %v5301_v50, %v4778_v45 }
 0x3f1   : > { %3275 = vmatpush.bf16.msra.mxu3 %v4833_v43  ;;  %3289 = vmatpush.bf16.msra.mxu0 %v4897_v63  ;;  %v4866_v43 = vld [vmem:[#allocation8 + $0x2b8] sm:$0xf0]  ;;  %v2844_v63 = vrot.slane %v6352_v41, 1  ;;  %v5322_v41 = vld [vmem:[#allocation8 + $0x2a4] sm:$0xf0]  ;;  %v4845_v37 = vor.u32 %v5317_v13, %v4842_v33 }
 0x3f2   : > { %3303 = vmatpush.bf16.msra.mxu1 %v4837_v46  ;;  %3317 = vmatpush.bf16.msrb.mxu2 %v4901_v39  ;;  %v5306_v46 = vld [vmem:[#allocation8 + $0x224] sm:$0xf0]  ;;  %v6373_v39 = vld [vmem:[#allocation5 + $0x10] sm:$0xcc]  ;;  %v4869_v9 = vor.u32 %v5323_v17, %v4866_v43  ;;  %v4857_v14 = vor.u32 %v5322_v41, %v4856_v11  ;;  %v5347_v7 = vld [vmem:[#allocation8 + $0x374] sm:$0xf] }
 0x3f3   : > { %v2846_v51 = vsel %vm582_vm2, %v2844_v63, %v2845_v60  ;;  %v3103_v34 = vunpack.c.l.b16 %v6373_v39  ;;  %v3104_v49 = vunpack.c.h.b16 %v6373_v39  ;;  %v5363_v60 = vld [vmem:[#allocation8 + $0x3f4] sm:$0xf]  ;;  %v5026_v36 = vld [vmem:[#allocation8 + $0x3f8] sm:$0xf0]  ;;  %v4954_v11 = vld [vmem:[#allocation8 + $0x368] sm:$0xf0] }
 0x3f4   : > { %v5029_v39 = vor.u32 %v5363_v60, %v5026_v36  ;;  %v5361_v41 = vld [vmem:[#allocation8 + $0x3e4] sm:$0xf]  ;;  %v5359_v20 = vld [vmem:[#allocation8 + $0x3d4] sm:$0xf]  ;;  %v4936_v28 = vld [vmem:[#allocation8 + $0x340] sm:$0xf] }
 0x3f5   : > { %3276 = vmatpush.bf16.msra.mxu3 %v4825_v25  ;;  %3290 = vmatpush.bf16.msra.mxu0 %v4889_v52  ;;  %v4858_v25 = vld [vmem:[#allocation8 + $0x2a8] sm:$0xf0]  ;;  %v4793_v52 = vor.u32 %v5306_v46, %v4792_v31  ;;  %v6379_v26 = vpack.c.b16 %v6347_v61, %v3103_v34  ;;  %v6384_v43 = vpack.c.b16 %v6349_v21, %v3104_v49  ;;  %v5346_v31 = vld [vmem:[#allocation8 + $0x364] sm:$0xf0]  ;;  %v5010_v34 = vld [vmem:[#allocation8 + $0x3d8] sm:$0xf0] }
 0x3f6   : > { %3304 = vmatpush.bf16.msra.mxu1 %v4829_v44  ;;  %3318 = vmatpush.bf16.msrb.mxu2 %v4893_v16  ;;  %v4797_v44 = vor.u32 %v5305_v8, %v4794_v32  ;;  %v4861_v16 = vor.u32 %v5321_v12, %v4858_v25  ;;  %v5018_v8 = vld [vmem:[#allocation8 + $0x3e8] sm:$0xf0]  ;;  %v4944_v25 = vld [vmem:[#allocation8 + $0x350] sm:$0xf]  ;;  %v5357_v50 = vld [vmem:[#allocation8 + $0x3c4] sm:$0xf] }
 0x3f7   : > { %v3107_v17 = vrot.slane %v6379_v26, 2  ;;  %v3110_v32 = vrot.slane %v6384_v43, 2  ;;  %v5002_v45 = vld [vmem:[#allocation8 + $0x3c8] sm:$0xf0]  ;;  %v5356_v60 = vld [vmem:[#allocation8 + $0x3b4] sm:$0xf0] }
 0x3f8   : > { %v5339_v36 = vld [vmem:[#allocation8 + $0x334] sm:$0xf] }
 0x3f9   : > { %3277 = vmatpush.bf16.msra.mxu3 %v4817_v54  ;;  %3291 = vmatpush.bf16.msra.mxu0 %v4881_v6  ;;  %v4776_v54 = vld [vmem:[#allocation8 + $0x200] sm:$0xf]  ;;  %v4785_v6 = vor.u32 %v5304_v22, %v4784_v5  ;;  %v5021_v22 = vor.u32 %v5361_v41, %v5018_v8  ;;  %v4922_v41 = vld [vmem:[#allocation8 + $0x328] sm:$0xf0]  ;;  %v5353_v8 = vld [vmem:[#allocation8 + $0x3a4] sm:$0xf] }
 0x3fa   : > { %3305 = vmatpush.bf16.msra.mxu1 %v4821_v2  ;;  %3319 = vmatpush.bf16.msrb.mxu2 %v4885_v62  ;;  %v4849_v2 = vor.u32 %v5320_v19, %v4848_v18  ;;  %v5318_v62 = vld [vmem:[#allocation8 + $0x284] sm:$0xf0]  ;;  %v4777_v57 = vor.u32 %v5302_v42, %v4776_v54  ;;  %v5343_v18 = vld [vmem:[#allocation8 + $0x354] sm:$0xf]  ;;  %v4946_v19 = vld [vmem:[#allocation8 + $0x358] sm:$0xf0]  ;;  %v5013_v42 = vor.u32 %v5359_v20, %v5010_v34 }
 0x3fb   : > { %v5342_v54 = vld [vmem:[#allocation8 + $0x344] sm:$0xf0]  ;;  %v4976_v20 = vld [vmem:[#allocation8 + $0x390] sm:$0xf]  ;;  %v5352_v34 = vld [vmem:[#allocation8 + $0x394] sm:$0xf0] }
 0x3fc   : > { %v4937_v33 = vor.u32 %v5342_v54, %v4936_v28  ;;  %v5351_v28 = vld [vmem:[#allocation8 + $0x394] sm:$0xf]  ;;  %v4978_v54 = vld [vmem:[#allocation8 + $0x398] sm:$0xf0] }
 0x3fd   : > { %3278 = vmatpush.bf16.msra.mxu3 %v4809_v24  ;;  %3292 = vmatpush.bf16.msra.mxu0 %v4873_v47  ;;  %v5348_v24 = vld [vmem:[#allocation8 + $0x374] sm:$0xf0]  ;;  %v5024_v47 = vld [vmem:[#allocation8 + $0x3f0] sm:$0xf] }
 0x3fe   : > { %3306 = vmatpush.bf16.msra.mxu1 %v4813_v58  ;;  %3320 = vmatpush.bf16.msrb.mxu2 %v4877_v59  ;;  %v4841_v58 = vor.u32 %v5318_v62, %v4840_v38  ;;  %v4962_v59 = vld [vmem:[#allocation8 + $0x378] sm:$0xf0]  ;;  %v4961_v63 = vor.u32 %v5348_v24, %v4960_v53  ;;  %v5025_v1 = vor.u32 %v5364_v56, %v5024_v47  ;;  %v5000_v38 = vld [vmem:[#allocation8 + $0x3c0] sm:$0xf]  ;;  %v5358_v62 = vld [vmem:[#allocation8 + $0x3c4] sm:$0xf0] }
 0x3ff   : > { %3020 = vmatmul.bf16.vlgmr.msrb.gmra.mxu3 %v2846_v51  ;;  %3034 = vmatmul.bf16.vlgmr.msrb.gmra.mxu0 %v2849_v10  ;;  %v4965_v46 = vor.u32 %v5347_v7, %v4962_v59  ;;  %v5001_v53 = vor.u32 %v5358_v62, %v5000_v38  ;;  %v4928_v24 = vld [vmem:[#allocation8 + $0x330] sm:$0xf]  ;;  %v5340_v47 = vld [vmem:[#allocation8 + $0x334] sm:$0xf0]  ;;  %v3375_v56 = vshrl.u32 %v6379_v26, 16  ;;  %v3378_v7 = vshll.u32 %v6379_v26, 16 }
 0x400   : > { %3048 = vmatmul.bf16.vlgmr.msrb.gmra.mxu1 %v2846_v51  ;;  %3062 = vmatmul.bf16.vlgmr.msra.gmra.mxu2 %v2849_v10  ;;  %v5016_v51 = vld [vmem:[#allocation8 + $0x3e0] sm:$0xf]  ;;  %v5362_v10 = vld [vmem:[#allocation8 + $0x3e4] sm:$0xf0]  ;;  %v4992_v59 = vld [vmem:[#allocation8 + $0x3b0] sm:$0xf] }
 0x401   : > { %3279 = vmatpush.bf16.msra.mxu3 %v4801_v4  ;;  %3293 = vmatpush.bf16.msra.mxu0 %v4865_v27  ;;  %v3108_v4 = vrot.slane %v6361_v15, 2  ;;  %v3111_v27 = vrot.slane %v6363_v40, 2  ;;  %v5017_v12 = vor.u32 %v5362_v10, %v5016_v51  ;;  %v5338_v26 = vld [vmem:[#allocation8 + $0x324] sm:$0xf0]  ;;  %v4984_v10 = vld [vmem:[#allocation8 + $0x3a0] sm:$0xf] }
 0x402   : > { %3307 = vmatpush.bf16.msra.mxu1 %v4805_v35  ;;  %3321 = vmatpush.bf16.msrb.mxu2 %v4869_v9  ;;  %v4952_v35 = vld [vmem:[#allocation8 + $0x360] sm:$0xf]  ;;  %v5345_v9 = vld [vmem:[#allocation8 + $0x364] sm:$0xf] }
 0x403   : > { %v3109_v15 = vsel %vm636_vm1, %v3107_v17, %v3108_v4  ;;  %v4953_v40 = vor.u32 %v5346_v31, %v4952_v35  ;;  %v4957_v5 = vor.u32 %v5345_v9, %v4954_v11  ;;  %v4994_v17 = vld [vmem:[#allocation8 + $0x3b8] sm:$0xf0]  ;;  %v4929_v4 = vor.u32 %v5340_v47, %v4928_v24  ;;  %v4920_v35 = vld [vmem:[#allocation8 + $0x320] sm:$0xf]  ;;  %v5354_v9 = vld [vmem:[#allocation8 + $0x3a4] sm:$0xf0] }
 0x404   : > { %v6397_v31 = vrot.slane %v3375_v56, 2  ;;  %v5337_v11 = vld [vmem:[#allocation8 + $0x324] sm:$0xf]  ;;  %v4970_v47 = vld [vmem:[#allocation8 + $0x388] sm:$0xf0] }
 0x405   : > { %3280 = vmatpush.bf16.msra.mxu3 %v4793_v52  ;;  %3294 = vmatpush.bf16.msra.mxu0 %v4857_v14  ;;  %v5344_v52 = vld [vmem:[#allocation8 + $0x354] sm:$0xf0]  ;;  %v3112_v14 = vsel %vm636_vm1, %v3110_v32, %v3111_v27  ;;  %v4993_v27 = vor.u32 %v5356_v60, %v4992_v59  ;;  %v4986_v32 = vld [vmem:[#allocation8 + $0x3a8] sm:$0xf0]  ;;  %v5349_v24 = vld [vmem:[#allocation8 + $0x384] sm:$0xf] }
 0x406   : > { %3308 = vmatpush.bf16.msra.mxu1 %v4797_v44  ;;  %3322 = vmatpush.bf16.msrb.mxu2 %v4861_v16  ;;  %v5008_v44 = vld [vmem:[#allocation8 + $0x3d0] sm:$0xf]  ;;  %v5360_v16 = vld [vmem:[#allocation8 + $0x3d4] sm:$0xf0]  ;;  %v4945_v0 = vor.u32 %v5344_v52, %v4944_v25  ;;  %v4921_v52 = vor.u32 %v5338_v26, %v4920_v35  ;;  %v5379_v59 = vld [vmem:[#allocation8 + $0x474] sm:$0xf] }
 0x407   : > { %v5009_v3 = vor.u32 %v5360_v16, %v5008_v44  ;;  %v3392_v44 = vshrl.u32 %v6384_v43, 16  ;;  %v3395_v16 = vshll.u32 %v6384_v43, 16  ;;  %v5088_v56 = vld [vmem:[#allocation8 + $0x470] sm:$0xf] }
 0x409   : > { %3281 = vmatpush.bf16.msra.mxu3 %v4785_v6  ;;  %3295 = vmatpush.bf16.msra.mxu0 %v4849_v2  ;;  %v3335_v6 = vld [vmem:[#allocation5 + $0x8] sm:$0x77]  ;;  %v4949_v2 = vor.u32 %v5343_v18, %v4946_v19  ;;  %v4925_v18 = vor.u32 %v5337_v11, %v4922_v41  ;;  %v4989_v19 = vor.u32 %v5353_v8, %v4986_v32  ;;  %v3394_v35 = vrot.slane %v3392_v44, 2  ;;  %v5378_v11 = vld [vmem:[#allocation8 + $0x464] sm:$0xf0] }
 0x40a   : > { %3309 = vmatpush.bf16.msra.mxu1 %v4789_v23  ;;  %3323 = vmatpush.bf16.msrb.mxu2 %v4853_v48  ;;  %v5341_v23 = vld [vmem:[#allocation8 + $0x344] sm:$0xf]  ;;  %v4938_v48 = vld [vmem:[#allocation8 + $0x348] sm:$0xf0]  ;;  %v3370_v13 = vunpack.c.l.b16 %v3335_v6  ;;  %v3371_v49 = vunpack.c.h.b16 %v3335_v6  ;;  %v4904_v6 = vld [vmem:[#allocation8 + $0x300] sm:$0xf] }
 0x40b   : > { %v3397_v26 = vrot.slane %v3395_v16, 3 }
 0x40d   : > { %3282 = vmatpush.bf16.msra.mxu3 %v4777_v57  ;;  %3296 = vmatpush.bf16.msra.mxu0 %v4841_v58  ;;  %v4941_v57 = vor.u32 %v5341_v23, %v4938_v48  ;;  %v5005_v58 = vor.u32 %v5357_v50, %v5002_v45  ;;  %v4977_v23 = vor.u32 %v5352_v34, %v4976_v20  ;;  %v5334_v48 = vld [vmem:[#allocation8 + $0x304] sm:$0xf0]  ;;  %v4968_v50 = vld [vmem:[#allocation8 + $0x380] sm:$0xf]  ;;  %v5376_v20 = vld [vmem:[#allocation8 + $0x454] sm:$0xf0] }
 0x40e   : > { %3310 = vmatpush.bf16.msra.mxu1 %v4781_v30  ;;  %3324 = vmatpush.bf16.msrb.mxu2 %v4845_v37  ;;  %v4930_v30 = vld [vmem:[#allocation8 + $0x338] sm:$0xf0]  ;;  %v5355_v37 = vld [vmem:[#allocation8 + $0x3b4] sm:$0xf]  ;;  %v5350_v45 = vld [vmem:[#allocation8 + $0x384] sm:$0xf0]  ;;  %v4905_v60 = vor.u32 %v5334_v48, %v4904_v6 }
 0x40f   : > { %v4997_v51 = vor.u32 %v5355_v37, %v4994_v17  ;;  %v5395_v37 = vld [vmem:[#allocation8 + $0x4f4] sm:$0xf]  ;;  %v5154_v17 = vld [vmem:[#allocation8 + $0x4f8] sm:$0xf0] }
 0x410   : > { %3283 = vmatmul.bf16.vlgmr.msra.gmra.mxu3 %v3109_v15  ;;  %3297 = vmatmul.bf16.vlgmr.msra.gmra.mxu0 %v3112_v14  ;;  %v5157_v8 = vor.u32 %v5395_v37, %v5154_v17  ;;  %v5391_v6 = vld [vmem:[#allocation8 + $0x4d4] sm:$0xf]  ;;  %v5122_v17 = vld [vmem:[#allocation8 + $0x4b8] sm:$0xf0] }
 0x411   : > { %3570 = vmatpush.bf16.msrb.mxu3 %v4961_v63  ;;  %3584 = vmatpush.bf16.msrb.mxu0 %v5025_v1  ;;  %v6393_v63 = vpack.c.b16 %v3370_v13, %v3370_v13  ;;  %v6395_v1 = vpack.c.b16 %v3371_v49, %v3371_v49  ;;  %v4981_v49 = vor.u32 %v5351_v28, %v4978_v54  ;;  %v5375_v28 = vld [vmem:[#allocation8 + $0x454] sm:$0xf]  ;;  %v5074_v54 = vld [vmem:[#allocation8 + $0x458] sm:$0xf0] }
 0x412   : > { %3598 = vmatpush.bf16.msrb.mxu1 %v4965_v46  ;;  %3612 = vmatpush.bf16.msra.mxu2 %v5029_v39  ;;  %v6399_v46 = vrot.slane %v3378_v7, 3  ;;  %v4933_v39 = vor.u32 %v5339_v36, %v4930_v30  ;;  %v5380_v7 = vld [vmem:[#allocation8 + $0x474] sm:$0xf0]  ;;  %v4969_v36 = vor.u32 %v5350_v45, %v4968_v50  ;;  %v5090_v30 = vld [vmem:[#allocation8 + $0x478] sm:$0xf0] }
 0x413   : > { %3311 = vmatmul.bf16.vlgmr.msra.gmra.mxu1 %v3109_v15  ;;  %3325 = vmatmul.bf16.vlgmr.msrb.gmra.mxu2 %v3112_v14  ;;  %v3383_v15 = vshrl.u32 %v6393_v63, 16  ;;  %v3403_v25 = vshll.u32 %v6395_v1, 16  ;;  %v4985_v14 = vor.u32 %v5354_v9, %v4984_v10  ;;  %v5080_v9 = vld [vmem:[#allocation8 + $0x460] sm:$0xf]  ;;  %v5093_v41 = vor.u32 %v5379_v59, %v5090_v30  ;;  %v5390_v45 = vld [vmem:[#allocation8 + $0x4c4] sm:$0xf0] }
 0x414   : > { %v5081_v16 = vor.u32 %v5378_v11, %v5080_v9  ;;  %v5128_v50 = vld [vmem:[#allocation8 + $0x4c0] sm:$0xf]  ;;  %v5120_v59 = vld [vmem:[#allocation8 + $0x4b0] sm:$0xf]  ;;  %v5058_v30 = vld [vmem:[#allocation8 + $0x438] sm:$0xf0] }
 0x415   : > { %3571 = vmatpush.bf16.msrb.mxu3 %v4953_v40  ;;  %3585 = vmatpush.bf16.msrb.mxu0 %v5017_v12  ;;  %v3386_v40 = vshll.u32 %v6393_v63, 16  ;;  %v3400_v12 = vshrl.u32 %v6395_v1, 16  ;;  %v6409_v62 = vrot.slane %v3403_v25, 3  ;;  %v3381_v25 = vor.u32 %v6399_v46, %v6397_v31  ;;  %v5136_v46 = vld [vmem:[#allocation8 + $0x4d0] sm:$0xf] }
 0x416   : > { %3599 = vmatpush.bf16.msrb.mxu1 %v4957_v5  ;;  %3613 = vmatpush.bf16.msra.mxu2 %v5021_v22  ;;  %v4912_v5 = vld [vmem:[#allocation8 + $0x310] sm:$0xf]  ;;  %v5336_v22 = vld [vmem:[#allocation8 + $0x314] sm:$0xf0]  ;;  %v5387_v37 = vld [vmem:[#allocation8 + $0x4b4] sm:$0xf] }
 0x417   : > { %v6407_v38 = vrot.slane %v3400_v12, 2  ;;  %v4913_v43 = vor.u32 %v5336_v22, %v4912_v5  ;;  %v5377_v12 = vld [vmem:[#allocation8 + $0x464] sm:$0xf]  ;;  %v5146_v5 = vld [vmem:[#allocation8 + $0x4e8] sm:$0xf0]  ;;  %v3398_v22 = vor.u32 %v3397_v26, %v3394_v35 }
 0x418   : > { %v5048_v35 = vld [vmem:[#allocation8 + $0x420] sm:$0xf]  ;;  %v5370_v26 = vld [vmem:[#allocation8 + $0x424] sm:$0xf0]  ;;  %v5369_v11 = vld [vmem:[#allocation8 + $0x424] sm:$0xf] }
 0x419   : > { %3572 = vmatpush.bf16.msrb.mxu3 %v4945_v0  ;;  %3586 = vmatpush.bf16.msrb.mxu0 %v5009_v3  ;;  %v5335_v0 = vld [vmem:[#allocation8 + $0x314] sm:$0xf]  ;;  %v4914_v3 = vld [vmem:[#allocation8 + $0x318] sm:$0xf0]  ;;  %v3406_v32 = vor.u32 %v6409_v62, %v6407_v38  ;;  %v5064_v62 = vld [vmem:[#allocation8 + $0x440] sm:$0xf] }
 0x41a   : > { %3600 = vmatpush.bf16.msrb.mxu1 %v4949_v2  ;;  %3614 = vmatpush.bf16.msra.mxu2 %v5013_v42  ;;  %v3385_v2 = vrot.slane %v3383_v15, 2  ;;  %v3388_v42 = vrot.slane %v3386_v40, 3  ;;  %v4917_v13 = vor.u32 %v5335_v0, %v4914_v3  ;;  %v5144_v15 = vld [vmem:[#allocation8 + $0x4e0] sm:$0xf]  ;;  %v5394_v40 = vld [vmem:[#allocation8 + $0x4e4] sm:$0xf0] }
 0x41b   : > { %v3407_v34 = vsel %vm696_vm3, %v3398_v22, %v3406_v32  ;;  %v5392_v3 = vld [vmem:[#allocation8 + $0x4d4] sm:$0xf0]  ;;  %v5386_v9 = vld [vmem:[#allocation8 + $0x4a4] sm:$0xf0]  ;;  %v5114_v32 = vld [vmem:[#allocation8 + $0x4a8] sm:$0xf0] }
 0x41c   : > { %v3389_v10 = vor.u32 %v3388_v42, %v3385_v2  ;;  %v5138_v2 = vld [vmem:[#allocation8 + $0x4d8] sm:$0xf0]  ;;  %v5137_v38 = vor.u32 %v5392_v3, %v5136_v46  ;;  %v5104_v22 = vld [vmem:[#allocation8 + $0x490] sm:$0xf]  ;;  %v5032_v46 = vld [vmem:[#allocation8 + $0x400] sm:$0xf] }
 0x41d   : > { %3573 = vmatpush.bf16.msrb.mxu3 %v4937_v33  ;;  %3587 = vmatpush.bf16.msrb.mxu0 %v5001_v53  ;;  %v5333_v33 = vld [vmem:[#allocation8 + $0x304] sm:$0xf]  ;;  %v4906_v53 = vld [vmem:[#allocation8 + $0x308] sm:$0xf0]  ;;  %v5141_v48 = vor.u32 %v5391_v6, %v5138_v2  ;;  %v5366_v3 = vld [vmem:[#allocation8 + $0x404] sm:$0xf0] }
 0x41e   : > { %3601 = vmatpush.bf16.msrb.mxu1 %v4941_v57  ;;  %3615 = vmatpush.bf16.msra.mxu2 %v5005_v58  ;;  %v5152_v57 = vld [vmem:[#allocation8 + $0x4f0] sm:$0xf]  ;;  %v5396_v58 = vld [vmem:[#allocation8 + $0x4f4] sm:$0xf0]  ;;  %v3390_v44 = vsel %vm696_vm3, %v3381_v25, %v3389_v10  ;;  %v5112_v10 = vld [vmem:[#allocation8 + $0x4a0] sm:$0xf] }
 0x41f   : > { %v5368_v25 = vld [vmem:[#allocation8 + $0x414] sm:$0xf0]  ;;  %v5096_v2 = vld [vmem:[#allocation8 + $0x480] sm:$0xf] }
 0x421   : > { %3574 = vmatpush.bf16.msrb.mxu3 %v4929_v4  ;;  %3588 = vmatpush.bf16.msrb.mxu0 %v4993_v27  ;;  %v4909_v4 = vor.u32 %v5333_v33, %v4906_v53  ;;  %v4973_v27 = vor.u32 %v5349_v24, %v4970_v47  ;;  %v5389_v33 = vld [vmem:[#allocation8 + $0x4c4] sm:$0xf]  ;;  %v5130_v53 = vld [vmem:[#allocation8 + $0x4c8] sm:$0xf0]  ;;  %v5129_v47 = vor.u32 %v5390_v45, %v5128_v50 }
 0x422   : > { %3602 = vmatpush.bf16.msrb.mxu1 %v4933_v39  ;;  %3616 = vmatpush.bf16.msra.mxu2 %v4997_v51  ;;  %v5089_v39 = vor.u32 %v5380_v7, %v5088_v56  ;;  %v5153_v51 = vor.u32 %v5396_v58, %v5152_v57  ;;  %v5056_v56 = vld [vmem:[#allocation8 + $0x430] sm:$0xf]  ;;  %v5372_v7 = vld [vmem:[#allocation8 + $0x434] sm:$0xf0]  ;;  %v5133_v58 = vor.u32 %v5389_v33, %v5130_v53  ;;  %v3670_v53 = vrot.slane %v6393_v63, 3 }
 0x423   : > { %v5033_v50 = vor.u32 %v5366_v3, %v5032_v46 }
 0x425   : > { %3575 = vmatpush.bf16.msrb.mxu3 %v4921_v52  ;;  %3589 = vmatpush.bf16.msrb.mxu0 %v4985_v14  ;;  %v5082_v52 = vld [vmem:[#allocation8 + $0x468] sm:$0xf0]  ;;  %v5393_v14 = vld [vmem:[#allocation8 + $0x4e4] sm:$0xf] }
 0x426   : > { %3603 = vmatpush.bf16.msrb.mxu1 %v4925_v18  ;;  %3617 = vmatpush.bf16.msra.mxu2 %v4989_v19  ;;  %v5145_v18 = vor.u32 %v5394_v40, %v5144_v15  ;;  %v5072_v19 = vld [vmem:[#allocation8 + $0x450] sm:$0xf]  ;;  %v5085_v0 = vor.u32 %v5377_v12, %v5082_v52  ;;  %v5149_v31 = vor.u32 %v5393_v14, %v5146_v5  ;;  %v3630_v52 = vld [vmem:[#allocation5 + $0x10] sm:$0x88] }
 0x427   : > { %v5073_v42 = vor.u32 %v5376_v20, %v5072_v19  ;;  %v5049_v15 = vor.u32 %v5370_v26, %v5048_v35  ;;  %v5113_v40 = vor.u32 %v5386_v9, %v5112_v10  ;;  %v5040_v12 = vld [vmem:[#allocation8 + $0x410] sm:$0xf]  ;;  %v5383_v19 = vld [vmem:[#allocation8 + $0x494] sm:$0xf]  ;;  %v5106_v20 = vld [vmem:[#allocation8 + $0x498] sm:$0xf0] }
 0x428   : > { %v5109_v6 = vor.u32 %v5383_v19, %v5106_v20 }
 0x429   : > { %3576 = vmatpush.bf16.msrb.mxu3 %v4913_v43  ;;  %3590 = vmatpush.bf16.msrb.mxu0 %v4977_v23  ;;  %v5374_v43 = vld [vmem:[#allocation8 + $0x444] sm:$0xf0]  ;;  %v5077_v23 = vor.u32 %v5375_v28, %v5074_v54  ;;  %v3666_v28 = vunpack.c.h.b16 %v3630_v52 }
 0x42a   : > { %3604 = vmatpush.bf16.msrb.mxu1 %v4917_v13  ;;  %3618 = vmatpush.bf16.msra.mxu2 %v4981_v49  ;;  %v5373_v13 = vld [vmem:[#allocation8 + $0x444] sm:$0xf]  ;;  %v5066_v49 = vld [vmem:[#allocation8 + $0x448] sm:$0xf0]  ;;  %v5065_v24 = vor.u32 %v5374_v43, %v5064_v62 }
 0x42b   : > { %v5069_v57 = vor.u32 %v5373_v13, %v5066_v49  ;;  %v5034_v62 = vld [vmem:[#allocation8 + $0x408] sm:$0xf0]  ;;  %v5381_v43 = vld [vmem:[#allocation8 + $0x484] sm:$0xf]  ;;  %v3668_v13 = vpack.c.b16 %v6349_v21, %v3666_v28 }
 0x42d   : > { %3577 = vmatpush.bf16.msrb.mxu3 %v4905_v60  ;;  %3591 = vmatpush.bf16.msrb.mxu0 %v4969_v36  ;;  %v5388_v60 = vld [vmem:[#allocation8 + $0x4b4] sm:$0xf0]  ;;  %v5371_v36 = vld [vmem:[#allocation8 + $0x434] sm:$0xf] }
 0x42e   : > { %3605 = vmatpush.bf16.msrb.mxu1 %v4909_v4  ;;  %3619 = vmatpush.bf16.msra.mxu2 %v4973_v27  ;;  %v5057_v4 = vor.u32 %v5372_v7, %v5056_v56  ;;  %v5121_v27 = vor.u32 %v5388_v60, %v5120_v59  ;;  %v3672_v56 = vrot.slane %v3668_v13, 3 }
 0x430   : > { %3578 = vmatmul.bf16.vlgmr.msrb.gmra.mxu3 %v3390_v44  ;;  %3592 = vmatmul.bf16.vlgmr.msrb.gmra.mxu0 %v3407_v34 }
 0x431   : > { %3837 = vmatpush.bf16.msra.mxu3 %v5089_v39  ;;  %3851 = vmatpush.bf16.msra.mxu0 %v5153_v51  ;;  %v5061_v39 = vor.u32 %v5371_v36, %v5058_v30  ;;  %v5125_v51 = vor.u32 %v5387_v37, %v5122_v17 }
 0x432   : > { %3865 = vmatpush.bf16.msra.mxu1 %v5093_v41  ;;  %3879 = vmatpush.bf16.msrb.mxu2 %v5157_v8  ;;  %v5050_v41 = vld [vmem:[#allocation8 + $0x428] sm:$0xf0]  ;;  %v5385_v8 = vld [vmem:[#allocation8 + $0x4a4] sm:$0xf] }
 0x433   : > { %3606 = vmatmul.bf16.vlgmr.msrb.gmra.mxu1 %v3390_v44  ;;  %3620 = vmatmul.bf16.vlgmr.msra.gmra.mxu2 %v3407_v34  ;;  %v5053_v14 = vor.u32 %v5369_v11, %v5050_v41  ;;  %v5117_v5 = vor.u32 %v5385_v8, %v5114_v32  ;;  %v5384_v44 = vld [vmem:[#allocation8 + $0x494] sm:$0xf0]  ;;  %v3665_v34 = vunpack.c.l.b16 %v3630_v52 }
 0x435   : > { %3838 = vmatpush.bf16.msra.mxu3 %v5081_v16  ;;  %3852 = vmatpush.bf16.msra.mxu0 %v5145_v18  ;;  %v5367_v16 = vld [vmem:[#allocation8 + $0x414] sm:$0xf]  ;;  %v5042_v18 = vld [vmem:[#allocation8 + $0x418] sm:$0xf0] }
 0x436   : > { %3866 = vmatpush.bf16.msra.mxu1 %v5085_v0  ;;  %3880 = vmatpush.bf16.msrb.mxu2 %v5149_v31  ;;  %v5041_v0 = vor.u32 %v5368_v25, %v5040_v12  ;;  %v5105_v31 = vor.u32 %v5384_v44, %v5104_v22  ;;  %v5045_v54 = vor.u32 %v5367_v16, %v5042_v18 }
 0x439   : > { %3839 = vmatpush.bf16.msra.mxu3 %v5073_v42  ;;  %3853 = vmatpush.bf16.msra.mxu0 %v5137_v38  ;;  %v5382_v42 = vld [vmem:[#allocation8 + $0x484] sm:$0xf0]  ;;  %v5365_v38 = vld [vmem:[#allocation8 + $0x404] sm:$0xf] }
 0x43a   : > { %3867 = vmatpush.bf16.msra.mxu1 %v5077_v23  ;;  %3881 = vmatpush.bf16.msrb.mxu2 %v5141_v48  ;;  %v5098_v23 = vld [vmem:[#allocation8 + $0x488] sm:$0xf0]  ;;  %v3667_v48 = vpack.c.b16 %v6347_v61, %v3665_v34  ;;  %v5097_v45 = vor.u32 %v5382_v42, %v5096_v2  ;;  %v5037_v49 = vor.u32 %v5365_v38, %v5034_v62 }
 0x43b   : > { %v5101_v33 = vor.u32 %v5381_v43, %v5098_v23 }
 0x43d   : > { %3840 = vmatpush.bf16.msra.mxu3 %v5065_v24  ;;  %3854 = vmatpush.bf16.msra.mxu0 %v5129_v47  ;;  %v3673_v24 = vrot.slane %v6395_v1, 3  ;;  %v3669_v47 = vrot.slane %v3667_v48, 3 }
 0x43e   : > { %3868 = vmatpush.bf16.msra.mxu1 %v5069_v57  ;;  %3882 = vmatpush.bf16.msrb.mxu2 %v5133_v58 }
 0x43f   : > { %v3671_v61 = vsel %vm774_vm5, %v3669_v47, %v3670_v53  ;;  %v3674_v7 = vsel %vm774_vm5, %v3672_v56, %v3673_v24 }
 0x441   : > { %3841 = vmatpush.bf16.msra.mxu3 %v5057_v4  ;;  %3855 = vmatpush.bf16.msra.mxu0 %v5121_v27 }
 0x442   : > { %3869 = vmatpush.bf16.msra.mxu1 %v5061_v39  ;;  %3883 = vmatpush.bf16.msrb.mxu2 %v5125_v51 }
 0x445   : > { %3842 = vmatpush.bf16.msra.mxu3 %v5049_v15  ;;  %3856 = vmatpush.bf16.msra.mxu0 %v5113_v40 }
 0x446   : > { %3870 = vmatpush.bf16.msra.mxu1 %v5053_v14  ;;  %3884 = vmatpush.bf16.msrb.mxu2 %v5117_v5 }
 0x449   : > { %3843 = vmatpush.bf16.msra.mxu3 %v5041_v0  ;;  %3857 = vmatpush.bf16.msra.mxu0 %v5105_v31 }
 0x44a   : > { %3871 = vmatpush.bf16.msra.mxu1 %v5045_v54  ;;  %3885 = vmatpush.bf16.msrb.mxu2 %v5109_v6 }
 0x44d   : > { %3844 = vmatpush.bf16.msra.mxu3 %v5033_v50  ;;  %3858 = vmatpush.bf16.msra.mxu0 %v5097_v45 }
 0x44e   : > { %3872 = vmatpush.bf16.msra.mxu1 %v5037_v49  ;;  %3886 = vmatpush.bf16.msrb.mxu2 %v5101_v33  ;;  %v3897_v49 = vld [vmem:[%s6455_s10] sm:$0x3] }
 0x450   : > { %3845 = vmatmul.bf16.vlgmr.msra.gmra.mxu3 %v3671_v61  ;;  %3859 = vmatmul.bf16.vlgmr.msra.gmra.mxu0 %v3674_v7 }
 0x451   : > { %3873 = vmatmul.bf16.vlgmr.msra.gmra.mxu1 %v3671_v61  ;;  %3887 = vmatmul.bf16.vlgmr.msrb.gmra.mxu2 %v3674_v7 }
 0x46c   : > { %v2806_v21 = vpop.f32.mrf.mxu0 }
 0x46d   : > { %v2820_v58 = vpop.f32.mrf.mxu1 }
 0x472   : > { %v2792_v57 = vpop.f32.mrf.mxu3 }
 0x473   : > { %v2807_v63 = vadd.f32 %v2806_v21, %v2792_v57  ;;  %v2834_v59 = vpop.f32.mrf.mxu2 }
 0x474   : > { %v2835_v1 = vadd.f32 %v2834_v59, %v2820_v58  ;;  %v2808_v60 = vpop.f32.mrf.mxu0  ;;  %v3899_v58 = vperm.slane %v3897_v49, 0 }
 0x475   : > { %v2822_v36 = vpop.f32.mrf.mxu1 }
 0x47a   : > { %v2794_v30 = vpop.f32.mrf.mxu3 }
 0x47b   : > { %v2836_v37 = vpop.f32.mrf.mxu2  ;;  %v2809_v34 = vadd.f32 %v2808_v60, %v2794_v30 }
 0x47c   : > { %v3035_v17 = vpop.f32.mrf.mxu0  ;;  %v2837_v2 = vadd.f32 %v2836_v37, %v2822_v36 }
 0x47d   : > { %v3049_v4 = vpop.f32.mrf.mxu1 }
 0x47e   : > { %v3050_v42 = vadd.f32 %v3049_v4, %v2835_v1 }
 0x482   : > { %v3021_v27 = vpop.f32.mrf.mxu3 }
 0x483   : > { %v3063_v35 = vpop.f32.mrf.mxu2  ;;  %v3022_v19 = vadd.f32 %v3021_v27, %v2807_v63 }
 0x484   : > { %v3037_v26 = vpop.f32.mrf.mxu0  ;;  %v3064_v48 = vadd.f32 %v3063_v35, %v3050_v42  ;;  %v3900_v35 = vperm.slane %v3897_v49, 1 }
 0x485   : > { %v3051_v39 = vpop.f32.mrf.mxu1  ;;  %v3036_v3 = vadd.f32 %v3035_v17, %v3022_v19 }
 0x486   : > { %v3052_v50 = vadd.f32 %v3051_v39, %v2837_v2 }
 0x48a   : > { %v3023_v51 = vpop.f32.mrf.mxu3 }
 0x48b   : > { %v3065_v10 = vpop.f32.mrf.mxu2  ;;  %v3024_v28 = vadd.f32 %v3023_v51, %v2809_v34 }
 0x48c   : > { %v3066_v47 = vadd.f32 %v3065_v10, %v3052_v50 }
 0x48d   : > { %v3298_v9 = vpop.f32.mrf.mxu0  ;;  %v3038_v33 = vadd.f32 %v3037_v26, %v3024_v28 }
 0x490   : > { %v3312_v11 = vpop.f32.mrf.mxu1 }
 0x493   : > { %v3284_v41 = vpop.f32.mrf.mxu3 }
 0x494   : > { %v3299_v0 = vadd.f32 %v3298_v9, %v3284_v41 }
 0x495   : > { %v3300_v32 = vpop.f32.mrf.mxu0 }
 0x496   : > { %v3326_v8 = vpop.f32.mrf.mxu2  ;;  %v3331_v62 = vadd.f32 %v3299_v0, %v3036_v3 }
 0x497   : > { %v3327_v38 = vadd.f32 %v3326_v8, %v3312_v11  ;;  %v3916_v11 = vand.u32 127, %v1311_v55 }
 0x498   : > { %v3314_v15 = vpop.f32.mrf.mxu1 }
 0x499   : > { %v3332_v56 = vadd.f32 %v3327_v38, %v3064_v48  ;;  %vm3919_vm13 = vcmp.lt.s32.totalorder %v3916_v11, 16 }
 0x49b   : > { %v3286_v40 = vpop.f32.mrf.mxu3 }
 0x49c   : > { %v3301_v43 = vadd.f32 %v3300_v32, %v3286_v40 }
 0x49e   : > { %v3328_v12 = vpop.f32.mrf.mxu2  ;;  %v3333_v21 = vadd.f32 %v3301_v43, %v3038_v33 }
 0x49f   : > { %v3329_v45 = vadd.f32 %v3328_v12, %v3314_v15 }
 0x4a1   : > { %v3334_v63 = vadd.f32 %v3329_v45, %v3066_v47 }
 0x4ad   : > { %v3593_v25 = vpop.f32.mrf.mxu0 }
 0x4b0   : > { %v3607_v52 = vpop.f32.mrf.mxu1 }
 0x4b3   : > { %v3579_v14 = vpop.f32.mrf.mxu3 }
 0x4b4   : > { %v3594_v54 = vadd.f32 %v3593_v25, %v3579_v14 }
 0x4b5   : > { %v3595_v22 = vpop.f32.mrf.mxu0 }
 0x4b6   : > { %v3621_v5 = vpop.f32.mrf.mxu2  ;;  %v3626_v53 = vadd.f32 %v3594_v54, %v3331_v62 }
 0x4b7   : > { %v3622_v13 = vadd.f32 %v3621_v5, %v3607_v52  ;;  %v5158_v5 = vsel %vm3919_vm13, 1.0, %v5585_v29 }
 0x4b8   : > { %v3609_v44 = vpop.f32.mrf.mxu1 }
 0x4b9   : > { %v3627_v59 = vadd.f32 %v3622_v13, %v3332_v56 }
 0x4bb   : > { %v3581_v16 = vpop.f32.mrf.mxu3 }
 0x4bc   : > { %v3596_v24 = vadd.f32 %v3595_v22, %v3581_v16 }
 0x4be   : > { %v3623_v18 = vpop.f32.mrf.mxu2  ;;  %v3628_v36 = vadd.f32 %v3596_v24, %v3333_v21 }
 0x4bf   : > { %v3624_v61 = vadd.f32 %v3623_v18, %v3609_v44  ;;  %v3974_v18 = vld [vmem:[%s468_s26] sm:$0x3] }
 0x4c1   : > { %v3629_v4 = vadd.f32 %v3624_v61, %v3334_v63 }
 0x4cd   : > { %v3860_v20 = vpop.f32.mrf.mxu0 }
 0x4ce   : > { %v3874_v31 = vpop.f32.mrf.mxu1 }
 0x4d3   : > { %v3846_v46 = vpop.f32.mrf.mxu3 }
 0x4d4   : > { %v3888_v6 = vpop.f32.mrf.mxu2  ;;  %v3861_v23 = vadd.f32 %v3860_v20, %v3846_v46 }
 0x4d5   : > { %v3889_v7 = vadd.f32 %v3888_v6, %v3874_v31  ;;  %v3862_v1 = vpop.f32.mrf.mxu0 }
 0x4d6   : > { %v3893_v57 = vadd.f32 %v3861_v23, %v3626_v53  ;;  %v3876_v30 = vpop.f32.mrf.mxu1 }
 0x4d7   : > { %v3894_v27 = vadd.f32 %v3889_v7, %v3627_v59 }
 0x4d8   : > { %v3903_v39 = vadd.f32 %v3899_v58, %v3893_v57 }
 0x4d9   : > { %v3904_v41 = vadd.f32 %v3900_v35, %v3894_v27 }
 0x4da   : > { %v3907_v15 = vmul.f32 0.01, %v3903_v39 }
 0x4db   : > { %v3848_v60 = vpop.f32.mrf.mxu3  ;;  %v3908_v25 = vmul.f32 0.01, %v3904_v41 }
 0x4dc   : > { %v3863_v37 = vadd.f32 %v3862_v1, %v3848_v60  ;;  %v3890_v17 = vpop.f32.mrf.mxu2  ;;  %v3911_v52 = vmax.f32 %v3903_v39, %v3907_v15 }
 0x4dd   : > { %v3891_v26 = vadd.f32 %v3890_v17, %v3876_v30  ;;  %v3912_v22 = vmax.f32 %v3904_v41, %v3908_v25 }
 0x4de   : > { %v3895_v51 = vadd.f32 %v3863_v37, %v3628_v36 }
 0x4df   : > { %v3896_v10 = vadd.f32 %v3891_v26, %v3629_v4 }
 0x4e0   : > { %v3905_v9 = vadd.f32 %v3899_v58, %v3895_v51 }
 0x4e1   : > { %v3906_v8 = vadd.f32 %v3900_v35, %v3896_v10 }
 0x4e2   : > { %v3909_v32 = vmul.f32 0.01, %v3905_v9 }
 0x4e3   : > { %v3910_v40 = vmul.f32 0.01, %v3906_v8 }
 0x4e4   : > { %v3913_v12 = vmax.f32 %v3905_v9, %v3909_v32 }
 0x4e5   : > { %v3914_v14 = vmax.f32 %v3906_v8, %v3910_v40 }
 0x4e6   : > { %3939 = vmatpush.msrb.mxu3 %v3913_v12 }
 0x4e8   : > { %3940 = vmatpush.msrb.mxu3 %v3911_v52 }
 0x4e9   : > { %5159 = vmatmul.msk.f32.vlgmr.msrb.gmra.mxu3 %vm545_vm0, %v5158_v5 }
 0x4ea   : > { %3959 = vmatpush.msra.mxu3 %v3914_v14 }
 0x4ec   : > { %3960 = vmatpush.msra.mxu3 %v3912_v22 }
 0x4f1   : > { %5160 = vmatmul.msk.f32.vlgmr.msra.gmra.mxu3 %vm545_vm0, %v5158_v5 }
 0x56c   : > { %v3942_v44 = vpop.f32.mrf.mxu3 }
 0x574   : > { %v3962_v16 = vpop.f32.mrf.mxu3 }
 0x575   : > { %v3977_v19 = vrot.slane %v3962_v16, 7 }
 0x577   : > { %v3979_v20 = vsel %vm3978_vm15, %v3942_v44, %v3977_v19 }
 0x578   : > { %v3981_v34 = vadd.f32 %v3979_v20, %v3974_v18 }
 0x57a   : > { %3986 = vst.msk [vmem:[%s468_s26] sm:$0x3] %vm3971_vm14, %v3981_v34 }
 0x57b PF: > { %s23_s19 = sadd.s32 1, %s5575_s19   ;;  %s6459_s17 = smov %s5571_s18 }
 0x57c   : > { %p20_p8 = scmp.ge.s32.totalorder %s23_s19, 4   ;;  %s6460_s18 = smov %s6462_s21 }
 0x57e   :  { %22 = sbr.rel (!%p20_p8) target bundleno = 3 (0x3), region = 143 }
 0x583   :  { %4014 = vsyncpa [#allocation7], 1 }
 0x584   :  { %4016 = vsyncpa [#allocation7 + $0x1], 1 }
 0x585   :  { %4017 = vsyncpa [#allocation9], 1 }

</bundles_post_ra>
